<compile_context>
chip_gen: v5e
topology: v5e:2x2
jax: 0.10.0
libtpu: 0.0.40
codegen_flags: <defaults>
</compile_context>

<pallas_src>
import functools

import jax
import jax.numpy as jnp
from jax.experimental import pallas as pl
from jax.experimental.pallas import tpu as pltpu

HIGHEST = jax.lax.Precision.HIGHEST  # only for the tiny GN-stats matmuls / ref


def _gn_leaky(h, gm, gamma, beta, eps=1e-5, slope=0.1):
    """GroupNorm + LeakyReLU on a (HW, C) tile.

    gm is a (C, C) block-diagonal matrix with 1/(group_size*HW) inside each
    group, so (1,C)-channel-sums @ gm gives the per-channel group mean.
    These matmuls are (1,C)x(C,C) -> negligible cost, kept at HIGHEST so the
    statistics stay f32-accurate.
    """
    s1 = jnp.sum(h, axis=0, keepdims=True)           # (1, C)
    s2 = jnp.sum(h * h, axis=0, keepdims=True)       # (1, C)
    mean = jnp.dot(s1, gm, precision=HIGHEST, preferred_element_type=jnp.float32)
    ex2 = jnp.dot(s2, gm, precision=HIGHEST, preferred_element_type=jnp.float32)
    var = ex2 - mean * mean
    inv = jax.lax.rsqrt(var + eps)
    y = (h - mean) * inv * gamma + beta
    return jnp.where(y >= 0, y, slope * y)


def dec_block_kernel(x_ref, w1_ref, b1_ref, g1_ref, be1_ref,
                     w2_ref, b2_ref, g2_ref, be2_ref,
                     w3_ref, b3_ref, gm_ref,
                     o_ref, pad_ref, *, H, W, Cin, Cmid, TOP, slope=0.1):
    HW = H * W
    x = x_ref[0]                                      # (HW, Cin)

    # ---- conv1: 1x1 conv == channel matmul (bf16 operands, f32 accum) -----
    h = jnp.dot(x, w1_ref[...], preferred_element_type=jnp.float32) + b1_ref[...]
    h = _gn_leaky(h, gm_ref[...], g1_ref[...], be1_ref[...], slope=slope)

    # ---- conv2: 3x3, padding=1, as ONE K=9*Cmid matmul ---------------------
    # Zero only the halo rows; interior rows are overwritten with h anyway.
    pad_ref[0:TOP, :] = jnp.zeros((TOP, Cmid), jnp.float32)
    pad_ref[TOP + HW:TOP + HW + TOP, :] = jnp.zeros((TOP, Cmid), jnp.float32)
    pad_ref[TOP:TOP + HW, :] = h                      # sublane-aligned store

    xpos = jax.lax.broadcasted_iota(jnp.int32, (HW, 1), 0) % W
    not_left = xpos != 0
    not_right = xpos != (W - 1)

    taps = []
    for dy in range(3):
        for dx in range(3):
            off = TOP + (dy - 1) * W + (dx - 1)       # static row offset
            t = pad_ref[off:off + HW, :]              # (HW, Cmid)
            if dx == 0:                               # left boundary (x-1 < 0)
                t = jnp.where(not_left, t, 0.0)
            elif dx == 2:                             # right boundary (x+1>=W)
                t = jnp.where(not_right, t, 0.0)
            taps.append(t)
    tap_cat = jnp.concatenate(taps, axis=-1)          # (HW, 9*Cmid)
    acc = jnp.dot(tap_cat, w2_ref[...],
                  preferred_element_type=jnp.float32) + b2_ref[...]
    h2 = _gn_leaky(acc, gm_ref[...], g2_ref[...], be2_ref[...], slope=slope)

    # ---- conv3: 1x1 conv + residual + LeakyReLU ----------------------------
    out = jnp.dot(h2, w3_ref[...], preferred_element_type=jnp.float32) + b3_ref[...]
    out = out + x
    o_ref[0] = jnp.where(out >= 0, out, slope * out)


def dec_block(x_nhwc, params, *, groups=16):
    N, H, W, Cin = x_nhwc.shape
    Cmid = params["w1"].shape[1]
    HW = H * W
    gs = Cmid // groups
    TOP = ((W + 1 + 7) // 8) * 8                      # sublane-aligned halo

    # block-diagonal group aggregation matrix (glue, plain JAX)
    grp = jnp.arange(Cmid) // gs
    gm = (grp[:, None] == grp[None, :]).astype(jnp.float32) / float(gs * HW)

    # tap-k-major flattened 3x3 weights: row index = k*Cmid + cin
    w2f = params["w2"].reshape(9 * Cmid, Cmid)

    x_flat = x_nhwc.reshape(N, HW, Cin)

    kernel = functools.partial(dec_block_kernel, H=H, W=W, Cin=Cin,
                               Cmid=Cmid, TOP=TOP)

    def full_spec(arr):
        nd = arr.ndim
        return pl.BlockSpec(arr.shape, lambda n, _nd=nd: (0,) * _nd)

    in_specs = [pl.BlockSpec((1, HW, Cin), lambda n: (n, 0, 0))]
    args = [x_flat]
    consts = [params["w1"], params["b1"], params["g1"], params["be1"],
              w2f, params["b2"], params["g2"], params["be2"],
              params["w3"], params["b3"], gm]
    for a in consts:
        args.append(a)
        in_specs.append(full_spec(a))

    out = pl.pallas_call(
        kernel,
        out_shape=jax.ShapeDtypeStruct((N, HW, Cin), jnp.float32),
        grid_spec=pltpu.PrefetchScalarGridSpec(
            num_scalar_prefetch=0,
            grid=(N,),
            in_specs=in_specs,
            out_specs=pl.BlockSpec((1, HW, Cin), lambda n: (n, 0, 0)),
            scratch_shapes=[pltpu.VMEM((2 * TOP + HW, Cmid), jnp.float32)],
        ),
        compiler_params=pltpu.CompilerParams(dimension_semantics=("parallel",)),
    )(*args)
    return out.reshape(N, H, W, Cin)


# ----------------------------- pure-JAX reference ---------------------------
def reference(x, p, groups=16, eps=1e-5, slope=0.1):
    def leaky(v):
        return jnp.where(v >= 0, v, slope * v)

    def gn(v, gamma, beta):
        n, h, w, c = v.shape
        vg = v.reshape(n, h, w, groups, c // groups)
        mean = vg.mean(axis=(1, 2, 4), keepdims=True)
        var = ((vg - mean) ** 2).mean(axis=(1, 2, 4), keepdims=True)
        vn = ((vg - mean) / jnp.sqrt(var + eps)).reshape(n, h, w, c)
        return vn * gamma.reshape(1, 1, 1, c) + beta.reshape(1, 1, 1, c)

    cmid = p["w1"].shape[1]
    h = jnp.einsum("nhwc,cd->nhwd", x, p["w1"], precision=HIGHEST) + p["b1"].reshape(1, 1, 1, -1)
    h = leaky(gn(h, p["g1"], p["be1"]))
    w2 = p["w2"].reshape(3, 3, cmid, cmid)            # tap k = dy*3+dx -> HWIO
    h = jax.lax.conv_general_dilated(
        h, w2, (1, 1), "SAME",
        dimension_numbers=("NHWC", "HWIO", "NHWC"),
        precision=HIGHEST) + p["b2"].reshape(1, 1, 1, -1)
    h = leaky(gn(h, p["g2"], p["be2"]))
    out = jnp.einsum("nhwc,cd->nhwd", h, p["w3"], precision=HIGHEST) + p["b3"].reshape(1, 1, 1, -1)
    return leaky(out + x)


if __name__ == "__main__":
    N, H, W = 2, 16, 16
    Cin, Cmid = 4, 32          # GroupNorm(16, midc) requires midc % 16 == 0

    key = jax.random.PRNGKey(0)
    keys = jax.random.split(key, 12)
    params = {
        "w1": 0.1 * jax.random.normal(keys[0], (Cin, Cmid), jnp.float32),
        "b1": 0.1 * jax.random.normal(keys[1], (1, Cmid), jnp.float32),
        "g1": 1.0 + 0.1 * jax.random.normal(keys[2], (1, Cmid), jnp.float32),
        "be1": 0.1 * jax.random.normal(keys[3], (1, Cmid), jnp.float32),
        "w2": 0.05 * jax.random.normal(keys[4], (9, Cmid, Cmid), jnp.float32),
        "b2": 0.1 * jax.random.normal(keys[5], (1, Cmid), jnp.float32),
        "g2": 1.0 + 0.1 * jax.random.normal(keys[6], (1, Cmid), jnp.float32),
        "be2": 0.1 * jax.random.normal(keys[7], (1, Cmid), jnp.float32),
        "w3": 0.1 * jax.random.normal(keys[8], (Cmid, Cin), jnp.float32),
        "b3": 0.1 * jax.random.normal(keys[9], (1, Cin), jnp.float32),
    }
    x = jax.random.normal(keys[10], (N, H, W, Cin), jnp.float32)  # NHWC

    out = jax.block_until_ready(dec_block(x, params))
    ref = reference(x, params)

    assert out.shape == ref.shape
    max_err = float(jnp.max(jnp.abs(out - ref)))
    assert jnp.allclose(out, ref, atol=1e-2, rtol=1e-2), f"max_err={max_err}"
    print("KERNEL_OK")
</pallas_src>

<mosaic_0001>
module attributes {stable_mosaic.version = 11 : i64} {
  func.func @dec_block_kernel(%arg0: i32, %arg1: memref<1x256x4xf32, #tpu.memory_space<vmem>>, %arg2: memref<4x32xf32, #tpu.memory_space<vmem>>, %arg3: memref<1x32xf32, #tpu.memory_space<vmem>>, %arg4: memref<1x32xf32, #tpu.memory_space<vmem>>, %arg5: memref<1x32xf32, #tpu.memory_space<vmem>>, %arg6: memref<288x32xf32, #tpu.memory_space<vmem>>, %arg7: memref<1x32xf32, #tpu.memory_space<vmem>>, %arg8: memref<1x32xf32, #tpu.memory_space<vmem>>, %arg9: memref<1x32xf32, #tpu.memory_space<vmem>>, %arg10: memref<32x4xf32, #tpu.memory_space<vmem>>, %arg11: memref<1x4xf32, #tpu.memory_space<vmem>>, %arg12: memref<32x32xf32, #tpu.memory_space<vmem>>, %arg13: memref<1x256x4xf32, #tpu.memory_space<vmem>>, %arg14: memref<304x32xf32, #tpu.memory_space<vmem>>) attributes {dimension_semantics = [#tpu.dimension_semantics<parallel>], iteration_bounds = array<i64: 2>, scalar_prefetch = 0 : i64, scratch_operands = 1 : i64, tpu.core_type = #tpu.core_type<tc>, window_params = [{transform_indices = @transform_0, window_bounds = array<i64: 1, 256, 4>}, {pipeline_mode = #tpu.pipeline_mode<synchronous>, transform_indices = @transform_1, window_bounds = array<i64: 4, 32>}, {pipeline_mode = #tpu.pipeline_mode<synchronous>, transform_indices = @transform_2, window_bounds = array<i64: 1, 32>}, {pipeline_mode = #tpu.pipeline_mode<synchronous>, transform_indices = @transform_3, window_bounds = array<i64: 1, 32>}, {pipeline_mode = #tpu.pipeline_mode<synchronous>, transform_indices = @transform_4, window_bounds = array<i64: 1, 32>}, {pipeline_mode = #tpu.pipeline_mode<synchronous>, transform_indices = @transform_5, window_bounds = array<i64: 288, 32>}, {pipeline_mode = #tpu.pipeline_mode<synchronous>, transform_indices = @transform_6, window_bounds = array<i64: 1, 32>}, {pipeline_mode = #tpu.pipeline_mode<synchronous>, transform_indices = @transform_7, window_bounds = array<i64: 1, 32>}, {pipeline_mode = #tpu.pipeline_mode<synchronous>, transform_indices = @transform_8, window_bounds = array<i64: 1, 32>}, {pipeline_mode = #tpu.pipeline_mode<synchronous>, transform_indices = @transform_9, window_bounds = array<i64: 32, 4>}, {pipeline_mode = #tpu.pipeline_mode<synchronous>, transform_indices = @transform_10, window_bounds = array<i64: 1, 4>}, {pipeline_mode = #tpu.pipeline_mode<synchronous>, transform_indices = @transform_11, window_bounds = array<i64: 32, 32>}, {transform_indices = @transform_12, window_bounds = array<i64: 1, 256, 4>}]} {
    %c0 = arith.constant 0 : index
    %c0_0 = arith.constant 0 : index
    %c0_1 = arith.constant 0 : index
    %0 = vector.load %arg1[%c0, %c0_0, %c0_1] : memref<1x256x4xf32, #tpu.memory_space<vmem>>, vector<1x256x4xf32>
    %1 = vector.shape_cast %0 : vector<1x256x4xf32> to vector<256x4xf32>
    %c0_2 = arith.constant 0 : index
    %c0_3 = arith.constant 0 : index
    %2 = vector.load %arg2[%c0_2, %c0_3] : memref<4x32xf32, #tpu.memory_space<vmem>>, vector<4x32xf32>
    %cst = arith.constant dense<0.000000e+00> : vector<256x32xf32>
    %3 = tpu.matmul %1, %2, %cst {dimension_numbers = #tpu.dot_dimension_numbers<[1], [0], [0], [1], [0, 0, 1, 1], [], []>} : vector<256x4xf32>, vector<4x32xf32>, vector<256x32xf32> -> vector<256x32xf32>
    %c0_4 = arith.constant 0 : index
    %c0_5 = arith.constant 0 : index
    %4 = vector.load %arg3[%c0_4, %c0_5] : memref<1x32xf32, #tpu.memory_space<vmem>>, vector<1x32xf32>
    %5 = vector.broadcast %4 : vector<1x32xf32> to vector<256x32xf32>
    %6 = arith.addf %3, %5 : vector<256x32xf32>
    %c0_6 = arith.constant 0 : index
    %c0_7 = arith.constant 0 : index
    %7 = vector.load %arg12[%c0_6, %c0_7] : memref<32x32xf32, #tpu.memory_space<vmem>>, vector<32x32xf32>
    %c0_8 = arith.constant 0 : index
    %c0_9 = arith.constant 0 : index
    %8 = vector.load %arg4[%c0_8, %c0_9] : memref<1x32xf32, #tpu.memory_space<vmem>>, vector<1x32xf32>
    %c0_10 = arith.constant 0 : index
    %c0_11 = arith.constant 0 : index
    %9 = vector.load %arg5[%c0_10, %c0_11] : memref<1x32xf32, #tpu.memory_space<vmem>>, vector<1x32xf32>
    %cst_12 = arith.constant dense<0.000000e+00> : vector<32xf32>
    %10 = vector.multi_reduction <add>, %6, %cst_12 [0] : vector<256x32xf32> to vector<32xf32>
    %11 = vector.shape_cast %10 : vector<32xf32> to vector<1x32xf32>
    %12 = arith.mulf %6, %6 : vector<256x32xf32>
    %cst_13 = arith.constant dense<0.000000e+00> : vector<32xf32>
    %13 = vector.multi_reduction <add>, %12, %cst_13 [0] : vector<256x32xf32> to vector<32xf32>
    %14 = vector.shape_cast %13 : vector<32xf32> to vector<1x32xf32>
    %cst_14 = arith.constant dense<0.000000e+00> : vector<1x32xf32>
    %15 = tpu.matmul %11, %7, %cst_14 {dimension_numbers = #tpu.dot_dimension_numbers<[1], [0], [0], [1], [0, 0, 1, 1], [], []>, precision = #tpu.contract_precision<fp32>} : vector<1x32xf32>, vector<32x32xf32>, vector<1x32xf32> -> vector<1x32xf32>
    %cst_15 = arith.constant dense<0.000000e+00> : vector<1x32xf32>
    %16 = tpu.matmul %14, %7, %cst_15 {dimension_numbers = #tpu.dot_dimension_numbers<[1], [0], [0], [1], [0, 0, 1, 1], [], []>, precision = #tpu.contract_precision<fp32>} : vector<1x32xf32>, vector<32x32xf32>, vector<1x32xf32> -> vector<1x32xf32>
    %17 = arith.mulf %15, %15 : vector<1x32xf32>
    %18 = arith.subf %16, %17 : vector<1x32xf32>
    %cst_16 = arith.constant 9.99999974E-6 : f32
    %19 = vector.broadcast %cst_16 : f32 to vector<1x32xf32>
    %20 = arith.addf %18, %19 : vector<1x32xf32>
    %21 = math.rsqrt %20 : vector<1x32xf32>
    %22 = vector.broadcast %15 : vector<1x32xf32> to vector<256x32xf32>
    %23 = arith.subf %6, %22 : vector<256x32xf32>
    %24 = vector.broadcast %21 : vector<1x32xf32> to vector<256x32xf32>
    %25 = arith.mulf %23, %24 : vector<256x32xf32>
    %26 = vector.broadcast %8 : vector<1x32xf32> to vector<256x32xf32>
    %27 = arith.mulf %25, %26 : vector<256x32xf32>
    %28 = vector.broadcast %9 : vector<1x32xf32> to vector<256x32xf32>
    %29 = arith.addf %27, %28 : vector<256x32xf32>
    %cst_17 = arith.constant 0.000000e+00 : f32
    %30 = vector.broadcast %cst_17 : f32 to vector<256x32xf32>
    %31 = arith.cmpf oge, %29, %30 : vector<256x32xf32>
    %cst_18 = arith.constant 1.000000e-01 : f32
    %32 = vector.broadcast %cst_18 : f32 to vector<256x32xf32>
    %33 = arith.mulf %32, %29 : vector<256x32xf32>
    %34 = arith.select %31, %29, %33 : vector<256x32xi1>, vector<256x32xf32>
    %cst_19 = arith.constant 0.000000e+00 : f32
    %35 = vector.broadcast %cst_19 : f32 to vector<24x32xf32>
    %c0_20 = arith.constant 0 : index
    %c0_21 = arith.constant 0 : index
    %36 = vector.load %arg14[%c0_20, %c0_21] : memref<304x32xf32, #tpu.memory_space<vmem>>, vector<24x32xf32>
    tpu.vector_store %arg14[%c0_20, %c0_21], %35 {strides = array<i32>} : memref<304x32xf32, #tpu.memory_space<vmem>>, vector<24x32xf32>,
    %cst_22 = arith.constant 0.000000e+00 : f32
    %37 = vector.broadcast %cst_22 : f32 to vector<24x32xf32>
    %c280 = arith.constant 280 : index
    %c0_23 = arith.constant 0 : index
    %38 = vector.load %arg14[%c280, %c0_23] : memref<304x32xf32, #tpu.memory_space<vmem>>, vector<24x32xf32>
    tpu.vector_store %arg14[%c280, %c0_23], %37 {strides = array<i32>} : memref<304x32xf32, #tpu.memory_space<vmem>>, vector<24x32xf32>,
    %c24 = arith.constant 24 : index
    %c0_24 = arith.constant 0 : index
    %39 = vector.load %arg14[%c24, %c0_24] : memref<304x32xf32, #tpu.memory_space<vmem>>, vector<256x32xf32>
    tpu.vector_store %arg14[%c24, %c0_24], %34 {strides = array<i32>} : memref<304x32xf32, #tpu.memory_space<vmem>>, vector<256x32xf32>,
    %40 = tpu.iota {dimensions = array<i32: 0>} : vector<256x1xi32>
    %c16_i32 = arith.constant 16 : i32
    %c0_i32 = arith.constant 0 : i32
    %41 = arith.cmpi eq, %c16_i32, %c0_i32 : i32
    %c1_i32 = arith.constant 1 : i32
    %42 = arith.select %41, %c1_i32, %c16_i32 : i32
    %43 = vector.broadcast %42 : i32 to vector<256x1xi32>
    %44 = arith.remsi %40, %43 : vector<256x1xi32>
    %c0_i32_25 = arith.constant 0 : i32
    %45 = vector.broadcast %c0_i32_25 : i32 to vector<256x1xi32>
    %46 = arith.cmpi ne, %44, %45 : vector<256x1xi32>
    %c0_i32_26 = arith.constant 0 : i32
    %47 = vector.broadcast %c0_i32_26 : i32 to vector<256x1xi32>
    %48 = arith.cmpi slt, %44, %47 : vector<256x1xi32>
    %c0_i32_27 = arith.constant 0 : i32
    %49 = arith.cmpi slt, %42, %c0_i32_27 : i32
    %50 = vector.broadcast %49 : i1 to vector<256x1xi1>
    %51 = vector.broadcast %50 : vector<256x1xi1> to vector<256x1xi1>
    %52 = arith.xori %48, %51 : vector<256x1xi1>
    %53 = arith.andi %52, %46 : vector<256x1xi1>
    %54 = vector.broadcast %42 : i32 to vector<256x1xi32>
    %55 = arith.addi %44, %54 : vector<256x1xi32>
    %56 = arith.select %53, %55, %44 : vector<256x1xi1>, vector<256x1xi32>
    %c0_i32_28 = arith.constant 0 : i32
    %57 = vector.broadcast %c0_i32_28 : i32 to vector<256x1xi32>
    %58 = arith.cmpi ne, %56, %57 : vector<256x1xi32>
    %c15_i32 = arith.constant 15 : i32
    %59 = vector.broadcast %c15_i32 : i32 to vector<256x1xi32>
    %60 = arith.cmpi ne, %56, %59 : vector<256x1xi32>
    %c7 = arith.constant 7 : index
    %c0_29 = arith.constant 0 : index
    %61 = vector.load %arg14[%c7, %c0_29] : memref<304x32xf32, #tpu.memory_space<vmem>>, vector<256x32xf32>
    %cst_30 = arith.constant 0.000000e+00 : f32
    %62 = vector.shape_cast %58 : vector<256x1xi1> to vector<256x1xi1>
    %63 = vector.broadcast %62 : vector<256x1xi1> to vector<256x32xi1>
    %64 = vector.broadcast %cst_30 : f32 to vector<256x32xf32>
    %65 = arith.select %63, %61, %64 : vector<256x32xi1>, vector<256x32xf32>
    %c8 = arith.constant 8 : index
    %c0_31 = arith.constant 0 : index
    %66 = vector.load %arg14[%c8, %c0_31] : memref<304x32xf32, #tpu.memory_space<vmem>>, vector<256x32xf32>
    %c9 = arith.constant 9 : index
    %c0_32 = arith.constant 0 : index
    %67 = vector.load %arg14[%c9, %c0_32] : memref<304x32xf32, #tpu.memory_space<vmem>>, vector<256x32xf32>
    %cst_33 = arith.constant 0.000000e+00 : f32
    %68 = vector.shape_cast %60 : vector<256x1xi1> to vector<256x1xi1>
    %69 = vector.broadcast %68 : vector<256x1xi1> to vector<256x32xi1>
    %70 = vector.broadcast %cst_33 : f32 to vector<256x32xf32>
    %71 = arith.select %69, %67, %70 : vector<256x32xi1>, vector<256x32xf32>
    %c23 = arith.constant 23 : index
    %c0_34 = arith.constant 0 : index
    %72 = vector.load %arg14[%c23, %c0_34] : memref<304x32xf32, #tpu.memory_space<vmem>>, vector<256x32xf32>
    %cst_35 = arith.constant 0.000000e+00 : f32
    %73 = vector.shape_cast %58 : vector<256x1xi1> to vector<256x1xi1>
    %74 = vector.broadcast %73 : vector<256x1xi1> to vector<256x32xi1>
    %75 = vector.broadcast %cst_35 : f32 to vector<256x32xf32>
    %76 = arith.select %74, %72, %75 : vector<256x32xi1>, vector<256x32xf32>
    %c24_36 = arith.constant 24 : index
    %c0_37 = arith.constant 0 : index
    %77 = vector.load %arg14[%c24_36, %c0_37] : memref<304x32xf32, #tpu.memory_space<vmem>>, vector<256x32xf32>
    %c25 = arith.constant 25 : index
    %c0_38 = arith.constant 0 : index
    %78 = vector.load %arg14[%c25, %c0_38] : memref<304x32xf32, #tpu.memory_space<vmem>>, vector<256x32xf32>
    %cst_39 = arith.constant 0.000000e+00 : f32
    %79 = vector.shape_cast %60 : vector<256x1xi1> to vector<256x1xi1>
    %80 = vector.broadcast %79 : vector<256x1xi1> to vector<256x32xi1>
    %81 = vector.broadcast %cst_39 : f32 to vector<256x32xf32>
    %82 = arith.select %80, %78, %81 : vector<256x32xi1>, vector<256x32xf32>
    %c39 = arith.constant 39 : index
    %c0_40 = arith.constant 0 : index
    %83 = vector.load %arg14[%c39, %c0_40] : memref<304x32xf32, #tpu.memory_space<vmem>>, vector<256x32xf32>
    %cst_41 = arith.constant 0.000000e+00 : f32
    %84 = vector.shape_cast %58 : vector<256x1xi1> to vector<256x1xi1>
    %85 = vector.broadcast %84 : vector<256x1xi1> to vector<256x32xi1>
    %86 = vector.broadcast %cst_41 : f32 to vector<256x32xf32>
    %87 = arith.select %85, %83, %86 : vector<256x32xi1>, vector<256x32xf32>
    %c40 = arith.constant 40 : index
    %c0_42 = arith.constant 0 : index
    %88 = vector.load %arg14[%c40, %c0_42] : memref<304x32xf32, #tpu.memory_space<vmem>>, vector<256x32xf32>
    %c41 = arith.constant 41 : index
    %c0_43 = arith.constant 0 : index
    %89 = vector.load %arg14[%c41, %c0_43] : memref<304x32xf32, #tpu.memory_space<vmem>>, vector<256x32xf32>
    %cst_44 = arith.constant 0.000000e+00 : f32
    %90 = vector.shape_cast %60 : vector<256x1xi1> to vector<256x1xi1>
    %91 = vector.broadcast %90 : vector<256x1xi1> to vector<256x32xi1>
    %92 = vector.broadcast %cst_44 : f32 to vector<256x32xf32>
    %93 = arith.select %91, %89, %92 : vector<256x32xi1>, vector<256x32xf32>
    %94 = tpu.concatenate %65, %66, %71, %76, %77, %82, %87, %88, %93 in 1 : vector<256x32xf32>, vector<256x32xf32>, vector<256x32xf32>, vector<256x32xf32>, vector<256x32xf32>, vector<256x32xf32>, vector<256x32xf32>, vector<256x32xf32>, vector<256x32xf32> -> vector<256x288xf32>
    %c0_45 = arith.constant 0 : index
    %c0_46 = arith.constant 0 : index
    %95 = vector.load %arg6[%c0_45, %c0_46] : memref<288x32xf32, #tpu.memory_space<vmem>>, vector<288x32xf32>
    %cst_47 = arith.constant dense<0.000000e+00> : vector<256x32xf32>
    %96 = tpu.matmul %94, %95, %cst_47 {dimension_numbers = #tpu.dot_dimension_numbers<[1], [0], [0], [1], [0, 0, 1, 1], [], []>} : vector<256x288xf32>, vector<288x32xf32>, vector<256x32xf32> -> vector<256x32xf32>
    %c0_48 = arith.constant 0 : index
    %c0_49 = arith.constant 0 : index
    %97 = vector.load %arg7[%c0_48, %c0_49] : memref<1x32xf32, #tpu.memory_space<vmem>>, vector<1x32xf32>
    %98 = vector.broadcast %97 : vector<1x32xf32> to vector<256x32xf32>
    %99 = arith.addf %96, %98 : vector<256x32xf32>
    %c0_50 = arith.constant 0 : index
    %c0_51 = arith.constant 0 : index
    %100 = vector.load %arg12[%c0_50, %c0_51] : memref<32x32xf32, #tpu.memory_space<vmem>>, vector<32x32xf32>
    %c0_52 = arith.constant 0 : index
    %c0_53 = arith.constant 0 : index
    %101 = vector.load %arg8[%c0_52, %c0_53] : memref<1x32xf32, #tpu.memory_space<vmem>>, vector<1x32xf32>
    %c0_54 = arith.constant 0 : index
    %c0_55 = arith.constant 0 : index
    %102 = vector.load %arg9[%c0_54, %c0_55] : memref<1x32xf32, #tpu.memory_space<vmem>>, vector<1x32xf32>
    %cst_56 = arith.constant dense<0.000000e+00> : vector<32xf32>
    %103 = vector.multi_reduction <add>, %99, %cst_56 [0] : vector<256x32xf32> to vector<32xf32>
    %104 = vector.shape_cast %103 : vector<32xf32> to vector<1x32xf32>
    %105 = arith.mulf %99, %99 : vector<256x32xf32>
    %cst_57 = arith.constant dense<0.000000e+00> : vector<32xf32>
    %106 = vector.multi_reduction <add>, %105, %cst_57 [0] : vector<256x32xf32> to vector<32xf32>
    %107 = vector.shape_cast %106 : vector<32xf32> to vector<1x32xf32>
    %cst_58 = arith.constant dense<0.000000e+00> : vector<1x32xf32>
    %108 = tpu.matmul %104, %100, %cst_58 {dimension_numbers = #tpu.dot_dimension_numbers<[1], [0], [0], [1], [0, 0, 1, 1], [], []>, precision = #tpu.contract_precision<fp32>} : vector<1x32xf32>, vector<32x32xf32>, vector<1x32xf32> -> vector<1x32xf32>
    %cst_59 = arith.constant dense<0.000000e+00> : vector<1x32xf32>
    %109 = tpu.matmul %107, %100, %cst_59 {dimension_numbers = #tpu.dot_dimension_numbers<[1], [0], [0], [1], [0, 0, 1, 1], [], []>, precision = #tpu.contract_precision<fp32>} : vector<1x32xf32>, vector<32x32xf32>, vector<1x32xf32> -> vector<1x32xf32>
    %110 = arith.mulf %108, %108 : vector<1x32xf32>
    %111 = arith.subf %109, %110 : vector<1x32xf32>
    %cst_60 = arith.constant 9.99999974E-6 : f32
    %112 = vector.broadcast %cst_60 : f32 to vector<1x32xf32>
    %113 = arith.addf %111, %112 : vector<1x32xf32>
    %114 = math.rsqrt %113 : vector<1x32xf32>
    %115 = vector.broadcast %108 : vector<1x32xf32> to vector<256x32xf32>
    %116 = arith.subf %99, %115 : vector<256x32xf32>
    %117 = vector.broadcast %114 : vector<1x32xf32> to vector<256x32xf32>
    %118 = arith.mulf %116, %117 : vector<256x32xf32>
    %119 = vector.broadcast %101 : vector<1x32xf32> to vector<256x32xf32>
    %120 = arith.mulf %118, %119 : vector<256x32xf32>
    %121 = vector.broadcast %102 : vector<1x32xf32> to vector<256x32xf32>
    %122 = arith.addf %120, %121 : vector<256x32xf32>
    %cst_61 = arith.constant 0.000000e+00 : f32
    %123 = vector.broadcast %cst_61 : f32 to vector<256x32xf32>
    %124 = arith.cmpf oge, %122, %123 : vector<256x32xf32>
    %cst_62 = arith.constant 1.000000e-01 : f32
    %125 = vector.broadcast %cst_62 : f32 to vector<256x32xf32>
    %126 = arith.mulf %125, %122 : vector<256x32xf32>
    %127 = arith.select %124, %122, %126 : vector<256x32xi1>, vector<256x32xf32>
    %c0_63 = arith.constant 0 : index
    %c0_64 = arith.constant 0 : index
    %128 = vector.load %arg10[%c0_63, %c0_64] : memref<32x4xf32, #tpu.memory_space<vmem>>, vector<32x4xf32>
    %cst_65 = arith.constant dense<0.000000e+00> : vector<256x4xf32>
    %129 = tpu.matmul %127, %128, %cst_65 {dimension_numbers = #tpu.dot_dimension_numbers<[1], [0], [0], [1], [0, 0, 1, 1], [], []>} : vector<256x32xf32>, vector<32x4xf32>, vector<256x4xf32> -> vector<256x4xf32>
    %c0_66 = arith.constant 0 : index
    %c0_67 = arith.constant 0 : index
    %130 = vector.load %arg11[%c0_66, %c0_67] : memref<1x4xf32, #tpu.memory_space<vmem>>, vector<1x4xf32>
    %131 = vector.broadcast %130 : vector<1x4xf32> to vector<256x4xf32>
    %132 = arith.addf %129, %131 : vector<256x4xf32>
    %133 = arith.addf %132, %1 : vector<256x4xf32>
    %cst_68 = arith.constant 0.000000e+00 : f32
    %134 = vector.broadcast %cst_68 : f32 to vector<256x4xf32>
    %135 = arith.cmpf oge, %133, %134 : vector<256x4xf32>
    %cst_69 = arith.constant 1.000000e-01 : f32
    %136 = vector.broadcast %cst_69 : f32 to vector<256x4xf32>
    %137 = arith.mulf %136, %133 : vector<256x4xf32>
    %138 = arith.select %135, %133, %137 : vector<256x4xi1>, vector<256x4xf32>
    %c0_70 = arith.constant 0 : index
    %c0_71 = arith.constant 0 : index
    %c0_72 = arith.constant 0 : index
    %139 = vector.load %arg13[%c0_70, %c0_71, %c0_72] : memref<1x256x4xf32, #tpu.memory_space<vmem>>, vector<1x256x4xf32>
    %140 = vector.shape_cast %139 : vector<1x256x4xf32> to vector<256x4xf32>
    %141 = vector.shape_cast %138 : vector<256x4xf32> to vector<1x256x4xf32>
    tpu.vector_store %arg13[%c0_70, %c0_71, %c0_72], %141 {strides = array<i32>} : memref<1x256x4xf32, #tpu.memory_space<vmem>>, vector<1x256x4xf32>,
    return
  }
  func.func @transform_0(%arg0: i32) -> (i32, i32, i32) {
    %c0_i32 = arith.constant 0 : i32
    %c0_i32_0 = arith.constant 0 : i32
    %c0_i32_1 = arith.constant 0 : i32
    return %arg0, %c0_i32, %c0_i32_0 : i32, i32, i32
  }
  func.func @transform_1(%arg0: i32) -> (i32, i32) {
    %c0_i32 = arith.constant 0 : i32
    %c0_i32_0 = arith.constant 0 : i32
    %c0_i32_1 = arith.constant 0 : i32
    return %c0_i32, %c0_i32_0 : i32, i32
  }
  func.func @transform_2(%arg0: i32) -> (i32, i32) {
    %c0_i32 = arith.constant 0 : i32
    %c0_i32_0 = arith.constant 0 : i32
    %c0_i32_1 = arith.constant 0 : i32
    return %c0_i32, %c0_i32_0 : i32, i32
  }
  func.func @transform_3(%arg0: i32) -> (i32, i32) {
    %c0_i32 = arith.constant 0 : i32
    %c0_i32_0 = arith.constant 0 : i32
    %c0_i32_1 = arith.constant 0 : i32
    return %c0_i32, %c0_i32_0 : i32, i32
  }
  func.func @transform_4(%arg0: i32) -> (i32, i32) {
    %c0_i32 = arith.constant 0 : i32
    %c0_i32_0 = arith.constant 0 : i32
    %c0_i32_1 = arith.constant 0 : i32
    return %c0_i32, %c0_i32_0 : i32, i32
  }
  func.func @transform_5(%arg0: i32) -> (i32, i32) {
    %c0_i32 = arith.constant 0 : i32
    %c0_i32_0 = arith.constant 0 : i32
    %c0_i32_1 = arith.constant 0 : i32
    return %c0_i32, %c0_i32_0 : i32, i32
  }
  func.func @transform_6(%arg0: i32) -> (i32, i32) {
    %c0_i32 = arith.constant 0 : i32
    %c0_i32_0 = arith.constant 0 : i32
    %c0_i32_1 = arith.constant 0 : i32
    return %c0_i32, %c0_i32_0 : i32, i32
  }
  func.func @transform_7(%arg0: i32) -> (i32, i32) {
    %c0_i32 = arith.constant 0 : i32
    %c0_i32_0 = arith.constant 0 : i32
    %c0_i32_1 = arith.constant 0 : i32
    return %c0_i32, %c0_i32_0 : i32, i32
  }
  func.func @transform_8(%arg0: i32) -> (i32, i32) {
    %c0_i32 = arith.constant 0 : i32
    %c0_i32_0 = arith.constant 0 : i32
    %c0_i32_1 = arith.constant 0 : i32
    return %c0_i32, %c0_i32_0 : i32, i32
  }
  func.func @transform_9(%arg0: i32) -> (i32, i32) {
    %c0_i32 = arith.constant 0 : i32
    %c0_i32_0 = arith.constant 0 : i32
    %c0_i32_1 = arith.constant 0 : i32
    return %c0_i32, %c0_i32_0 : i32, i32
  }
  func.func @transform_10(%arg0: i32) -> (i32, i32) {
    %c0_i32 = arith.constant 0 : i32
    %c0_i32_0 = arith.constant 0 : i32
    %c0_i32_1 = arith.constant 0 : i32
    return %c0_i32, %c0_i32_0 : i32, i32
  }
  func.func @transform_11(%arg0: i32) -> (i32, i32) {
    %c0_i32 = arith.constant 0 : i32
    %c0_i32_0 = arith.constant 0 : i32
    %c0_i32_1 = arith.constant 0 : i32
    return %c0_i32, %c0_i32_0 : i32, i32
  }
  func.func @transform_12(%arg0: i32) -> (i32, i32, i32) {
    %c0_i32 = arith.constant 0 : i32
    %c0_i32_0 = arith.constant 0 : i32
    %c0_i32_1 = arith.constant 0 : i32
    return %arg0, %c0_i32, %c0_i32_0 : i32, i32, i32
  }
}

</mosaic_0001>

<bundles_post_ra>
// kernel: tpu_custom_call.1
= control target key start
LH: loop header
LB: loop body
LE: loop exit
PB: predicated region body
PF: predicated region fallthrough
CT: control target
= control target key end

     0   :  { %s5781_s21 = smov 0   ;;  %s9085_s0 = inlined_call_operand.vmem [shape: f32[2,256,4], index: 0, kind: input, shape index: {}]   ;;  %s9086_s1 = inlined_call_operand.vmem [shape: f32[4,32], index: 1, kind: input, shape index: {}]   ;;  %s9087_s2 = inlined_call_operand.vmem [shape: f32[1,32], index: 2, kind: input, shape index: {}]   ;;  %s9088_s3 = inlined_call_operand.vmem [shape: f32[1,32], index: 3, kind: input, shape index: {}]   ;;  %s9089_s4 = inlined_call_operand.vmem [shape: f32[1,32], index: 4, kind: input, shape index: {}]   ;;  %s9090_s5 = inlined_call_operand.vmem [shape: f32[288,32], index: 5, kind: input, shape index: {}]   ;;  %s9091_s6 = inlined_call_operand.vmem [shape: f32[1,32], index: 6, kind: input, shape index: {}]   ;;  %s9092_s7 = inlined_call_operand.vmem [shape: f32[1,32], index: 7, kind: input, shape index: {}]   ;;  %s9093_s8 = inlined_call_operand.vmem [shape: f32[1,32], index: 8, kind: input, shape index: {}]   ;;  %s9094_s9 = inlined_call_operand.vmem [shape: f32[32,4], index: 9, kind: input, shape index: {}]   ;;  %s9095_s10 = inlined_call_operand.vmem [shape: f32[1,4], index: 10, kind: input, shape index: {}]   ;;  %s9096_s11 = inlined_call_operand.vmem [shape: f32[32,32], index: 11, kind: input, shape index: {}]   ;;  %s9097_s12 = inlined_call_operand.vmem [shape: f32[2,256,4], index: 12, kind: output, shape index: {}]  }
   0x1 LB: > { %s5048_s22 = sadd.s32 4294967295, %s5710_s21   ;;  %p5052_p0 = scmp.ge.s32.totalorder %s5710_s21, 1  ;;  %s5710_s21 = sphi %s5781_s21, %s22_s21  }
   0x2   : > { %p362_p1 = scmp.lt.s32.totalorder %s5710_s21, 3 }
   0x4   : > { %p363_p2 = pnand %p5052_p0, %p362_p1 }
   0x6   : > { %366 = sbr.rel (%p363_p2) target bundleno = 1721 (0x6b9), region = 68 }
   0xb   : > { %v446_v0 = vld [vmem:[%s9086_s1] sm:$0xf]  ;;  %vm548_vm0 = vcmask 1043456   ;;  %p404_p3 = scmp.lt.s32.totalorder %s5048_s22, 1  ;;  %vm9103_vm1 = vcmask 31744   ;;  %vm9104_vm2 = vcmask 261120  }
   0xc   : > { %5057 = vmatpush.msk.msra.mxu0 %vm548_vm0, %v446_v0  ;;  %5158 = vmatpush.msk.msra.mxu1 %vm548_vm0, %v446_v0  ;;  %v5883_v51 = vld [vmem:[%s9087_s2] ss:$0 sm:$0xff]  ;;  %s5713_s19 = smov 32   ;;  %s5714_s20 = smov 64  }
   0xd   : > { %s9683_s22 = smov (!%p404_p3, %s5048_s22), 1  ;;  %s5715_s23 = smov 96  }
   0xe   : > { %s5156_s25 = sshll.u32 %s9683_s22, 8 }
   0xf   : > { %s5800_s28 = scalar_lea.vmem %s9085_s0, %s5156_s25 }
  0x10   : > { %v414_v1 = vld [vmem:[%s5800_s28] sm:$0xff]  ;;  %v415_v2 = vld [vmem:[%s5800_s28 + $0x8] sm:$0xff]  ;;  %v416_v3 = vld [vmem:[%s5800_s28 + $0x10] sm:$0xff] }
  0x11   : > { %5058 = vmatmul.msk.f32.vlgmr.msra.gmra.mxu0 %vm9103_vm1, %v414_v1  ;;  %v417_v4 = vld [vmem:[%s5800_s28 + $0x18] sm:$0xff]  ;;  %v418_v5 = vld [vmem:[%s5800_s28 + $0x20] sm:$0xff]  ;;  %v419_v6 = vld [vmem:[%s5800_s28 + $0x28] sm:$0xff] }
  0x12   : > { %v420_v7 = vld [vmem:[%s5800_s28 + $0x30] sm:$0xff]  ;;  %v421_v8 = vld [vmem:[%s5800_s28 + $0x38] sm:$0xff]  ;;  %v422_v9 = vld [vmem:[%s5800_s28 + $0x40] sm:$0xff] }
  0x13   : > { %v423_v10 = vld [vmem:[%s5800_s28 + $0x48] sm:$0xff]  ;;  %v424_v11 = vld [vmem:[%s5800_s28 + $0x50] sm:$0xff]  ;;  %v425_v12 = vld [vmem:[%s5800_s28 + $0x58] sm:$0xff] }
  0x14   : > { %v426_v13 = vld [vmem:[%s5800_s28 + $0x60] sm:$0xff]  ;;  %v427_v14 = vld [vmem:[%s5800_s28 + $0x68] sm:$0xff]  ;;  %v428_v15 = vld [vmem:[%s5800_s28 + $0x70] sm:$0xff] }
  0x15   : > { %v429_v16 = vld [vmem:[%s5800_s28 + $0x78] sm:$0xff]  ;;  %v430_v18 = vld [vmem:[%s5800_s28 + $0x80] sm:$0xff]  ;;  %v431_v20 = vld [vmem:[%s5800_s28 + $0x88] sm:$0xff] }
  0x16   : > { %v440_v21 = vld [vmem:[%s5800_s28 + $0xd0] sm:$0xff]  ;;  %v441_v24 = vld [vmem:[%s5800_s28 + $0xd8] sm:$0xff]  ;;  %v442_v27 = vld [vmem:[%s5800_s28 + $0xe0] sm:$0xff] }
  0x17   : > { %5084 = vmatmul.msk.f32.vlgmr.msra.gmra.mxu1 %vm9103_vm1, %v440_v21  ;;  %v432_v23 = vld [vmem:[%s5800_s28 + $0x90] sm:$0xff]  ;;  %v433_v26 = vld [vmem:[%s5800_s28 + $0x98] sm:$0xff]  ;;  %v434_v29 = vld [vmem:[%s5800_s28 + $0xa0] sm:$0xff] }
  0x18   : > { %v443_v30 = vld [vmem:[%s5800_s28 + $0xe8] sm:$0xff]  ;;  %v444_v33 = vld [vmem:[%s5800_s28 + $0xf0] sm:$0xff]  ;;  %v445_v36 = vld [vmem:[%s5800_s28 + $0xf8] sm:$0xff] }
  0x19   : > { %5059 = vmatmul.msk.f32.gmra.mxu0 %vm9103_vm1, %v415_v2  ;;  %v435_v32 = vld [vmem:[%s5800_s28 + $0xa8] sm:$0xff]  ;;  %v436_v35 = vld [vmem:[%s5800_s28 + $0xb0] sm:$0xff]  ;;  %v437_v38 = vld [vmem:[%s5800_s28 + $0xb8] sm:$0xff] }
  0x1a   : > { %v438_v40 = vld [vmem:[%s5800_s28 + $0xc0] sm:$0xff]  ;;  %v439_v42 = vld [vmem:[%s5800_s28 + $0xc8] sm:$0xff] }
  0x1f   : > { %5085 = vmatmul.msk.f32.gmra.mxu1 %vm9103_vm1, %v441_v24 }
  0x21   : > { %5060 = vmatmul.msk.f32.gmra.mxu0 %vm9103_vm1, %v416_v3 }
  0x27   : > { %5086 = vmatmul.msk.f32.gmra.mxu1 %vm9103_vm1, %v442_v27 }
  0x29   : > { %5061 = vmatmul.msk.f32.gmra.mxu0 %vm9103_vm1, %v417_v4 }
  0x2f   : > { %5087 = vmatmul.msk.f32.gmra.mxu1 %vm9103_vm1, %v443_v30 }
  0x31   : > { %5062 = vmatmul.msk.f32.gmra.mxu0 %vm9103_vm1, %v418_v5 }
  0x37   : > { %5088 = vmatmul.msk.f32.gmra.mxu1 %vm9103_vm1, %v444_v33 }
  0x39   : > { %5063 = vmatmul.msk.f32.gmra.mxu0 %vm9103_vm1, %v419_v6 }
  0x3f   : > { %5089 = vmatmul.msk.f32.gmra.mxu1 %vm9103_vm1, %v445_v36 }
  0x41   : > { %5064 = vmatmul.msk.f32.gmra.mxu0 %vm9103_vm1, %v420_v7 }
  0x49   : > { %5065 = vmatmul.msk.f32.gmra.mxu0 %vm9103_vm1, %v421_v8 }
  0x51   : > { %5066 = vmatmul.msk.f32.gmra.mxu0 %vm9103_vm1, %v422_v9 }
  0x59   : > { %5067 = vmatmul.msk.f32.gmra.mxu0 %vm9103_vm1, %v423_v10 }
  0x61   : > { %5068 = vmatmul.msk.f32.gmra.mxu0 %vm9103_vm1, %v424_v11 }
  0x69   : > { %5069 = vmatmul.msk.f32.gmra.mxu0 %vm9103_vm1, %v425_v12 }
  0x71   : > { %5070 = vmatmul.msk.f32.gmra.mxu0 %vm9103_vm1, %v426_v13 }
  0x79   : > { %5071 = vmatmul.msk.f32.gmra.mxu0 %vm9103_vm1, %v427_v14 }
  0x81   : > { %5072 = vmatmul.msk.f32.gmra.mxu0 %vm9103_vm1, %v428_v15 }
  0x89   : > { %5073 = vmatmul.msk.f32.gmra.mxu0 %vm9103_vm1, %v429_v16 }
  0x8e   : > { %v569_v17 = vpop.f32.mrf.mxu0 }
  0x8f   : > { %v5891_v54 = vadd.f32 %v5883_v51, %v569_v17 }
  0x91   : > { %5074 = vmatmul.msk.f32.gmra.mxu0 %vm9103_vm1, %v430_v18  ;;  %v741_v58 = vmul.f32 %v5891_v54, %v5891_v54  ;;  %v672_v62 = vsel %vm9104_vm2, %v5891_v54, 0.0 }
  0x93   : > { %v773_v4 = vsel %vm9104_vm2, %v741_v58, 0.0 }
  0x94   : > { %v5923_v6 = vpop.f32.mrf.mxu1 }
  0x96   : > { %v572_v19 = vpop.f32.mrf.mxu0 }
  0x97   : > { %v5888_v53 = vadd.f32 %v5883_v51, %v572_v19 }
  0x99   : > { %5075 = vmatmul.msk.f32.gmra.mxu0 %vm9103_vm1, %v431_v20  ;;  %v742_v56 = vmul.f32 %v5888_v53, %v5888_v53  ;;  %v673_v59 = vsel %vm9104_vm2, %v5888_v53, 0.0 }
  0x9a   : > { %v674_v5 = vadd.f32 %v673_v59, %v672_v62  ;;  %v5982_v59 = vld [vmem:[%s9096_s11 + $0x18] sm:$0xff] }
  0x9b   : > { %v774_v0 = vsel %vm9104_vm2, %v742_v56, 0.0 }
  0x9c   : > { %v775_v11 = vadd.f32 %v774_v0, %v773_v4 }
  0x9e   : > { %v575_v22 = vpop.f32.mrf.mxu0 }
  0x9f   : > { %v5894_v55 = vadd.f32 %v5883_v51, %v575_v22 }
  0xa1   : > { %5076 = vmatmul.msk.f32.gmra.mxu0 %vm9103_vm1, %v432_v23  ;;  %v743_v60 = vmul.f32 %v5894_v55, %v5894_v55  ;;  %v675_v1 = vsel %vm9104_vm2, %v5894_v55, 0.0 }
  0xa2   : > { %v676_v12 = vadd.f32 %v675_v1, %v674_v5 }
  0xa3   : > { %v776_v7 = vsel %vm9104_vm2, %v743_v60, 0.0 }
  0xa4   : > { %v777_v17 = vadd.f32 %v776_v7, %v775_v11 }
  0xa6   : > { %v578_v25 = vpop.f32.mrf.mxu0 }
  0xa7   : > { %v5899_v57 = vadd.f32 %v5883_v51, %v578_v25 }
  0xa9   : > { %5077 = vmatmul.msk.f32.gmra.mxu0 %vm9103_vm1, %v433_v26  ;;  %v744_v2 = vmul.f32 %v5899_v57, %v5899_v57  ;;  %v677_v8 = vsel %vm9104_vm2, %v5899_v57, 0.0 }
  0xaa   : > { %v678_v18 = vadd.f32 %v677_v8, %v676_v12 }
  0xab   : > { %v778_v13 = vsel %vm9104_vm2, %v744_v2, 0.0 }
  0xac   : > { %v779_v23 = vadd.f32 %v778_v13, %v777_v17 }
  0xae   : > { %v581_v28 = vpop.f32.mrf.mxu0 }
  0xaf   : > { %v5908_v61 = vadd.f32 %v5883_v51, %v581_v28 }
  0xb1   : > { %5078 = vmatmul.msk.f32.gmra.mxu0 %vm9103_vm1, %v434_v29  ;;  %v745_v9 = vmul.f32 %v5908_v61, %v5908_v61  ;;  %v679_v14 = vsel %vm9104_vm2, %v5908_v61, 0.0 }
  0xb2   : > { %v680_v24 = vadd.f32 %v679_v14, %v678_v18 }
  0xb3   : > { %v780_v20 = vsel %vm9104_vm2, %v745_v9, 0.0 }
  0xb4   : > { %v781_v30 = vadd.f32 %v780_v20, %v779_v23 }
  0xb6   : > { %v584_v31 = vpop.f32.mrf.mxu0 }
  0xb7   : > { %v5920_v3 = vadd.f32 %v5883_v51, %v584_v31 }
  0xb9   : > { %5079 = vmatmul.msk.f32.gmra.mxu0 %vm9103_vm1, %v435_v32  ;;  %v746_v15 = vmul.f32 %v5920_v3, %v5920_v3  ;;  %v681_v21 = vsel %vm9104_vm2, %v5920_v3, 0.0 }
  0xba   : > { %v682_v31 = vadd.f32 %v681_v21, %v680_v24 }
  0xbb   : > { %v782_v26 = vsel %vm9104_vm2, %v746_v15, 0.0 }
  0xbc   : > { %v783_v36 = vadd.f32 %v782_v26, %v781_v30 }
  0xbe   : > { %v587_v34 = vpop.f32.mrf.mxu0 }
  0xbf   : > { %v5931_v10 = vadd.f32 %v5883_v51, %v587_v34 }
  0xc1   : > { %5080 = vmatmul.msk.f32.gmra.mxu0 %vm9103_vm1, %v436_v35  ;;  %v747_v22 = vmul.f32 %v5931_v10, %v5931_v10  ;;  %v683_v27 = vsel %vm9104_vm2, %v5931_v10, 0.0 }
  0xc3   : > { %v784_v33 = vsel %vm9104_vm2, %v747_v22, 0.0 }
  0xc4   : > { %v785_v56 = vadd.f32 %v784_v33, %v783_v36 }
  0xc6   : > { %v590_v37 = vpop.f32.mrf.mxu0 }
  0xc7   : > { %v5939_v16 = vadd.f32 %v5883_v51, %v590_v37  ;;  %v684_v37 = vadd.f32 %v683_v27, %v682_v31 }
  0xc9   : > { %5081 = vmatmul.msk.f32.gmra.mxu0 %vm9103_vm1, %v437_v38  ;;  %v748_v28 = vmul.f32 %v5939_v16, %v5939_v16  ;;  %v685_v34 = vsel %vm9104_vm2, %v5939_v16, 0.0  ;;  %v5967_v38 = vpop.f32.mrf.mxu1 }
  0xca   : > { %v686_v58 = vadd.f32 %v685_v34, %v684_v37 }
  0xce   : > { %v593_v39 = vpop.f32.mrf.mxu0 }
  0xcf   : > { %v5942_v19 = vadd.f32 %v5883_v51, %v593_v39  ;;  %v786_v39 = vsel %vm9104_vm2, %v748_v28, 0.0 }
  0xd0   : > { %v787_v1 = vadd.f32 %v786_v39, %v785_v56 }
  0xd1   : > { %5082 = vmatmul.msk.f32.gmra.mxu0 %vm9103_vm1, %v438_v40  ;;  %v749_v32 = vmul.f32 %v5942_v19, %v5942_v19  ;;  %v687_v40 = vsel %vm9104_vm2, %v5942_v19, 0.0  ;;  %v6026_v26 = vpop.f32.mrf.mxu1 }
  0xd2   : > { %v688_v2 = vadd.f32 %v687_v40, %v686_v58 }
  0xd6   : > { %v596_v41 = vpop.f32.mrf.mxu0 }
  0xd7   : > { %v5957_v29 = vadd.f32 %v5883_v51, %v596_v41 }
  0xd9   : > { %5083 = vmatmul.msk.f32.gmra.mxu0 %vm9103_vm1, %v439_v42  ;;  %v750_v41 = vmul.f32 %v5957_v29, %v5957_v29  ;;  %v689_v60 = vsel %vm9104_vm2, %v5957_v29, 0.0 }
  0xda   : > { %v690_v11 = vadd.f32 %v689_v60, %v688_v2 }
  0xdb   : > { %v790_v5 = vsel %vm9104_vm2, %v750_v41, 0.0 }
  0xde   : > { %v599_v43 = vpop.f32.mrf.mxu0 }
  0xdf   : > { %v5965_v35 = vadd.f32 %v5883_v51, %v599_v43  ;;  %v788_v43 = vsel %vm9104_vm2, %v749_v32, 0.0 }
  0xe1   : > { %v751_v62 = vmul.f32 %v5965_v35, %v5965_v35  ;;  %v691_v7 = vsel %vm9104_vm2, %v5965_v35, 0.0 }
  0xe2   : > { %v692_v17 = vadd.f32 %v691_v7, %v690_v11 }
  0xe3   : > { %v792_v12 = vsel %vm9104_vm2, %v751_v62, 0.0 }
  0xe6   : > { %v5866_v44 = vpop.f32.mrf.mxu0 }
  0xe7   : > { %v5976_v42 = vadd.f32 %v5883_v51, %v5866_v44  ;;  %v5993_v44 = vand.u32 4294901760, %v5982_v59 }
  0xe9   : > { %v752_v8 = vmul.f32 %v5976_v42, %v5976_v42  ;;  %858 = vmatpush.msrb.mxu1 %v5993_v44  ;;  %1018 = vmatpush.msra.mxu3 %v5993_v44  ;;  %v693_v13 = vsel %vm9104_vm2, %v5976_v42, 0.0 }
  0xea   : > { %v694_v24 = vadd.f32 %v693_v13, %v692_v17  ;;  %v667_v17 = vld [vmem:[%s9096_s11 + $0x10] sm:$0xff] }
  0xeb   : > { %v794_v18 = vsel %vm9104_vm2, %v752_v8, 0.0 }
  0xee   : > { %v5868_v45 = vpop.f32.mrf.mxu0 }
  0xef   : > { %v5990_v0 = vadd.f32 %v5883_v51, %v5868_v45  ;;  %v789_v45 = vadd.f32 %v788_v43, %v787_v1 }
  0xf1   : > { %v753_v14 = vmul.f32 %v5990_v0, %v5990_v0  ;;  %v695_v20 = vsel %vm9104_vm2, %v5990_v0, 0.0 }
  0xf2   : > { %v696_v32 = vadd.f32 %v695_v20, %v694_v24 }
  0xf6   : > { %v5870_v46 = vpop.f32.mrf.mxu0 }
  0xf7   : > { %v6004_v9 = vadd.f32 %v5883_v51, %v5870_v46  ;;  %v791_v46 = vadd.f32 %v790_v5, %v789_v45 }
  0xf9   : > { %v754_v21 = vmul.f32 %v6004_v9, %v6004_v9  ;;  %v793_v23 = vadd.f32 %v792_v12, %v791_v46  ;;  %v697_v27 = vsel %vm9104_vm2, %v6004_v9, 0.0  ;;  %v6073_v46 = vpop.f32.mrf.mxu1 }
  0xfa   : > { %v698_v40 = vadd.f32 %v697_v27, %v696_v32 }
  0xfb   : > { %v795_v31 = vadd.f32 %v794_v18, %v793_v23  ;;  %v798_v33 = vsel %vm9104_vm2, %v754_v21, 0.0 }
  0xfe   : > { %v5872_v47 = vpop.f32.mrf.mxu0 }
  0xff   : > { %v6015_v15 = vadd.f32 %v5883_v51, %v5872_v47  ;;  %v796_v47 = vsel %vm9104_vm2, %v753_v14, 0.0 }
 0x100   : > { %v797_v39 = vadd.f32 %v796_v47, %v795_v31 }
 0x101   : > { %v755_v28 = vmul.f32 %v6015_v15, %v6015_v15  ;;  %v699_v34 = vsel %vm9104_vm2, %v6015_v15, 0.0 }
 0x102   : > { %v799_v43 = vadd.f32 %v798_v33, %v797_v39  ;;  %v700_v60 = vadd.f32 %v699_v34, %v698_v40  ;;  %v6101_v39 = vsub.f32 %v5982_v59, %v5993_v44 }
 0x106   : > { %v5874_v48 = vpop.f32.mrf.mxu0 }
 0x107   : > { %v6024_v22 = vadd.f32 %v5883_v51, %v5874_v48 }
 0x109   : > { %v756_v36 = vmul.f32 %v6024_v22, %v6024_v22  ;;  %v701_v41 = vsel %vm9104_vm2, %v6024_v22, 0.0 }
 0x10a   : > { %v702_v5 = vadd.f32 %v701_v41, %v700_v60  ;;  %v6118_v60 = vand.u32 4294901760, %v6101_v39 }
 0x10b   : > { %v802_v62 = vsel %vm9104_vm2, %v756_v36, 0.0 }
 0x10c   : > { %987 = vmatpush.msra.mxu2 %v6118_v60 }
 0x10e   : > { %v5876_v49 = vpop.f32.mrf.mxu0 }
 0x10f   : > { %v6035_v30 = vadd.f32 %v5883_v51, %v5876_v49  ;;  %v800_v49 = vsel %vm9104_vm2, %v755_v28, 0.0 }
 0x110   : > { %v801_v2 = vadd.f32 %v800_v49, %v799_v43 }
 0x111   : > { %v757_v56 = vmul.f32 %v6035_v30, %v6035_v30 }
 0x112   : > { %v803_v11 = vadd.f32 %v802_v62, %v801_v2 }
 0x113   : > { %v804_v7 = vsel %vm9104_vm2, %v757_v56, 0.0 }
 0x114   : > { %v805_v21 = vadd.f32 %v804_v7, %v803_v11  ;;  %v6135_v11 = vpop.f32.mrf.mxu1 }
 0x116   : > { %v5878_v50 = vpop.f32.mrf.mxu0 }
 0x117   : > { %v6044_v37 = vadd.f32 %v5883_v51, %v5878_v50  ;;  %v703_v50 = vsel %vm9104_vm2, %v6035_v30, 0.0 }
 0x118   : > { %v704_v12 = vadd.f32 %v703_v50, %v702_v5  ;;  %v665_v50 = vld [vmem:[%s9096_s11] sm:$0xff] }
 0x119   : > { %v758_v1 = vmul.f32 %v6044_v37, %v6044_v37  ;;  %v705_v8 = vsel %vm9104_vm2, %v6044_v37, 0.0  ;;  %v6133_v7 = vand.u32 4294901760, %v665_v50 }
 0x11a   : > { %v706_v23 = vadd.f32 %v705_v8, %v704_v12 }
 0x11b   : > { %v806_v18 = vsel %vm9104_vm2, %v758_v1, 0.0 }
 0x11c   : > { %v807_v28 = vadd.f32 %v806_v18, %v805_v21  ;;  %v6152_v21 = vsub.f32 %v665_v50, %v6133_v7 }
 0x11e   : > { %v5885_v52 = vpop.f32.mrf.mxu0 }
 0x11f   : > { %v6053_v58 = vadd.f32 %v5883_v51, %v5885_v52 }
 0x121   : > { %v759_v52 = vmul.f32 %v6053_v58, %v6053_v58  ;;  %v707_v20 = vsel %vm9104_vm2, %v6053_v58, 0.0 }
 0x122   : > { %v708_v31 = vadd.f32 %v707_v20, %v706_v23 }
 0x123   : > { %v808_v24 = vsel %vm9104_vm2, %v759_v52, 0.0 }
 0x124   : > { %v809_v34 = vadd.f32 %v808_v24, %v807_v28 }
 0x126   : > { %v5912_v63 = vpop.f32.mrf.mxu0 }
 0x127   : > { %v6067_v45 = vadd.f32 %v5883_v51, %v5912_v63  ;;  %v6081_v63 = vand.u32 4294901760, %v667_v17 }
 0x129   : > { %v760_v47 = vmul.f32 %v6067_v45, %v6067_v45  ;;  %860 = vmatpush.msrb.mxu1 %v6081_v63  ;;  %1020 = vmatpush.msra.mxu3 %v6081_v63  ;;  %v6121_v62 = vsub.f32 %v667_v17, %v6081_v63 }
 0x12b   : > { %v6140_v12 = vand.u32 4294901760, %v6121_v62 }
 0x12d   : > { %991 = vmatpush.msra.mxu2 %v6140_v12 }
 0x12e   : > { %v5949_v25 = vpop.f32.mrf.mxu0 }
 0x12f   : > { %v6071_v13 = vadd.f32 %v5883_v51, %v5949_v25  ;;  %v709_v25 = vsel %vm9104_vm2, %v6067_v45, 0.0 }
 0x130   : > { %v710_v36 = vadd.f32 %v709_v25, %v708_v31  ;;  %v6156_v25 = vadd.f32 %v5883_v51, %v5923_v6 }
 0x131   : > { %v761_v32 = vmul.f32 %v6071_v13, %v6071_v13  ;;  %v711_v40 = vsel %vm9104_vm2, %v6071_v13, 0.0 }
 0x132   : > { %v712_v52 = vadd.f32 %v711_v40, %v710_v36  ;;  %v6178_v40 = vadd.f32 %v5883_v51, %v5967_v38 }
 0x133   : > { %v812_v56 = vsel %vm9104_vm2, %v761_v32, 0.0 }
 0x134   : > { %9201 = vst [vmem:[#allocation3_spill] sm:$0xff] %v6178_v40 }
 0x136   : > { %v5995_v4 = vpop.f32.mrf.mxu0 }
 0x137   : > { %v6090_v27 = vadd.f32 %v5883_v51, %v5995_v4  ;;  %v810_v4 = vsel %vm9104_vm2, %v760_v47, 0.0 }
 0x138   : > { %v811_v8 = vadd.f32 %v810_v4, %v809_v34  ;;  %v6169_v34 = vand.u32 4294901760, %v6152_v21  ;;  %v889_v4 = vsub.f32 %v6101_v39, %v6118_v60 }
 0x139   : > { %v762_v49 = vmul.f32 %v6090_v27, %v6090_v27  ;;  %v713_v1 = vsel %vm9104_vm2, %v6090_v27, 0.0 }
 0x13a   : > { %v813_v23 = vadd.f32 %v812_v56, %v811_v8  ;;  %v714_v24 = vadd.f32 %v713_v1, %v712_v52  ;;  %v890_v1 = vand.u32 4294901760, %v889_v4 }
 0x13b   : > { %v814_v17 = vsel %vm9104_vm2, %v762_v49, 0.0 }
 0x13c   : > { %v815_v6 = vadd.f32 %v814_v17, %v813_v23  ;;  %v907_v17 = vsub.f32 %v6152_v21, %v6169_v34 }
 0x13e   : > { %v635_v48 = vpop.f32.mrf.mxu0 }
 0x13f   : > { %v6097_v33 = vadd.f32 %v5883_v51, %v635_v48  ;;  %v666_v48 = vld [vmem:[%s9096_s11 + $0x8] sm:$0xff] }
 0x140   : > { %v6115_v59 = vand.u32 4294901760, %v666_v48 }
 0x141   : > { %v763_v2 = vmul.f32 %v6097_v33, %v6097_v33  ;;  %v715_v18 = vsel %vm9104_vm2, %v6097_v33, 0.0 }
 0x142   : > { %862 = vmatpush.msrb.mxu1 %v6115_v59  ;;  %1022 = vmatpush.msra.mxu3 %v6115_v59  ;;  %v716_v36 = vadd.f32 %v715_v18, %v714_v24  ;;  %v767_v18 = vmul.f32 %v6156_v25, %v6156_v25 }
 0x143   : > { %v816_v28 = vsel %vm9104_vm2, %v763_v2, 0.0  ;;  %v895_v2 = vsub.f32 %v6121_v62, %v6140_v12 }
 0x144   : > { %864 = vmatpush.msrb.mxu1 %v6133_v7  ;;  %1024 = vmatpush.msra.mxu3 %v6133_v7  ;;  %v817_v56 = vadd.f32 %v816_v28, %v815_v6  ;;  %v6200_v28 = vadd.f32 %v5883_v51, %v6026_v26  ;;  %v768_v26 = vmul.f32 %v6178_v40, %v6178_v40 }
 0x145   : > { %v896_v24 = vand.u32 4294901760, %v895_v2 }
 0x146   : > { %v638_v14 = vpop.f32.mrf.mxu0  ;;  %1117 = vmatpush.msrb.mxu3 %v6101_v39  ;;  %9202 = vst [vmem:[#allocation4_spill] sm:$0xff] %v6200_v28  ;;  %891 = vmatpush.msra.mxu1 %v890_v1 }
 0x147   : > { %v6109_v41 = vadd.f32 %v5883_v51, %v638_v14  ;;  %v6143_v14 = vsub.f32 %v666_v48, %v6115_v59 }
 0x148   : > { %1120 = vmatpush.msrb.mxu3 %v6121_v62  ;;  %897 = vmatpush.msra.mxu1 %v896_v24 }
 0x149   : > { %v764_v20 = vmul.f32 %v6109_v41, %v6109_v41  ;;  %v6161_v47 = vand.u32 4294901760, %v6143_v14  ;;  %v717_v31 = vsel %vm9104_vm2, %v6109_v41, 0.0 }
 0x14a   : > { %1123 = vmatpush.msrb.mxu3 %v6143_v14 }
 0x14b   : > { %995 = vmatpush.msra.mxu2 %v6161_v47  ;;  %v818_v49 = vsel %vm9104_vm2, %v764_v20, 0.0  ;;  %v901_v52 = vsub.f32 %v6143_v14, %v6161_v47 }
 0x14c   : > { %v819_v20 = vadd.f32 %v818_v49, %v817_v56  ;;  %v662_v49 = vpop.f32.mrf.mxu1  ;;  %1126 = vmatpush.msrb.mxu3 %v6152_v21  ;;  %v723_v56 = vsel %vm9104_vm2, %v6156_v25, 0.0 }
 0x14d   : > { %999 = vmatpush.msra.mxu2 %v6169_v34  ;;  %v902_v6 = vand.u32 4294901760, %v901_v52  ;;  %v725_v52 = vsel %vm9104_vm2, %v6178_v40, 0.0 }
 0x14e   : > { %v641_v43 = vpop.f32.mrf.mxu0 }
 0x14f   : > { %v6131_v5 = vadd.f32 %v5883_v51, %v641_v43  ;;  %v718_v43 = vadd.f32 %v717_v31, %v716_v36  ;;  %1079 = vmatpush.msrb.mxu2 %v890_v1  ;;  %v824_v1 = vsel %vm9104_vm2, %v767_v18, 0.0  ;;  %903 = vmatpush.msra.mxu1 %v902_v6  ;;  %v826_v18 = vsel %vm9104_vm2, %v768_v26, 0.0 }
 0x151   : > { %v765_v32 = vmul.f32 %v6131_v5, %v6131_v5  ;;  %v719_v48 = vsel %vm9104_vm2, %v6131_v5, 0.0  ;;  %1085 = vmatpush.msrb.mxu2 %v896_v24 }
 0x152   : > { %v720_v23 = vadd.f32 %v719_v48, %v718_v43  ;;  %v908_v48 = vand.u32 4294901760, %v907_v17  ;;  %v6213_v43 = vadd.f32 %v5883_v51, %v6073_v46  ;;  %v769_v17 = vmul.f32 %v6200_v28, %v6200_v28 }
 0x153   : > { %v820_v8 = vsel %vm9104_vm2, %v765_v32, 0.0  ;;  %1091 = vmatpush.msrb.mxu2 %v902_v6  ;;  %v6226_v46 = vadd.f32 %v5883_v51, %v662_v49 }
 0x154   : > { %v821_v36 = vadd.f32 %v820_v8, %v819_v20  ;;  %9203 = vst [vmem:[#allocation5_spill] sm:$0xff] %v6213_v43  ;;  %v6223_v20 = vadd.f32 %v5883_v51, %v6135_v11  ;;  %909 = vmatpush.msra.mxu1 %v908_v48  ;;  %v828_v11 = vsel %vm9104_vm2, %v769_v17, 0.0 }
 0x155   : > { %9205 = vst [vmem:[#allocation7_spill] sm:$0xff] %v6226_v46  ;;  %1097 = vmatpush.msrb.mxu2 %v908_v48  ;;  %v772_v49 = vmul.f32 %v6226_v46, %v6226_v46 }
 0x156   : > { %v644_v50 = vpop.f32.mrf.mxu0  ;;  %9204 = vst [vmem:[#allocation6_spill] sm:$0xff] %v6223_v20  ;;  %v771_v6 = vmul.f32 %v6223_v20, %v6223_v20  ;;  %v731_v48 = vsel %vm9104_vm2, %v6223_v20, 0.0 }
 0x157   : > { %v6189_v38 = vadd.f32 %v5883_v51, %v644_v50  ;;  %v729_v51 = vsel %vm9104_vm2, %v6213_v43, 0.0  ;;  %v834_v17 = vsel %vm9104_vm2, %v772_v49, 0.0 }
 0x159   : > { %v721_v31 = vsel %vm9104_vm2, %v6189_v38, 0.0  ;;  %v766_v32 = vmul.f32 %v6189_v38, %v6189_v38 }
 0x15a   : > { %v722_v4 = vadd.f32 %v721_v31, %v720_v23  ;;  %v727_v31 = vsel %vm9104_vm2, %v6200_v28, 0.0 }
 0x15b   : > { %v822_v50 = vsel %vm9104_vm2, %v766_v32, 0.0  ;;  %v770_v32 = vmul.f32 %v6213_v43, %v6213_v43 }
 0x15c   : > { %v724_v2 = vadd.f32 %v723_v56, %v722_v4  ;;  %v823_v8 = vadd.f32 %v822_v50, %v821_v36 }
 0x15d   : > { %v830_v50 = vsel %vm9104_vm2, %v770_v32, 0.0 }
 0x15e   : > { %v726_v23 = vadd.f32 %v725_v52, %v724_v2  ;;  %v825_v24 = vadd.f32 %v824_v1, %v823_v8  ;;  %v733_v1 = vsel %vm9104_vm2, %v6226_v46, 0.0  ;;  %v832_v52 = vsel %vm9104_vm2, %v771_v6, 0.0 }
 0x160   : > { %v827_v36 = vadd.f32 %v826_v18, %v825_v24  ;;  %v728_v4 = vadd.f32 %v727_v31, %v726_v23 }
 0x162   : > { %v730_v56 = vadd.f32 %v729_v51, %v728_v4  ;;  %v829_v26 = vadd.f32 %v828_v11, %v827_v36 }
 0x164   : > { %v732_v2 = vadd.f32 %v731_v48, %v730_v56  ;;  %v831_v8 = vadd.f32 %v830_v50, %v829_v26 }
 0x166   : > { %v833_v23 = vadd.f32 %v832_v52, %v831_v8  ;;  %v734_v24 = vadd.f32 %v733_v1, %v732_v2 }
 0x168   : > { %v735_v18 = vrot.slane %v734_v24, 4  ;;  %v835_v31 = vadd.f32 %v834_v17, %v833_v23 }
 0x16a   : > { %v736_v4 = vadd.f32 %v735_v18, %v734_v24  ;;  %v836_v36 = vrot.slane %v835_v31, 4 }
 0x16c   : > { %v737_v11 = vrot.slane %v736_v4, 2  ;;  %v837_v32 = vadd.f32 %v836_v36, %v835_v31 }
 0x16e   : > { %v738_v51 = vadd.f32 %v737_v11, %v736_v4  ;;  %v838_v43 = vrot.slane %v837_v32, 2 }
 0x170   : > { %v739_v20 = vrot.slane %v738_v51, 1  ;;  %v839_v28 = vadd.f32 %v838_v43, %v837_v32 }
 0x172   : > { %v740_v40 = vadd.f32 %v739_v20, %v738_v51  ;;  %v840_v46 = vrot.slane %v839_v28, 1  ;;  %v3379_v51 = vld [vmem:[%s9090_s5 + $0x118] sm:$0xff] }
 0x173   : > { %3718 = vmatpush.msrb.mxu0 %v3379_v51 }
 0x174   : > { %v843_v56 = vsel %vm9104_vm2, %v740_v40, 0  ;;  %v841_v26 = vadd.f32 %v840_v46, %v839_v28 }
 0x175   : > { %v865_v6 = vand.u32 4294901760, %v843_v56 }
 0x176   : > { %v1031_v50 = vsel %vm9104_vm2, %v841_v26, 0 }
 0x177   : > { %1001 = vmatmul.f32.vlgmr.msra.gmra.mxu2 %v865_v6  ;;  %1026 = vmatmul.f32.vlgmr.msra.gmra.mxu3 %v865_v6  ;;  %v866_v49 = vsub.f32 %v843_v56, %v865_v6  ;;  %v1053_v1 = vand.u32 4294901760, %v1031_v50 }
 0x178   : > { %1175 = vmatpush.msra.mxu2 %v6118_v60  ;;  %1206 = vmatpush.msra.mxu3 %v5993_v44 }
 0x179   : > { %v867_v48 = vand.u32 4294901760, %v866_v49  ;;  %v1054_v28 = vsub.f32 %v1031_v50, %v1053_v1  ;;  %v3378_v50 = vld [vmem:[%s9090_s5 + $0x110] sm:$0xff] }
 0x17a   : > { %1179 = vmatpush.msra.mxu2 %v6140_v12  ;;  %1208 = vmatpush.msra.mxu3 %v6081_v63 }
 0x17b   : > { %v868_v43 = vsub.f32 %v866_v49, %v867_v48  ;;  %3719 = vmatpush.msrb.mxu0 %v3378_v50 }
 0x17c   : > { %1183 = vmatpush.msra.mxu2 %v6161_v47  ;;  %1210 = vmatpush.msra.mxu3 %v6115_v59 }
 0x17d   : > { %v869_v40 = vand.u32 4294901760, %v868_v43 }
 0x17e   : > { %1187 = vmatpush.msra.mxu2 %v6169_v34  ;;  %1212 = vmatpush.msra.mxu3 %v6133_v7 }
 0x17f   : > { %870 = vmatmul.f32.vlgmr.msrb.gmra.mxu1 %v869_v40  ;;  %1099 = vmatmul.f32.vlgmr.msrb.gmra.mxu2 %v1053_v1 }
 0x180   : > { %1129 = vmatmul.f32.vlgmr.msrb.gmra.mxu3 %v1054_v28  ;;  %929 = vmatpush.msrb.mxu1 %v6101_v39  ;;  %v1055_v39 = vand.u32 4294901760, %v1054_v28 }
 0x181   : > { %5159 = vmatpush.msrb.mxu3 %v3379_v51 }
 0x182   : > { %932 = vmatpush.msrb.mxu1 %v6121_v62  ;;  %v1056_v60 = vsub.f32 %v1054_v28, %v1055_v39 }
 0x183   : > { %5160 = vmatpush.msrb.mxu3 %v3378_v50 }
 0x184   : > { %935 = vmatpush.msrb.mxu1 %v6143_v14  ;;  %v1057_v62 = vand.u32 4294901760, %v1056_v60 }
 0x186   : > { %938 = vmatpush.msrb.mxu1 %v6152_v21 }
 0x187   : > { %911 = vmatmul.f32.vlgmr.msra.gmra.mxu1 %v865_v6  ;;  %1189 = vmatmul.f32.vlgmr.msra.gmra.mxu2 %v1053_v1 }
 0x188   : > { %1214 = vmatmul.f32.vlgmr.msra.gmra.mxu3 %v1053_v1  ;;  %958 = vmatpush.msra.mxu1 %v5993_v44 }
 0x18a   : > { %960 = vmatpush.msra.mxu1 %v6081_v63 }
 0x18c   : > { %962 = vmatpush.msra.mxu1 %v6115_v59 }
 0x18e   : > { %964 = vmatpush.msra.mxu1 %v6133_v7 }
 0x18f   : > { %941 = vmatmul.f32.vlgmr.msrb.gmra.mxu1 %v866_v49 }
 0x190   : > { %1046 = vmatpush.msrb.mxu1 %v5993_v44 }
 0x192   : > { %1048 = vmatpush.msrb.mxu1 %v6081_v63 }
 0x194   : > { %1050 = vmatpush.msrb.mxu1 %v6115_v59 }
 0x196   : > { %1052 = vmatpush.msrb.mxu1 %v6133_v7 }
 0x197   : > { %968 = vmatmul.f32.vlgmr.msra.gmra.mxu1 %v867_v48 }
 0x198   : > { %1146 = vmatpush.msra.mxu1 %v5993_v44 }
 0x19a   : > { %1148 = vmatpush.msra.mxu1 %v6081_v63 }
 0x19c   : > { %1150 = vmatpush.msra.mxu1 %v6115_v59 }
 0x19e   : > { %1152 = vmatpush.msra.mxu1 %v6133_v7 }
 0x19f   : > { %1058 = vmatmul.f32.vlgmr.msrb.gmra.mxu1 %v1057_v62 }
 0x1a7   : > { %1156 = vmatmul.f32.vlgmr.msra.gmra.mxu1 %v1055_v39 }
 0x1fa   : > { %v1002_v34 = vpop.f32.mrf.mxu2  ;;  %v1027_v20 = vpop.f32.mrf.mxu3 }
 0x1fc   : > { %v871_v12 = vpop.f32.mrf.mxu1 }
 0x202   : > { %v1100_v44 = vpop.f32.mrf.mxu2 }
 0x203   : > { %v1130_v17 = vpop.f32.mrf.mxu3 }
 0x204   : > { %v912_v14 = vpop.f32.mrf.mxu1 }
 0x205   : > { %v913_v2 = vadd.f32 %v912_v14, %v871_v12 }
 0x20a   : > { %v1190_v31 = vpop.f32.mrf.mxu2 }
 0x20b   : > { %v1215_v36 = vpop.f32.mrf.mxu3 }
 0x20c   : > { %v942_v21 = vpop.f32.mrf.mxu1 }
 0x20d   : > { %v943_v8 = vadd.f32 %v942_v21, %v913_v2 }
 0x214   : > { %v969_v47 = vpop.f32.mrf.mxu1 }
 0x215   : > { %v970_v52 = vadd.f32 %v969_v47, %v943_v8 }
 0x217   : > { %v1003_v63 = vadd.f32 %v1002_v34, %v970_v52 }
 0x219   : > { %v1028_v18 = vadd.f32 %v1027_v20, %v1003_v63 }
 0x21b   : > { %v1218_v11 = vmul.f32 %v1028_v18, %v1028_v18  ;;  %v6279_v40 = vperm.slane %v1028_v18, 0 }
 0x21c   : > { %v1059_v46 = vpop.f32.mrf.mxu1 }
 0x21d   : > { %v1101_v23 = vadd.f32 %v1100_v44, %v1059_v46  ;;  %v1232_v39 = vsub.f32 %v5891_v54, %v6279_v40  ;;  %v1233_v60 = vsub.f32 %v5888_v53, %v6279_v40  ;;  %v1234_v62 = vsub.f32 %v5894_v55, %v6279_v40 }
 0x21e   : > { %v1235_v14 = vsub.f32 %v5899_v57, %v6279_v40  ;;  %v1236_v21 = vsub.f32 %v5908_v61, %v6279_v40  ;;  %v1237_v47 = vsub.f32 %v5920_v3, %v6279_v40  ;;  %v1238_v53 = vsub.f32 %v5931_v10, %v6279_v40 }
 0x21f   : > { %v1131_v24 = vadd.f32 %v1130_v17, %v1101_v23  ;;  %v1239_v55 = vsub.f32 %v5939_v16, %v6279_v40  ;;  %v1240_v34 = vsub.f32 %v5942_v19, %v6279_v40  ;;  %v1241_v57 = vsub.f32 %v5957_v29, %v6279_v40 }
 0x220   : > { %v1242_v61 = vsub.f32 %v5965_v35, %v6279_v40  ;;  %v1243_v3 = vsub.f32 %v5976_v42, %v6279_v40  ;;  %v1244_v20 = vsub.f32 %v5990_v0, %v6279_v40  ;;  %v1245_v10 = vsub.f32 %v6004_v9, %v6279_v40 }
 0x221   : > { %v1246_v16 = vsub.f32 %v6015_v15, %v6279_v40  ;;  %v1247_v19 = vsub.f32 %v6024_v22, %v6279_v40  ;;  %v1248_v29 = vsub.f32 %v6035_v30, %v6279_v40  ;;  %v1249_v35 = vsub.f32 %v6044_v37, %v6279_v40 }
 0x222   : > { %v1250_v42 = vsub.f32 %v6053_v58, %v6279_v40  ;;  %v1251_v0 = vsub.f32 %v6067_v45, %v6279_v40  ;;  %v1252_v9 = vsub.f32 %v6071_v13, %v6279_v40  ;;  %v1253_v15 = vsub.f32 %v6090_v27, %v6279_v40  ;;  %v9208_v13 = vld [vmem:[#allocation3_spill] sm:$0xff]  ;;  %v9209_v27 = vld [vmem:[#allocation4_spill] sm:$0xff] }
 0x223   : > { %v1254_v22 = vsub.f32 %v6097_v33, %v6279_v40  ;;  %v1255_v30 = vsub.f32 %v6109_v41, %v6279_v40  ;;  %v1256_v37 = vsub.f32 %v6131_v5, %v6279_v40  ;;  %v1257_v58 = vsub.f32 %v6189_v38, %v6279_v40  ;;  %v3377_v33 = vld [vmem:[%s9090_s5 + $0x108] sm:$0xff]  ;;  %v9210_v41 = vld [vmem:[#allocation5_spill] sm:$0xff]  ;;  %v9212_v38 = vld [vmem:[#allocation7_spill] sm:$0xff] }
 0x224   : > { %v1157_v59 = vpop.f32.mrf.mxu1  ;;  %v1258_v45 = vsub.f32 %v6156_v25, %v6279_v40  ;;  %v1259_v2 = vsub.f32 %v9208_v13, %v6279_v40  ;;  %v1260_v8 = vsub.f32 %v9209_v27, %v6279_v40  ;;  %v1261_v44 = vsub.f32 %v9210_v41, %v6279_v40  ;;  %v9211_v5 = vld [vmem:[#allocation6_spill] sm:$0xff]  ;;  %3720 = vmatpush.msrb.mxu0 %v3377_v33 }
 0x225   : > { %v1158_v7 = vadd.f32 %v1157_v59, %v1131_v24  ;;  %v1262_v52 = vsub.f32 %v9211_v5, %v6279_v40  ;;  %v1263_v17 = vsub.f32 %v9212_v38, %v6279_v40  ;;  %5161 = vmatpush.msrb.mxu3 %v3377_v33 }
 0x227   : > { %v1191_v4 = vadd.f32 %v1190_v31, %v1158_v7 }
 0x229   : > { %v1216_v32 = vadd.f32 %v1215_v36, %v1191_v4 }
 0x22b   : > { %v1219_v56 = vsub.f32 %v1216_v32, %v1218_v11 }
 0x22d   : > { %v1220_v26 = vadd.f32 1e-05, %v1219_v56  ;;  %v5655_v56 = vld [vmem:[%s9088_s3] ss:$0 sm:$0xff] }
 0x22f   : > { %5661 = vrsqrt.f32 %v1220_v26  ;;  %vm1227_vm4 = vweird.f32 %v1220_v26 }
 0x235   : > { %v5662_v6 = vpop.eup %5661 }
 0x236   : > { %v1222_v49 = vmul.f32 %v5662_v6, %v1220_v26  ;;  %vm1228_vm3 = vweird.f32 %v5662_v6 }
 0x237   : > { %vm6287_vm5 = vmor %vm1227_vm4, %vm1228_vm3 }
 0x238   : > { %v1223_v48 = vmul.f32 %v5662_v6, %v1222_v49 }
 0x23a   : > { %v1224_v1 = vmul.f32 0.5, %v1223_v48 }
 0x23c   : > { %v1225_v43 = vsub.f32 1.5, %v1224_v1 }
 0x23e   : > { %v1226_v28 = vmul.f32 %v5662_v6, %v1225_v43 }
 0x240   : > { %v1230_v54 = vsel %vm6287_vm5, %v5662_v6, %v1226_v28 }
 0x241   : > { %v1264_v46 = vperm.slane %v1230_v54, 0 }
 0x243   : > { %v1265_v25 = vmul.f32 %v1264_v46, %v1232_v39  ;;  %v1266_v63 = vmul.f32 %v1264_v46, %v1233_v60  ;;  %v1267_v23 = vmul.f32 %v1264_v46, %v1234_v62  ;;  %v1268_v59 = vmul.f32 %v1264_v46, %v1235_v14 }
 0x244   : > { %v1269_v24 = vmul.f32 %v1264_v46, %v1236_v21  ;;  %v1270_v18 = vmul.f32 %v1264_v46, %v1237_v47  ;;  %v1271_v7 = vmul.f32 %v1264_v46, %v1238_v53  ;;  %v1272_v31 = vmul.f32 %v1264_v46, %v1239_v55 }
 0x245   : > { %v1273_v4 = vmul.f32 %v1264_v46, %v1240_v34  ;;  %v1274_v36 = vmul.f32 %v1264_v46, %v1241_v57  ;;  %v1275_v11 = vmul.f32 %v1264_v46, %v1242_v61  ;;  %v1276_v32 = vmul.f32 %v1264_v46, %v1243_v3 }
 0x246   : > { %v1277_v51 = vmul.f32 %v1264_v46, %v1244_v20  ;;  %v1278_v26 = vmul.f32 %v1264_v46, %v1245_v10  ;;  %v1279_v6 = vmul.f32 %v1264_v46, %v1246_v16  ;;  %v1280_v49 = vmul.f32 %v1264_v46, %v1247_v19  ;;  %v6360_v10 = vld [vmem:[%s9089_s4] ss:$0 sm:$0xff] }
 0x247   : > { %v1281_v50 = vmul.f32 %v1264_v46, %v1248_v29  ;;  %v1282_v48 = vmul.f32 %v1264_v46, %v1249_v35  ;;  %v1283_v1 = vmul.f32 %v1264_v46, %v1250_v42  ;;  %v1284_v43 = vmul.f32 %v1264_v46, %v1251_v0 }
 0x248   : > { %v1285_v40 = vmul.f32 %v1264_v46, %v1252_v9  ;;  %v1286_v28 = vmul.f32 %v1264_v46, %v1253_v15  ;;  %v1287_v39 = vmul.f32 %v1264_v46, %v1254_v22  ;;  %v1288_v60 = vmul.f32 %v1264_v46, %v1255_v30 }
 0x249   : > { %v1289_v62 = vmul.f32 %v1264_v46, %v1256_v37  ;;  %v1290_v12 = vmul.f32 %v1264_v46, %v1257_v58  ;;  %v1291_v14 = vmul.f32 %v1264_v46, %v1258_v45  ;;  %v1292_v21 = vmul.f32 %v1264_v46, %v1259_v2 }
 0x24a   : > { %v1293_v47 = vmul.f32 %v1264_v46, %v1260_v8  ;;  %v1294_v54 = vmul.f32 %v1264_v46, %v1261_v44  ;;  %v1295_v53 = vmul.f32 %v1264_v46, %v1262_v52  ;;  %v1296_v55 = vmul.f32 %v1264_v46, %v1263_v17 }
 0x24b   : > { %v1300_v34 = vmul.f32 %v5655_v56, %v1265_v25  ;;  %v1301_v57 = vmul.f32 %v5655_v56, %v1266_v63  ;;  %v1302_v61 = vmul.f32 %v5655_v56, %v1267_v23  ;;  %v1303_v3 = vmul.f32 %v5655_v56, %v1268_v59 }
 0x24c   : > { %v1304_v20 = vmul.f32 %v5655_v56, %v1269_v24  ;;  %v1305_v16 = vmul.f32 %v5655_v56, %v1270_v18  ;;  %v1306_v19 = vmul.f32 %v5655_v56, %v1271_v7  ;;  %v1307_v29 = vmul.f32 %v5655_v56, %v1272_v31 }
 0x24d   : > { %v1308_v35 = vmul.f32 %v5655_v56, %v1273_v4  ;;  %v1309_v42 = vmul.f32 %v5655_v56, %v1274_v36  ;;  %v1310_v0 = vmul.f32 %v5655_v56, %v1275_v11  ;;  %v1311_v9 = vmul.f32 %v5655_v56, %v1276_v32 }
 0x24e   : > { %v1312_v15 = vmul.f32 %v5655_v56, %v1277_v51  ;;  %v1313_v22 = vmul.f32 %v5655_v56, %v1278_v26  ;;  %v1314_v46 = vmul.f32 %v5655_v56, %v1279_v6  ;;  %v1315_v30 = vmul.f32 %v5655_v56, %v1280_v49 }
 0x24f   : > { %v1316_v37 = vmul.f32 %v5655_v56, %v1281_v50  ;;  %v1317_v58 = vmul.f32 %v5655_v56, %v1282_v48  ;;  %v1318_v45 = vmul.f32 %v5655_v56, %v1283_v1  ;;  %v1319_v13 = vmul.f32 %v5655_v56, %v1284_v43 }
 0x250   : > { %v1320_v2 = vmul.f32 %v5655_v56, %v1285_v40  ;;  %v6362_v27 = vmul.f32 %v5655_v56, %v1286_v28  ;;  %v6364_v8 = vmul.f32 %v5655_v56, %v1287_v39  ;;  %v6366_v33 = vmul.f32 %v5655_v56, %v1288_v60 }
 0x251   : > { %v1335_v41 = vadd.f32 %v6360_v10, %v1300_v34  ;;  %v6369_v44 = vmul.f32 %v5655_v56, %v1289_v62  ;;  %v6371_v5 = vmul.f32 %v5655_v56, %v1290_v12  ;;  %v6373_v52 = vmul.f32 %v5655_v56, %v1291_v14 }
 0x252   : > { %v1336_v38 = vadd.f32 %v6360_v10, %v1301_v57  ;;  %v6376_v17 = vmul.f32 %v5655_v56, %v1292_v21  ;;  %v6378_v25 = vmul.f32 %v5655_v56, %v1293_v47  ;;  %v6380_v63 = vmul.f32 %v5655_v56, %v1294_v54 }
 0x253   : > { %v1337_v23 = vadd.f32 %v6360_v10, %v1302_v61  ;;  %v6383_v59 = vmul.f32 %v5655_v56, %v1295_v53  ;;  %v6385_v24 = vmul.f32 %v5655_v56, %v1296_v55  ;;  %v1338_v18 = vadd.f32 %v6360_v10, %v1303_v3 }
 0x254   : > { %v1339_v7 = vadd.f32 %v6360_v10, %v1304_v20  ;;  %v1340_v31 = vadd.f32 %v6360_v10, %v1305_v16  ;;  %v1341_v4 = vadd.f32 %v6360_v10, %v1306_v19  ;;  %v1342_v36 = vadd.f32 %v6360_v10, %v1307_v29 }
 0x255   : > { %v1399_v11 = vmul.f32 0.1, %v1335_v41  ;;  %v1343_v32 = vadd.f32 %v6360_v10, %v1308_v35  ;;  %v1344_v51 = vadd.f32 %v6360_v10, %v1309_v42  ;;  %vm1367_vm6 = vcmp.ge.f32.partialorder %v1335_v41, 0.0  ;;  %v3376_v35 = vld [vmem:[%s9090_s5 + $0x100] sm:$0xff] }
 0x256   : > { %v1400_v26 = vmul.f32 0.1, %v1336_v38  ;;  %v1345_v56 = vadd.f32 %v6360_v10, %v1310_v0  ;;  %v6396_v6 = vadd.f32 %v6360_v10, %v1311_v9  ;;  %vm1368_vm7 = vcmp.ge.f32.partialorder %v1336_v38, 0.0  ;;  %3721 = vmatpush.msrb.mxu0 %v3376_v35  ;;  %5162 = vmatpush.msrb.mxu3 %v3376_v35 }
 0x257   : > { %v1401_v49 = vmul.f32 0.1, %v1337_v23  ;;  %v6399_v50 = vadd.f32 %v6360_v10, %v1312_v15  ;;  %v6402_v48 = vadd.f32 %v6360_v10, %v1313_v22  ;;  %vm1369_vm8 = vcmp.ge.f32.partialorder %v1337_v23, 0.0 }
 0x258   : > { %v1402_v1 = vmul.f32 0.1, %v1338_v18  ;;  %v6405_v43 = vadd.f32 %v6360_v10, %v1314_v46  ;;  %vm1370_vm9 = vcmp.ge.f32.partialorder %v1338_v18, 0.0  ;;  %v1403_v40 = vmul.f32 0.1, %v1339_v7 }
 0x259   : > { %v1431_v28 = vsel %vm1367_vm6, %v1335_v41, %v1399_v11  ;;  %v6408_v39 = vadd.f32 %v6360_v10, %v1315_v30  ;;  %vm1371_vm10 = vcmp.ge.f32.partialorder %v1339_v7, 0.0  ;;  %v1404_v60 = vmul.f32 0.1, %v1340_v31 }
 0x25a   : > { %v1432_v62 = vsel %vm1368_vm7, %v1336_v38, %v1400_v26  ;;  %v6411_v12 = vadd.f32 %v6360_v10, %v1316_v37  ;;  %vm1372_vm11 = vcmp.ge.f32.partialorder %v1340_v31, 0.0  ;;  %v1405_v14 = vmul.f32 0.1, %v1341_v4  ;;  %1469 = vst.msk [vmem:[#allocation2 + $0x18] sm:$0xff] %vm9104_vm2, %v1431_v28 }
 0x25b   : > { %v1433_v21 = vsel %vm1369_vm8, %v1337_v23, %v1401_v49  ;;  %v6414_v47 = vadd.f32 %v6360_v10, %v1317_v58  ;;  %vm1373_vm12 = vcmp.ge.f32.partialorder %v1341_v4, 0.0  ;;  %v1406_v54 = vmul.f32 0.1, %v1342_v36  ;;  %1470 = vst.msk [vmem:[#allocation2 + $0x20] sm:$0xff] %vm9104_vm2, %v1432_v62 }
 0x25c   : > { %v1434_v53 = vsel %vm1370_vm9, %v1338_v18, %v1402_v1  ;;  %v6418_v55 = vadd.f32 %v6360_v10, %v1318_v45  ;;  %vm1374_vm13 = vcmp.ge.f32.partialorder %v1342_v36, 0.0  ;;  %v1407_v34 = vmul.f32 0.1, %v1343_v32  ;;  %1471 = vst.msk [vmem:[#allocation2 + $0x28] sm:$0xff] %vm9104_vm2, %v1433_v21 }
 0x25d   : > { %v1435_v57 = vsel %vm1371_vm10, %v1339_v7, %v1403_v40  ;;  %v6422_v61 = vadd.f32 %v6360_v10, %v1319_v13  ;;  %vm1375_vm14 = vcmp.ge.f32.partialorder %v1343_v32, 0.0  ;;  %v1408_v3 = vmul.f32 0.1, %v1344_v51  ;;  %1472 = vst.msk [vmem:[#allocation2 + $0x30] sm:$0xff] %vm9104_vm2, %v1434_v53 }
 0x25e   : > { %v1436_v20 = vsel %vm1372_vm11, %v1340_v31, %v1404_v60  ;;  %v6427_v16 = vadd.f32 %v6360_v10, %v1320_v2  ;;  %vm1376_vm15 = vcmp.ge.f32.partialorder %v1344_v51, 0.0  ;;  %v1409_v19 = vmul.f32 0.1, %v1345_v56  ;;  %1473 = vst.msk [vmem:[#allocation2 + $0x38] sm:$0xff] %vm9104_vm2, %v1435_v57 }
 0x25f   : > { %v1437_v29 = vsel %vm1373_vm12, %v1341_v4, %v1405_v14  ;;  %v6436_v42 = vadd.f32 %v6360_v10, %v6362_v27  ;;  %vm1377_vm0 = vcmp.ge.f32.partialorder %v1345_v56, 0.0  ;;  %v1410_v0 = vmul.f32 0.1, %v6396_v6  ;;  %1474 = vst.msk [vmem:[#allocation2 + $0x40] sm:$0xff] %vm9104_vm2, %v1436_v20 }
 0x260   : > { %v1438_v9 = vsel %vm1374_vm13, %v1342_v36, %v1406_v54  ;;  %v6443_v15 = vadd.f32 %v6360_v10, %v6364_v8  ;;  %vm1378_vm3 = vcmp.ge.f32.partialorder %v6396_v6, 0.0  ;;  %v1411_v22 = vmul.f32 0.1, %v6399_v50  ;;  %1475 = vst.msk [vmem:[#allocation2 + $0x48] sm:$0xff] %vm9104_vm2, %v1437_v29 }
 0x261   : > { %v1439_v46 = vsel %vm1375_vm14, %v1343_v32, %v1407_v34  ;;  %vm1379_vm4 = vcmp.ge.f32.partialorder %v6399_v50, 0.0  ;;  %v1412_v30 = vmul.f32 0.1, %v6402_v48  ;;  %v1440_v37 = vsel %vm1376_vm15, %v1344_v51, %v1408_v3  ;;  %1476 = vst.msk [vmem:[#allocation2 + $0x50] sm:$0xff] %vm9104_vm2, %v1438_v9 }
 0x262   : > { %v1501_v58 = vlaneseq  ;;  %v6455_v45 = vadd.f32 %v6360_v10, %v6366_v33  ;;  %vm1380_vm5 = vcmp.ge.f32.partialorder %v6402_v48, 0.0  ;;  %v1413_v13 = vmul.f32 0.1, %v6405_v43  ;;  %1477 = vst.msk [vmem:[#allocation2 + $0x58] sm:$0xff] %vm9104_vm2, %v1439_v46 }
 0x263   : > { %v1441_v2 = vsel %vm1377_vm0, %v1345_v56, %v1409_v19  ;;  %vm1381_vm6 = vcmp.ge.f32.partialorder %v6405_v43, 0.0  ;;  %v1414_v27 = vmul.f32 0.1, %v6408_v39  ;;  %v1442_v8 = vsel %vm1378_vm3, %v6396_v6, %v1410_v0  ;;  %1478 = vst.msk [vmem:[#allocation2 + $0x60] sm:$0xff] %vm9104_vm2, %v1440_v37 }
 0x264   : > { %v6467_v33 = vshrl.u32 %v1501_v58, 7  ;;  %v6471_v41 = vadd.f32 %v6360_v10, %v6369_v44  ;;  %vm1382_vm7 = vcmp.ge.f32.partialorder %v6408_v39, 0.0  ;;  %v1415_v38 = vmul.f32 0.1, %v6411_v12  ;;  %1479 = vst.msk [vmem:[#allocation2 + $0x68] sm:$0xff] %vm9104_vm2, %v1441_v2  ;;  %v6485_v44 = vld [vmem:[#allocation2 + $0x29] sm:$0xff] }
 0x265   : > { %v1443_v23 = vsel %vm1379_vm4, %v6399_v50, %v1411_v22  ;;  %vm1383_vm8 = vcmp.ge.f32.partialorder %v6411_v12, 0.0  ;;  %v1416_v18 = vmul.f32 0.1, %v6414_v47  ;;  %v1444_v7 = vsel %vm1380_vm5, %v6402_v48, %v1412_v30  ;;  %1480 = vst.msk [vmem:[#allocation2 + $0x70] sm:$0xff] %vm9104_vm2, %v1442_v8  ;;  %5090 = vmatmul.msk.f32.vlgmr.msrb.gmra.mxu0 %vm9104_vm2, %v6485_v44 }
 0x266   : > { %9213 = vst [vmem:[#allocation3_spill] sm:$0xff] %v6467_v33  ;;  %v1503_v31 = vadd.s32 8, %v6467_v33  ;;  %v1360_v4 = vadd.f32 %v6360_v10, %v6371_v5  ;;  %vm1384_vm9 = vcmp.ge.f32.partialorder %v6414_v47, 0.0  ;;  %v1417_v36 = vmul.f32 0.1, %v6418_v55 }
 0x267   : > { %v1445_v11 = vsel %vm1381_vm6, %v6405_v43, %v1413_v13  ;;  %vm1385_vm10 = vcmp.ge.f32.partialorder %v6418_v55, 0.0  ;;  %v1418_v32 = vmul.f32 0.1, %v6422_v61  ;;  %v1446_v5 = vsel %vm1382_vm7, %v6408_v39, %v1414_v27  ;;  %1481 = vst.msk [vmem:[#allocation2 + $0x78] sm:$0xff] %vm9104_vm2, %v1443_v23  ;;  %v6530_v43 = vld [vmem:[#allocation2 + $0x31] sm:$0xff]  ;;  %v6606_v2 = vld [vmem:[#allocation2 + $0x41] sm:$0xff] }
 0x268   : > { %v1545_v51 = vand.u32 15, %v1503_v31  ;;  %v1361_v26 = vadd.f32 %v6360_v10, %v6373_v52  ;;  %vm1386_vm11 = vcmp.ge.f32.partialorder %v6422_v61, 0.0  ;;  %v1419_v56 = vmul.f32 0.1, %v6427_v16  ;;  %1482 = vst.msk [vmem:[#allocation2 + $0x80] sm:$0xff] %vm9104_vm2, %v1444_v7 }
 0x269   : > { %v1447_v6 = vsel %vm1383_vm8, %v6411_v12, %v1415_v38  ;;  %v1362_v49 = vadd.f32 %v6360_v10, %v6376_v17  ;;  %vm1387_vm12 = vcmp.ge.f32.partialorder %v6427_v16, 0.0  ;;  %v1420_v50 = vmul.f32 0.1, %v6436_v42  ;;  %1483 = vst.msk [vmem:[#allocation2 + $0x88] sm:$0xff] %vm9104_vm2, %v1445_v11  ;;  %v6702_v17 = vld [vmem:[#allocation2 + $0x37] sm:$0xff] }
 0x26a   : > { %v1448_v52 = vsel %vm1384_vm9, %v6414_v47, %v1416_v18  ;;  %vm1388_vm13 = vcmp.ge.f32.partialorder %v6436_v42, 0.0  ;;  %v1421_v48 = vmul.f32 0.1, %v6443_v15  ;;  %v1449_v1 = vsel %vm1385_vm10, %v6418_v55, %v1417_v36  ;;  %1484 = vst.msk [vmem:[#allocation2 + $0x90] sm:$0xff] %vm9104_vm2, %v1446_v5  ;;  %v6622_v18 = vld [vmem:[#allocation2 + $0x19] sm:$0xff]  ;;  %v6636_v5 = vld [vmem:[#allocation2 + $0x2f] sm:$0xff] }
 0x26b   : > { %vm6526_vm14 = vcmp.ne.s32.totalorder %v1545_v51, 15  ;;  %v1363_v40 = vadd.f32 %v6360_v10, %v6378_v25  ;;  %vm1389_vm15 = vcmp.ge.f32.partialorder %v6443_v15, 0.0  ;;  %v1422_v28 = vmul.f32 0.1, %v6455_v45  ;;  %1485 = vst.msk [vmem:[#allocation2 + $0x98] sm:$0xff] %vm9104_vm2, %v1447_v6  ;;  %v6638_v51 = vld [vmem:[#allocation2 + $0x28] sm:$0xff] }
 0x26c   : > { %v1450_v39 = vsel %vm1386_vm11, %v6422_v61, %v1418_v32  ;;  %v1364_v60 = vadd.f32 %v6360_v10, %v6380_v63  ;;  %vm1390_vm0 = vcmp.ge.f32.partialorder %v6455_v45, 0.0  ;;  %v1423_v62 = vmul.f32 0.1, %v6471_v41  ;;  %1486 = vst.msk [vmem:[#allocation2 + $0xa0] sm:$0xff] %vm9104_vm2, %v1448_v52 }
 0x26d   : > { %v1451_v25 = vsel %vm1387_vm12, %v6427_v16, %v1419_v56  ;;  %vm1391_vm3 = vcmp.ge.f32.partialorder %v6471_v41, 0.0  ;;  %v1424_v12 = vmul.f32 0.1, %v1360_v4  ;;  %v1452_v14 = vsel %vm1388_vm13, %v6436_v42, %v1420_v50  ;;  %1487 = vst.msk [vmem:[#allocation2 + $0xa8] sm:$0xff] %vm9104_vm2, %v1449_v1  ;;  %v6655_v1 = vld [vmem:[#allocation2 + $0x27] sm:$0xff] }
 0x26e   : > { %v2379_v63 = vsel %vm6526_vm14, %v6530_v43, 0.0  ;;  %v1365_v21 = vadd.f32 %v6360_v10, %v6383_v59  ;;  %vm1392_vm4 = vcmp.ge.f32.partialorder %v1360_v4, 0.0  ;;  %v1425_v47 = vmul.f32 0.1, %v1361_v26  ;;  %1488 = vst.msk [vmem:[#allocation2 + $0xb0] sm:$0xff] %vm9104_vm2, %v1450_v39 }
 0x26f   : > { %v1453_v54 = vsel %vm1389_vm15, %v6443_v15, %v1421_v48  ;;  %5091 = vmatmul.msk.f32.gmra.mxu0 %vm9104_vm2, %v2379_v63  ;;  %v1366_v53 = vadd.f32 %v6360_v10, %v6385_v24  ;;  %vm1393_vm5 = vcmp.ge.f32.partialorder %v1361_v26, 0.0  ;;  %v1426_v55 = vmul.f32 0.1, %v1362_v49  ;;  %1489 = vst.msk [vmem:[#allocation2 + $0xb8] sm:$0xff] %vm9104_vm2, %v1451_v25  ;;  %v6586_v15 = vld [vmem:[#allocation2 + $0x39] sm:$0xff] }
 0x270   : > { %v1454_v34 = vsel %vm1390_vm0, %v6455_v45, %v1422_v28  ;;  %vm1394_vm6 = vcmp.ge.f32.partialorder %v1362_v49, 0.0  ;;  %v1427_v59 = vmul.f32 0.1, %v1363_v40  ;;  %v1455_v57 = vsel %vm1391_vm3, %v6471_v41, %v1423_v62  ;;  %1490 = vst.msk [vmem:[#allocation2 + $0xc0] sm:$0xff] %vm9104_vm2, %v1452_v14 }
 0x271   : > { %v1517_v61 = vadd.s32 120, %v6467_v33  ;;  %vm1395_vm7 = vcmp.ge.f32.partialorder %v1363_v40, 0.0  ;;  %v1428_v10 = vmul.f32 0.1, %v1364_v60  ;;  %v1456_v24 = vsel %vm1392_vm4, %v1360_v4, %v1424_v12  ;;  %1491 = vst.msk [vmem:[#allocation2 + $0xc8] sm:$0xff] %vm9104_vm2, %v1453_v54  ;;  %v6668_v12 = vld [vmem:[#allocation2 + $0x21] sm:$0xff] }
 0x272   : > { %vm1396_vm8 = vcmp.ge.f32.partialorder %v1364_v60, 0.0  ;;  %v1429_v3 = vmul.f32 0.1, %v1365_v21  ;;  %v1457_v20 = vsel %vm1393_vm5, %v1361_v26, %v1425_v47  ;;  %1492 = vst.msk [vmem:[#allocation2 + $0xd0] sm:$0xff] %vm9104_vm2, %v1454_v34  ;;  %v1505_v16 = vadd.s32 24, %v6467_v33  ;;  %v6678_v54 = vld [vmem:[#allocation2 + $0x1f] sm:$0xff] }
 0x273   : > { %vm1397_vm9 = vcmp.ge.f32.partialorder %v1365_v21, 0.0  ;;  %v1430_v19 = vmul.f32 0.1, %v1366_v53  ;;  %v1458_v29 = vsel %vm1394_vm6, %v1362_v49, %v1426_v55  ;;  %1493 = vst.msk [vmem:[#allocation2 + $0xd8] sm:$0xff] %vm9104_vm2, %v1455_v57  ;;  %v6580_v35 = vld [vmem:[#allocation2 + $0x99] sm:$0xff]  ;;  %vm1398_vm10 = vcmp.ge.f32.partialorder %v1366_v53, 0.0 }
 0x274   : > { %v1459_v42 = vsel %vm1395_vm7, %v1363_v40, %v1427_v59  ;;  %1494 = vst.msk [vmem:[#allocation2 + $0xe0] sm:$0xff] %vm9104_vm2, %v1456_v24  ;;  %5104 = vmatmul.msk.f32.vlgmr.msrb.gmra.mxu3 %vm9104_vm2, %v6580_v35  ;;  %v1643_v0 = vand.u32 15, %v1517_v61  ;;  %v1460_v9 = vsel %vm1396_vm8, %v1364_v60, %v1428_v10  ;;  %v1461_v22 = vsel %vm1397_vm9, %v1365_v21, %v1429_v3  ;;  %v6597_v58 = vld [vmem:[#allocation2 + $0xa1] sm:$0xff]  ;;  %v6657_v40 = vld [vmem:[#allocation2 + $0x49] sm:$0xff]  ;;  %v6684_v55 = vld [vmem:[#allocation2 + $0x51] sm:$0xff] }
 0x275   : > { %1495 = vst.msk [vmem:[#allocation2 + $0xe8] sm:$0xff] %vm9104_vm2, %v1457_v20  ;;  %v1559_v46 = vand.u32 15, %v1505_v16  ;;  %v1462_v30 = vsel %vm1398_vm10, %v1366_v53, %v1430_v19  ;;  %v9216_v37 = vmov 0  ;;  %v1504_v45 = vadd.s32 16, %v6467_v33  ;;  %v6640_v26 = vld [vmem:[#allocation2 + $0xa9] sm:$0xff]  ;;  %v6695_v3 = vld [vmem:[#allocation2 + $0x81] sm:$0xff] }
 0x276   : > { %1496 = vst.msk [vmem:[#allocation2 + $0xf0] sm:$0xff] %vm9104_vm2, %v1458_v29  ;;  %vm6593_vm11 = vcmp.ne.s32.totalorder %v1643_v0, 15  ;;  %v5712_v27 = vmov 0.0   ;;  %v1538_v23 = vand.u32 15, %v6467_v33  ;;  %v1519_v7 = vadd.s32 136, %v6467_v33  ;;  %v6674_v63 = vld [vmem:[#allocation2 + $0xb1] sm:$0xff] }
 0x277   : > { %5092 = vmatmul.msk.f32.gmra.mxu0 %vm9104_vm2, %v6586_v15  ;;  %1497 = vst.msk [vmem:[#allocation2 + $0xf8] sm:$0xff] %vm9104_vm2, %v1459_v42  ;;  %v9217_v37 = vsel %vm6593_vm11, 4294967295, %v9216_v37  ;;  %vm6602_vm12 = vcmp.ne.s32.totalorder %v1559_v46, 15  ;;  %v2393_v8 = vsel %vm6593_vm11, %v6597_v58, 0.0  ;;  %v1552_v38 = vand.u32 15, %v1504_v45  ;;  %v6686_v59 = vld [vmem:[#allocation2 + $0x30] sm:$0xff] }
 0x278   : > { %1498 = vst.msk [vmem:[#allocation2 + $0x100] sm:$0xff] %vm9104_vm2, %v1460_v9  ;;  %v2381_v41 = vsel %vm6602_vm12, %v6606_v2, 0.0  ;;  %v9221_v31 = vmov 0  ;;  %vm6630_vm15 = vcmp.ne.s32.totalorder %v1538_v23, 0  ;;  %v9224_v36 = vmov 0  ;;  %v6706_v0 = vld [vmem:[#allocation2 + $0x18] sm:$0xff] }
 0x279   : > { %9218 = vst [vmem:[#allocation4_spill] sm:$0xff] %v6597_v58  ;;  %vm6626_vm13 = vcmp.ne.s32.totalorder %v1552_v38, 0  ;;  %v9225_v36 = vsel %vm6630_vm15, 4294967295, %v9224_v36  ;;  %v1507_v11 = vadd.s32 40, %v6467_v33  ;;  %v1657_v49 = vand.u32 15, %v1519_v7  ;;  %v6714_v45 = vld [vmem:[#allocation2 + $0x91] sm:$0xff] }
 0x27a   : > { %1499 = vst.msk [vmem:[#allocation2 + $0x108] sm:$0xff] %vm9104_vm2, %v1461_v22  ;;  %v9222_v31 = vsel %vm6626_vm13, 4294967295, %v9221_v31  ;;  %v2342_v25 = vsel %vm6630_vm15, %v6655_v1, 0.0  ;;  %v9230_v14 = vmov 0  ;;  %v1521_v21 = vadd.s32 152, %v6467_v33  ;;  %v6999_v53 = vld [vmem:[#allocation2 + $0x71] sm:$0xff] }
 0x27b   : > { %1500 = vst.msk [vmem:[#allocation2 + $0x110] sm:$0xff] %vm9104_vm2, %v1462_v30  ;;  %v1573_v60 = vand.u32 15, %v1507_v11  ;;  %vm6670_vm0 = vcmp.ne.s32.totalorder %v1657_v49, 15  ;;  %v1506_v47 = vadd.s32 32, %v6467_v33  ;;  %v2309_v61 = vsel %vm6526_vm14, %v6668_v12, 0.0 }
 0x27c   : > { %1464 = vst.msk [vmem:[#allocation2 + $0x8] sm:$0xff] %vm9104_vm2, %v5712_v27  ;;  %5105 = vmatmul.msk.f32.gmra.mxu3 %vm9104_vm2, %v2393_v8  ;;  %v9231_v14 = vsel %vm6670_vm0, 4294967295, %v9230_v14  ;;  %v2395_v10 = vsel %vm6670_vm0, %v6674_v63, 0.0  ;;  %v1523_v24 = vadd.s32 168, %v6467_v33  ;;  %v1671_v20 = vand.u32 15, %v1521_v21 }
 0x27d   : > { %1463 = vst.msk [vmem:[#allocation2] sm:$0xff] %vm9104_vm2, %v5712_v27  ;;  %vm6680_vm3 = vcmp.ne.s32.totalorder %v1573_v60, 15  ;;  %v1566_v16 = vand.u32 15, %v1506_v47  ;;  %v5204_v29 = vpack.i.bf16 %v6678_v54, %v6686_v59  ;;  %v1508_v9 = vadd.s32 48, %v6467_v33 }
 0x27e   : > { %1465 = vst.msk [vmem:[#allocation2 + $0x10] sm:$0xff] %vm9104_vm2, %v5712_v27  ;;  %v2383_v19 = vsel %vm6680_vm3, %v6684_v55, 0.0  ;;  %v1685_v46 = vand.u32 15, %v1523_v24  ;;  %v1525_v30 = vadd.s32 184, %v6467_v33  ;;  %v1509_v8 = vadd.s32 56, %v6467_v33 }
 0x27f   : > { %1466 = vst.msk [vmem:[#allocation2 + $0x118] sm:$0xff] %vm9104_vm2, %v5712_v27  ;;  %5093 = vmatmul.msk.f32.gmra.mxu0 %vm9104_vm2, %v2381_v41  ;;  %v2344_v41 = vsel %vm6626_vm13, %v6702_v17, 0.0  ;;  %v5209_v38 = vpack.i.bf16 %v6706_v0, %v6485_v44  ;;  %vm6728_vm4 = vcmp.ne.s32.totalorder %v1566_v16, 0  ;;  %v9242_v23 = vmov 0 }
 0x280   : > { %1467 = vst.msk [vmem:[#allocation2 + $0x120] sm:$0xff] %vm9104_vm2, %v5712_v27  ;;  %v9243_v23 = vsel %vm6728_vm4, 4294967295, %v9242_v23  ;;  %v2274_v11 = vsel %vm6626_vm13, %v6655_v1, 0.0  ;;  %vm6748_vm5 = vcmp.ne.s32.totalorder %v1685_v46, 15  ;;  %v1527_v60 = vadd.s32 200, %v6467_v33  ;;  %v6791_v46 = vld [vmem:[#allocation2 + $0x20] sm:$0xff] }
 0x281   : > { %1468 = vst.msk [vmem:[#allocation2 + $0x128] sm:$0xff] %vm9104_vm2, %v5712_v27  ;;  %v9239_v27 = vmov 0  ;;  %v1512_v21 = vadd.s32 80, %v6467_v33  ;;  %v1528_v7 = vadd.s32 208, %v6467_v33  ;;  %vm9279_vm13 = vcmask 261120  }
 0x282   : > { %9223 = vst [vmem:[#allocation5_spill] sm:$0xff] %v9222_v31  ;;  %v9295_v31 = vmov 0  ;;  %v9298_v58 = vmov 0 }
 0x283   : > { %v2110_v4 = vld [vmem:[#allocation2 + $0x8] sm:$0xff]  ;;  %9226 = vst [vmem:[#allocation6_spill] sm:$0xff] %v6638_v51 }
 0x284   : > { %v5179_v32 = vpack.i.bf16 %v2110_v4, %v6622_v18  ;;  %9227 = vst [vmem:[#allocation7_spill] sm:$0xff] %v6640_v26  ;;  %5106 = vmatmul.msk.f32.gmra.mxu3 %vm9104_vm2, %v6640_v26  ;;  %v6735_v4 = vld [vmem:[#allocation2 + $0x38] sm:$0xff] }
 0x285   : > { %v2143_v56 = vld [vmem:[#allocation2 + $0x11] sm:$0xff]  ;;  %9229 = vst [vmem:[#allocation9_spill] sm:$0xff] %v6655_v1  ;;  %v2142_v62 = vld [vmem:[#allocation2 + $0x9] sm:$0xff]  ;;  %v5219_v24 = vpack.i.bf16 %v2274_v11, %v6735_v4  ;;  %v1514_v11 = vadd.s32 96, %v6467_v33 }
 0x286   : > { %v6642_v6 = vld [vmem:[#allocation2 + $0x17] sm:$0xff]  ;;  %5180 = vrot.lane.b32.xlu0 %v5179_v32, %s5713_s19  ;;  %v2239_v50 = vsel %vm6526_vm14, %v2143_v56, 0.0  ;;  %9232 = vst [vmem:[#allocation10_spill] sm:$0xff] %v9231_v14  ;;  %v5184_v34 = vpack.i.bf16 %v2142_v62, %v2342_v25  ;;  %vm6718_vm14 = vcmp.ne.s32.totalorder %v1671_v20, 15  ;;  %v1580_v32 = vand.u32 15, %v1508_v9 }
 0x287   : > { %9228 = vst [vmem:[#allocation8_spill] sm:$0xff] %v6642_v6  ;;  %v2272_v52 = vsel %vm6630_vm15, %v6642_v6, 0.0  ;;  %v5199_v28 = vpack.i.bf16 %v2239_v50, %v6636_v5  ;;  %5094 = vmatmul.msk.f32.gmra.mxu0 %vm9104_vm2, %v6657_v40  ;;  %v2111_v57 = vld [vmem:[#allocation2 + $0x10] sm:$0xff]  ;;  %v9240_v27 = vsel %vm6718_vm14, 4294967295, %v9239_v27  ;;  %v1510_v56 = vadd.s32 64, %v6467_v33  ;;  %v6744_v50 = vld [vmem:[#allocation2 + $0xb9] sm:$0xff] }
 0x288   : > { %v5189_v39 = vpack.i.bf16 %v2272_v52, %v6638_v51  ;;  %9233 = vst [vmem:[#allocation11_spill] sm:$0xff] %v6674_v63  ;;  %v5194_v42 = vpack.i.bf16 %v2111_v57, %v2309_v61  ;;  %v6746_v52 = vld [vmem:[#allocation2 + $0xc1] sm:$0xff]  ;;  %v1587_v25 = vand.u32 15, %v1509_v8  ;;  %v5214_v57 = vpack.i.bf16 %v6622_v18, %v2344_v41  ;;  %v6767_v61 = vld [vmem:[#allocation2 + $0x59] sm:$0xff]  ;;  %v6859_v62 = vld [vmem:[#allocation2 + $0xf1] sm:$0xff] }
 0x289   : > { %5200 = vrot.lane.b32.xlu2 %v5199_v28, %s5714_s20  ;;  %9234 = vst [vmem:[#allocation12_spill] sm:$0xff] %v6678_v54  ;;  %v9247_v28 = vmov 0  ;;  %vm6773_vm6 = vcmp.ne.s32.totalorder %v1580_v32, 0  ;;  %v1594_v16 = vand.u32 15, %v1510_v56  ;;  %v1713_v9 = vand.u32 15, %v1527_v60  ;;  %v6803_v32 = vld [vmem:[#allocation2 + $0x3f] sm:$0xff] }
 0x28a   : > { %5190 = vrot.lane.b32.xlu1 %v5189_v39, %s5715_s23  ;;  %9237 = vst [vmem:[#allocation13_spill] sm:$0xff] %v6686_v59  ;;  %v9248_v28 = vsel %vm6748_vm5, 4294967295, %v9247_v28  ;;  %v1699_v39 = vand.u32 15, %v1525_v30  ;;  %v6793_v30 = vld [vmem:[#allocation2 + $0x40] sm:$0xff]  ;;  %v2241_v8 = vsel %vm6602_vm12, %v6668_v12, 0.0  ;;  %vm6798_vm8 = vcmp.ne.s32.totalorder %v1587_v25, 15 }
 0x28b   : > { %9238 = vst [vmem:[#allocation14_spill] sm:$0xff] %v6702_v17  ;;  %v6805_v56 = vld [vmem:[#allocation2 + $0x61] sm:$0xff]  ;;  %v1516_v60 = vadd.s32 112, %v6467_v33  ;;  %vm6816_vm9 = vcmp.ne.s32.totalorder %v1594_v16, 0  ;;  %v2397_v13 = vsel %vm6718_vm14, %v6746_v52, 0.0  ;;  %vm6832_vm10 = vcmp.ne.s32.totalorder %v1713_v9, 15 }
 0x28c   : > { %5107 = vmatmul.msk.f32.gmra.mxu3 %vm9104_vm2, %v2395_v10  ;;  %9241 = vst [vmem:[#allocation15_spill] sm:$0xff] %v9240_v27  ;;  %v1529_v10 = vadd.s32 216, %v6467_v33  ;;  %vm6785_vm7 = vcmp.ne.s32.totalorder %v1699_v39, 15  ;;  %v6814_v12 = vld [vmem:[#allocation2 + $0x47] sm:$0xff]  ;;  %v6849_v9 = vld [vmem:[#allocation2 + $0x57] sm:$0xff]  ;;  %v1622_v47 = vand.u32 15, %v1514_v11 }
 0x28d   : > { %9244 = vst [vmem:[#allocation16_spill] sm:$0xff] %v9243_v23  ;;  %v6830_v18 = vld [vmem:[#allocation2 + $0xe1] sm:$0xff]  ;;  %v1526_v11 = vadd.s32 192, %v6467_v33  ;;  %v2346_v49 = vsel %vm6728_vm4, %v6814_v12, 0.0  ;;  %v6908_v23 = vld [vmem:[#allocation2 + $0xc9] sm:$0xff]  ;;  %v6943_v54 = vld [vmem:[#allocation2 + $0x97] sm:$0xff] }
 0x28e   : > { %5185 = vrot.lane.b32.xlu0 %v5184_v34, %s5714_s20  ;;  %9245 = vst [vmem:[#allocation17_spill] sm:$0xff] %v6744_v50  ;;  %v1727_v39 = vand.u32 15, %v1529_v10  ;;  %v5239_v34 = vpack.i.bf16 %v2241_v8, %v6803_v32  ;;  %v9265_v8 = vmov 0  ;;  %v1518_v10 = vadd.s32 128, %v6467_v33  ;;  %v7006_v14 = vld [vmem:[#allocation2 + $0x50] sm:$0xff] }
 0x28f   : > { %5095 = vmatmul.msk.f32.gmra.mxu0 %vm9104_vm2, %v2383_v19  ;;  %9246 = vst [vmem:[#allocation18_spill] sm:$0xff] %v6746_v52  ;;  %v2311_v19 = vsel %vm6602_vm12, %v6530_v43, 0.0  ;;  %v6898_v52 = vld [vmem:[#allocation2 + $0x101] sm:$0xff]  ;;  %v1706_v26 = vand.u32 15, %v1526_v11  ;;  %v2313_v11 = vsel %vm6680_vm3, %v6606_v2, 0.0  ;;  %v1515_v41 = vadd.s32 104, %v6467_v33 }
 0x290   : > { %9249 = vst [vmem:[#allocation19_spill] sm:$0xff] %v9248_v28  ;;  %vm6851_vm1 = vcmp.ne.s32.totalorder %v1727_v39, 15  ;;  %v1511_v39 = vadd.s32 72, %v6467_v33  ;;  %v1650_v1 = vand.u32 15, %v1518_v10  ;;  %v6945_v10 = vld [vmem:[#allocation2 + $0xa7] sm:$0xff]  ;;  %v9305_v28 = vmov 0 }
 0x291   : > { %5205 = vrot.lane.b32.xlu2 %v5204_v29, %s5715_s23  ;;  %v6783_v29 = vld [vmem:[#allocation2 + $0xd1] sm:$0xff]  ;;  %9259 = vst [vmem:[#allocation21_spill] sm:$0xff] %v6830_v18  ;;  %v9266_v8 = vsel %vm6851_vm1, 4294967295, %v9265_v8 }
 0x292   : > { %5195 = vrot.lane.b32.xlu1 %v5194_v42, %s5713_s19  ;;  %9252 = vst [vmem:[#allocation20_spill] sm:$0xff] %v6783_v29  ;;  %vm6939_vm0 = vcmp.ne.s32.totalorder %v1650_v1, 0  ;;  %v6983_v1 = vld [vmem:[#allocation2 + $0xe7] sm:$0xff] }
 0x293   : > { %9264 = vst [vmem:[#allocation22_spill] sm:$0xff] %v6849_v9 }
 0x294   : > { %5108 = vmatmul.msk.f32.gmra.mxu3 %vm9104_vm2, %v6744_v50  ;;  %9267 = vst [vmem:[#allocation23_spill] sm:$0xff] %v6859_v62  ;;  %v9272_v50 = vmov 0 }
 0x295   : > { %9271 = vst [vmem:[#allocation25_spill] sm:$0xff] %v6898_v52 }
 0x296   : > { %5210 = vrot.lane.b32.xlu0 %v5209_v38, %s5713_s19  ;;  %v1608_v38 = vand.u32 15, %v1512_v21  ;;  %v1531_v21 = vadd.s32 232, %v6467_v33  ;;  %9278 = vst [vmem:[#allocation28_spill] sm:$0xff] %v6908_v23 }
 0x297   : > { %5096 = vmatmul.msk.f32.gmra.mxu0 %vm9104_vm2, %v6767_v61  ;;  %9284 = vst [vmem:[#allocation31_spill] sm:$0xff] %v6943_v54 }
 0x298   : > { %vm6841_vm12 = vcmp.ne.s32.totalorder %v1608_v38, 0  ;;  %v1741_v48 = vand.u32 15, %v1531_v21  ;;  %v1524_v38 = vadd.s32 176, %v6467_v33  ;;  %v5234_v21 = vpack.i.bf16 %v6638_v51, %v6586_v15  ;;  %9285 = vst [vmem:[#allocation32_spill] sm:$0xff] %v6945_v10 }
 0x299   : > { %5220 = vrot.lane.b32.xlu2 %v5219_v24, %s5715_s23  ;;  %v5229_v24 = vpack.i.bf16 %v6791_v46, %v2311_v19  ;;  %v2385_v19 = vsel %vm6798_vm8, %v6805_v56, 0.0  ;;  %v1530_v51 = vadd.s32 224, %v6467_v33 }
 0x29a   : > { %5215 = vrot.lane.b32.xlu1 %v5214_v57, %s5714_s20  ;;  %v5224_v57 = vpack.i.bf16 %v6636_v5, %v6793_v30  ;;  %v1692_v22 = vand.u32 15, %v1524_v38 }
 0x29c   : > { %5109 = vmatmul.msk.f32.gmra.mxu3 %vm9104_vm2, %v2397_v13  ;;  %v1636_v13 = vand.u32 15, %v1516_v60  ;;  %v1520_v60 = vadd.s32 144, %v6467_v33 }
 0x29e   : > { %5230 = vrot.lane.b32.xlu0 %v5229_v24, %s5713_s19  ;;  %v1522_v24 = vadd.s32 160, %v6467_v33  ;;  %vm6900_vm14 = vcmp.ne.s32.totalorder %v1636_v13, 0  ;;  %v1664_v63 = vand.u32 15, %v1520_v60  ;;  %v6915_v13 = vld [vmem:[#allocation2 + $0x77] sm:$0xff]  ;;  %v5244_v60 = vpack.i.bf16 %v6485_v44, %v2346_v49 }
 0x29f   : > { %5097 = vmatmul.msk.f32.gmra.mxu0 %vm9104_vm2, %v2385_v19  ;;  %v2276_v19 = vsel %vm6728_vm4, %v6702_v17, 0.0  ;;  %vm6887_vm2 = vcmp.ne.s32.totalorder %v1622_v47, 0  ;;  %v6895_v17 = vld [vmem:[#allocation2 + $0x48] sm:$0xff]  ;;  %v9273_v50 = vsel %vm6900_vm14, 4294967295, %v9272_v50  ;;  %vm6904_vm4 = vcmp.ne.s32.totalorder %v1741_v48, 15  ;;  %9280 = vst [vmem:[#allocation29_spill] sm:$0xff] %v6915_v13 }
 0x2a0   : > { %9274 = vst [vmem:[#allocation26_spill] sm:$0xff] %v9273_v50  ;;  %v9275_v47 = vmov 0  ;;  %v1678_v27 = vand.u32 15, %v1522_v24  ;;  %v1720_v48 = vand.u32 15, %v1528_v7  ;;  %v5249_v38 = vpack.i.bf16 %v2276_v19, %v6895_v17  ;;  %v6924_v24 = vld [vmem:[#allocation2 + $0x69] sm:$0xff] }
 0x2a1   : > { %5225 = vrot.lane.b32.xlu2 %v5224_v57, %s5715_s23  ;;  %v6885_v57 = vld [vmem:[#allocation2 + $0x67] sm:$0xff]  ;;  %v9276_v47 = vsel %vm6904_vm4, 4294967295, %v9275_v47  ;;  %v1734_v49 = vand.u32 15, %v1530_v51  ;;  %vm6947_vm15 = vcmp.ne.s32.totalorder %v1664_v63, 0  ;;  %vm6970_vm4 = vcmp.ne.s32.totalorder %v1706_v26, 0  ;;  %v7008_v26 = vld [vmem:[#allocation2 + $0x4f] sm:$0xff] }
 0x2a2   : > { %5240 = vrot.lane.b32.xlu1 %v5239_v34, %s5714_s20  ;;  %9268 = vst [vmem:[#allocation24_spill] sm:$0xff] %v6885_v57  ;;  %v9269_v34 = vmov 0  ;;  %v6937_v19 = vld [vmem:[#allocation2 + $0x87] sm:$0xff]  ;;  %vm6953_vm11 = vcmp.ne.s32.totalorder %v1678_v27, 0 }
 0x2a3   : > { %v9270_v34 = vsel %vm6887_vm2, 4294967295, %v9269_v34  ;;  %9277 = vst [vmem:[#allocation27_spill] sm:$0xff] %v9276_v47  ;;  %v6962_v51 = vld [vmem:[#allocation2 + $0xc7] sm:$0xff]  ;;  %vm6974_vm2 = vcmp.ne.s32.totalorder %v1720_v48, 0  ;;  %vm6985_vm14 = vcmp.ne.s32.totalorder %v1734_v49, 0  ;;  %v2399_v48 = vsel %vm6748_vm5, %v6783_v29, 0.0 }
 0x2a4   : > { %5110 = vmatmul.msk.f32.gmra.mxu3 %vm9279_vm13, %v6908_v23  ;;  %9281 = vst [vmem:[#allocation30_spill] sm:$0xff] %v6937_v19  ;;  %v6951_v23 = vld [vmem:[#allocation2 + $0xb7] sm:$0xff]  ;;  %v9296_v31 = vsel %vm6974_vm2, 4294967295, %v9295_v31  ;;  %v9299_v58 = vsel %vm6985_vm14, 4294967295, %v9298_v58 }
 0x2a5   : > { %9288 = vst [vmem:[#allocation33_spill] sm:$0xff] %v6951_v23  ;;  %v7046_v29 = vld [vmem:[#allocation2 + $0x58] sm:$0xff] }
 0x2a6   : > { %5235 = vrot.lane.b32.xlu0 %v5234_v21, %s5713_s19  ;;  %v1601_v21 = vand.u32 15, %v1511_v39  ;;  %v6968_v39 = vld [vmem:[#allocation2 + $0xd7] sm:$0xff]  ;;  %9297 = vst [vmem:[#allocation34_spill] sm:$0xff] %v9296_v31  ;;  %v7075_v31 = vld [vmem:[#allocation2 + $0x60] sm:$0xff] }
 0x2a7   : > { %5098 = vmatmul.msk.f32.gmra.mxu0 %vm9279_vm13, %v6924_v24  ;;  %vm6964_vm13 = vcmp.ne.s32.totalorder %v1692_v22, 0  ;;  %v2243_v22 = vsel %vm6680_vm3, %v6530_v43, 0.0  ;;  %9300 = vst [vmem:[#allocation35_spill] sm:$0xff] %v9299_v58  ;;  %v7001_v43 = vld [vmem:[#allocation2 + $0xf7] sm:$0xff]  ;;  %vm9304_vm3 = vcmask 261120  }
 0x2a8   : > { %vm6995_vm1 = vcmp.ne.s32.totalorder %v1601_v21, 15  ;;  %9303 = vst [vmem:[#allocation36_spill] sm:$0xff] %v7001_v43  ;;  %v5264_v21 = vpack.i.bf16 %v6735_v4, %v6657_v40  ;;  %v2315_v43 = vsel %vm6798_vm8, %v6684_v55, 0.0 }
 0x2a9   : > { %5250 = vrot.lane.b32.xlu2 %v5249_v38, %s5715_s23  ;;  %v1532_v38 = vadd.s32 240, %v6467_v33 }
 0x2aa   : > { %5245 = vrot.lane.b32.xlu1 %v5244_v60, %s5714_s20  ;;  %v5259_v60 = vpack.i.bf16 %v6686_v59, %v2313_v11  ;;  %v2278_v59 = vsel %vm6773_vm6, %v6814_v12, 0.0 }
 0x2ab   : > { %v1748_v49 = vand.u32 15, %v1532_v38  ;;  %v2387_v38 = vsel %vm6995_vm1, %v6999_v53, 0.0 }
 0x2ac   : > { %5111 = vmatmul.msk.f32.gmra.mxu3 %vm9304_vm3, %v2399_v48  ;;  %v5254_v48 = vpack.i.bf16 %v6803_v32, %v7006_v14 }
 0x2ad   : > { %vm7023_vm5 = vcmp.ne.s32.totalorder %v1748_v49, 0  ;;  %v5269_v49 = vpack.i.bf16 %v2243_v22, %v7008_v26  ;;  %v2348_v22 = vsel %vm6773_vm6, %v6849_v9, 0.0 }
 0x2ae   : > { %v9306_v28 = vsel %vm7023_vm5, 4294967295, %v9305_v28  ;;  %5260 = vrot.lane.b32.xlu0 %v5259_v60, %s5713_s19  ;;  %v1513_v60 = vadd.s32 88, %v6467_v33  ;;  %vm9308_vm5 = vmmov %vm9304_vm3 }
 0x2af   : > { %9307 = vst [vmem:[#allocation37_spill] sm:$0xff] %v9306_v28  ;;  %5099 = vmatmul.msk.f32.gmra.mxu0 %vm9304_vm3, %v2387_v38  ;;  %v7054_v38 = vld [vmem:[#allocation2 + $0xd9] sm:$0xff]  ;;  %v5274_v28 = vpack.i.bf16 %v6586_v15, %v2348_v22  ;;  %vm9311_vm14 = vmmov %vm9308_vm5 }
 0x2b0   : > { %v1615_v58 = vand.u32 15, %v1513_v60  ;;  %v7077_v15 = vld [vmem:[#allocation2 + $0x5f] sm:$0xff]  ;;  %v2245_v60 = vsel %vm6798_vm8, %v6606_v2, 0.0  ;;  %v7096_v2 = vld [vmem:[#allocation2 + $0x68] sm:$0xff]  ;;  %vm9313_vm8 = vmmov %vm9308_vm5 }
 0x2b1   : > { %5255 = vrot.lane.b32.xlu2 %v5254_v48, %s5715_s23  ;;  %v7059_v48 = vld [vmem:[#allocation2 + $0x79] sm:$0xff]  ;;  %v5299_v22 = vpack.i.bf16 %v2245_v60, %v7077_v15  ;;  %v2350_v60 = vsel %vm6816_vm9, %v6885_v57, 0.0 }
 0x2b2   : > { %5270 = vrot.lane.b32.xlu1 %v5269_v49, %s5714_s20  ;;  %v5279_v49 = vpack.i.bf16 %v2278_v59, %v7046_v29  ;;  %v5289_v59 = vpack.i.bf16 %v6793_v30, %v2315_v43  ;;  %v5284_v43 = vpack.i.bf16 %v7008_v26, %v7075_v31 }
 0x2b4   : > { %5112 = vmatmul.msk.f32.gmra.mxu3 %vm9304_vm3, %v7054_v38  ;;  %vm7070_vm3 = vcmp.ne.s32.totalorder %v1615_v58, 15 }
 0x2b5   : > { %v2389_v58 = vsel %vm7070_vm3, %v6695_v3, 0.0 }
 0x2b6   : > { %5265 = vrot.lane.b32.xlu0 %v5264_v21, %s5713_s19 }
 0x2b7   : > { %5100 = vmatmul.msk.f32.gmra.mxu0 %vm9308_vm5, %v7059_v48 }
 0x2b9   : > { %5280 = vrot.lane.b32.xlu2 %v5279_v49, %s5715_s23  ;;  %v5294_v49 = vpack.i.bf16 %v6895_v17, %v6767_v61 }
 0x2ba   : > { %5275 = vrot.lane.b32.xlu1 %v5274_v28, %s5714_s20  ;;  %v2401_v28 = vsel %vm6785_vm7, %v6830_v18, 0.0  ;;  %v1629_v18 = vand.u32 15, %v1515_v41  ;;  %v7137_v41 = vld [vmem:[#allocation2 + $0x6f] sm:$0xff] }
 0x2bb   : > { %9314 = vst [vmem:[#allocation38_spill] sm:$0xff] %v7137_v41 }
 0x2bc   : > { %5113 = vmatmul.msk.f32.gmra.mxu3 %vm9308_vm5, %v2401_v28  ;;  %v7107_v28 = vld [vmem:[#allocation2 + $0xe9] sm:$0xff] }
 0x2be   : > { %5290 = vrot.lane.b32.xlu0 %v5289_v59, %s5713_s19  ;;  %v2280_v59 = vsel %vm6816_vm9, %v6849_v9, 0.0  ;;  %v5304_v9 = vpack.i.bf16 %v6657_v40, %v2350_v60  ;;  %v3374_v40 = vld [vmem:[%s9090_s5 + $0xf0] sm:$0xff]  ;;  %v2247_v60 = vsel %vm6995_vm1, %v6684_v55, 0.0  ;;  %v3372_v55 = vld [vmem:[%s9090_s5 + $0xe0] sm:$0xff] }
 0x2bf   : > { %5101 = vmatmul.msk.f32.gmra.mxu0 %vm9311_vm14, %v2389_v58  ;;  %v3359_v58 = vld [vmem:[%s9090_s5 + $0x78] sm:$0xff]  ;;  %vm9312_vm14 = vmmov %vm9308_vm5  ;;  %v5309_v33 = vpack.i.bf16 %v2280_v59, %v7096_v2  ;;  %v7135_v59 = vld [vmem:[#allocation2 + $0x70] sm:$0xff]  ;;  %vm7139_vm5 = vcmp.ne.s32.totalorder %v1629_v18, 15 }
 0x2c0   : > { %3480 = vmatpush.msrb.mxu1 %v3359_v58  ;;  %v2317_v58 = vsel %vm6995_vm1, %v6805_v56, 0.0  ;;  %v3373_v18 = vld [vmem:[%s9090_s5 + $0xe8] sm:$0xff]  ;;  %v2391_v11 = vsel %vm7139_vm5, %v6714_v45, 0.0  ;;  %vm9318_vm1 = vmmov %vm9313_vm8 }
 0x2c1   : > { %5285 = vrot.lane.b32.xlu2 %v5284_v43, %s5715_s23  ;;  %v3375_v43 = vld [vmem:[%s9090_s5 + $0xf8] sm:$0xff] }
 0x2c2   : > { %5300 = vrot.lane.b32.xlu1 %v5299_v22, %s5714_s20  ;;  %v7118_v22 = vld [vmem:[#allocation2 + $0x89] sm:$0xff]  ;;  %3593 = vmatpush.msrb.mxu2 %v3375_v43  ;;  %v2403_v43 = vsel %vm6832_vm10, %v6859_v62, 0.0  ;;  %v5329_v62 = vpack.i.bf16 %v2247_v60, %v7137_v41 }
 0x2c3   : > { %v3354_v60 = vld [vmem:[%s9090_s5 + $0x50] sm:$0xff] }
 0x2c4   : > { %5114 = vmatmul.msk.f32.gmra.mxu3 %vm9312_vm14, %v7107_v28  ;;  %3594 = vmatpush.msrb.mxu2 %v3374_v40  ;;  %vm9317_vm14 = vmmov %vm9313_vm8  ;;  %v5314_v40 = vpack.i.bf16 %v7077_v15, %v7135_v59 }
 0x2c6   : > { %5295 = vrot.lane.b32.xlu0 %v5294_v49, %s5713_s19  ;;  %v3358_v49 = vld [vmem:[%s9090_s5 + $0x70] sm:$0xff]  ;;  %3595 = vmatpush.msrb.mxu2 %v3373_v18  ;;  %v7185_v18 = vld [vmem:[#allocation2 + $0x78] sm:$0xff] }
 0x2c7   : > { %5102 = vmatmul.msk.f32.gmra.mxu0 %vm9313_vm8, %v7118_v22  ;;  %3481 = vmatpush.msrb.mxu1 %v3358_v49  ;;  %v3357_v49 = vld [vmem:[%s9090_s5 + $0x68] sm:$0xff]  ;;  %9319 = vst [vmem:[#allocation39_spill] sm:$0xff] %v7185_v18  ;;  %vm9321_vm8 = vmmov %vm9318_vm1 }
 0x2c8   : > { %3596 = vmatpush.msrb.mxu2 %v3372_v55  ;;  %v2282_v55 = vsel %vm6841_vm12, %v6885_v57, 0.0  ;;  %v3368_v57 = vld [vmem:[%s9090_s5 + $0xc0] sm:$0xff] }
 0x2c9   : > { %5310 = vrot.lane.b32.xlu2 %v5309_v33, %s5715_s23  ;;  %3482 = vmatpush.msrb.mxu1 %v3357_v49  ;;  %v3370_v49 = vld [vmem:[%s9090_s5 + $0xd0] sm:$0xff] }
 0x2ca   : > { %5305 = vrot.lane.b32.xlu1 %v5304_v9, %s5714_s20  ;;  %v5319_v9 = vpack.i.bf16 %v7006_v14, %v2317_v58  ;;  %v3356_v58 = vld [vmem:[%s9090_s5 + $0x60] sm:$0xff] }
 0x2cb   : > { %3483 = vmatpush.msrb.mxu1 %v3356_v58  ;;  %v5324_v58 = vpack.i.bf16 %v7046_v29, %v6924_v24 }
 0x2cc   : > { %5115 = vmatmul.msk.f32.gmra.mxu3 %vm9317_vm14, %v2403_v43  ;;  %v3355_v43 = vld [vmem:[%s9090_s5 + $0x58] sm:$0xff]  ;;  %vm9324_vm14 = vnez %v9266_v8 }
 0x2cd   : > { %3484 = vmatpush.msrb.mxu1 %v3355_v43  ;;  %v3369_v43 = vld [vmem:[%s9090_s5 + $0xc8] sm:$0xff] }
 0x2ce   : > { %5320 = vrot.lane.b32.xlu0 %v5319_v9, %s5713_s19  ;;  %v3371_v9 = vld [vmem:[%s9090_s5 + $0xd8] sm:$0xff] }
 0x2cf   : > { %5103 = vmatmul.msk.f32.gmra.mxu0 %vm9318_vm1, %v2391_v11  ;;  %3597 = vmatpush.msrb.mxu2 %v3371_v9  ;;  %v7195_v11 = vld [vmem:[#allocation2 + $0xf9] sm:$0xff] }
 0x2d0   : > { %9320 = vst [vmem:[#allocation40_spill] sm:$0xff] %v7195_v11  ;;  %3485 = vmatpush.msrb.mxu1 %v3354_v60  ;;  %v3352_v9 = vld [vmem:[%s9090_s5 + $0x40] sm:$0xff]  ;;  %v5339_v60 = vpack.i.bf16 %v2282_v55, %v7185_v18  ;;  %v3350_v55 = vld [vmem:[%s9090_s5 + $0x30] sm:$0xff] }
 0x2d1   : > { %5315 = vrot.lane.b32.xlu2 %v5314_v40, %s5715_s23  ;;  %3598 = vmatpush.msrb.mxu2 %v3370_v49  ;;  %v3353_v40 = vld [vmem:[%s9090_s5 + $0x48] sm:$0xff] }
 0x2d2   : > { %5330 = vrot.lane.b32.xlu1 %v5329_v62, %s5714_s20  ;;  %v2352_v62 = vsel %vm6841_vm12, %v6915_v13, 0.0  ;;  %3486 = vmatpush.msrb.mxu1 %v3353_v40 }
 0x2d3   : > { %v5334_v49 = vpack.i.bf16 %v6767_v61, %v2352_v62  ;;  %3599 = vmatpush.msrb.mxu2 %v3369_v43  ;;  %v3367_v61 = vld [vmem:[%s9090_s5 + $0xb8] sm:$0xff]  ;;  %v3366_v62 = vld [vmem:[%s9090_s5 + $0xb0] sm:$0xff]  ;;  %v7232_v43 = vld [vmem:[#allocation2 + $0x80] sm:$0xff] }
 0x2d4   : > { %5116 = vmatmul.msk.f32.gmra.mxu3 %vm9321_vm8, %v7195_v11  ;;  %v3351_v11 = vld [vmem:[%s9090_s5 + $0x38] sm:$0xff]  ;;  %3487 = vmatpush.msrb.mxu1 %v3352_v9  ;;  %9322 = vst [vmem:[#allocation41_spill] sm:$0xff] %v7232_v43  ;;  %vm9327_vm8 = vmmov %vm9318_vm1 }
 0x2d5   : > { %3600 = vmatpush.msrb.mxu2 %v3368_v57  ;;  %v7234_v9 = vld [vmem:[#allocation2 + $0x7f] sm:$0xff]  ;;  %v3349_v57 = vld [vmem:[%s9090_s5 + $0x28] sm:$0xff] }
 0x2d6   : > { %5325 = vrot.lane.b32.xlu0 %v5324_v58, %s5713_s19  ;;  %v2319_v58 = vsel %vm7070_vm3, %v6999_v53, 0.0  ;;  %3488 = vmatpush.msrb.mxu1 %v3351_v11  ;;  %9323 = vst [vmem:[#allocation42_spill] sm:$0xff] %v7234_v9  ;;  %v3365_v11 = vld [vmem:[%s9090_s5 + $0xa8] sm:$0xff] }
 0x2d7   : > { %v5349_v40 = vpack.i.bf16 %v7075_v31, %v2319_v58  ;;  %3601 = vmatpush.msrb.mxu2 %v3367_v61  ;;  %v3348_v58 = vld [vmem:[%s9090_s5 + $0x20] sm:$0xff] }
 0x2d8   : > { %3489 = vmatpush.msrb.mxu1 %v3350_v55  ;;  %v3364_v61 = vld [vmem:[%s9090_s5 + $0xa0] sm:$0xff]  ;;  %v3347_v55 = vld [vmem:[%s9090_s5 + $0x18] sm:$0xff] }
 0x2d9   : > { %5340 = vrot.lane.b32.xlu2 %v5339_v60, %s5715_s23  ;;  %v2249_v60 = vsel %vm7070_vm3, %v6805_v56, 0.0  ;;  %3602 = vmatpush.msrb.mxu2 %v3366_v62  ;;  %v5344_v56 = vpack.i.bf16 %v7137_v41, %v7232_v43  ;;  %v3363_v62 = vld [vmem:[%s9090_s5 + $0x98] sm:$0xff]  ;;  %vm9325_vm3 = vnez %v9270_v34 }
 0x2da   : > { %5335 = vrot.lane.b32.xlu1 %v5334_v49, %s5714_s20  ;;  %v2405_v49 = vsel %vm9324_vm14, %v6898_v52, 0.0  ;;  %v5359_v21 = vpack.i.bf16 %v2249_v60, %v7234_v9  ;;  %3490 = vmatpush.msrb.mxu1 %v3349_v57  ;;  %v3346_v60 = vld [vmem:[%s9090_s5 + $0x10] sm:$0xff]  ;;  %v7274_v57 = vld [vmem:[#allocation2 + $0x88] sm:$0xff]  ;;  %vm9186_vm14 = vcmask 785408  }
 0x2db   : > { %3603 = vmatpush.msrb.mxu2 %v3365_v11  ;;  %v2284_v11 = vsel %vm9325_vm3, %v6915_v13, 0.0 }
 0x2dc   : > { %5117 = vmatmul.msk.f32.gmra.mxu3 %vm9318_vm1, %v2405_v49  ;;  %3491 = vmatpush.msrb.mxu1 %v3348_v58  ;;  %v5354_v49 = vpack.i.bf16 %v7096_v2, %v7059_v48  ;;  %v3362_v58 = vld [vmem:[%s9090_s5 + $0x90] sm:$0xff]  ;;  %v5369_v13 = vpack.i.bf16 %v2284_v11, %v7274_v57  ;;  %vm9330_vm1 = vnez %v9276_v47 }
 0x2dd   : > { %3604 = vmatpush.msrb.mxu2 %v3364_v61  ;;  %v3345_v61 = vld [vmem:[%s9090_s5 + $0x8] sm:$0xff] }
 0x2de   : > { %5350 = vrot.lane.b32.xlu0 %v5349_v40, %s5713_s19  ;;  %3492 = vmatpush.msrb.mxu1 %v3347_v55  ;;  %v3361_v55 = vld [vmem:[%s9090_s5 + $0x88] sm:$0xff] }
 0x2df   : > { %3605 = vmatpush.msrb.mxu2 %v3363_v62  ;;  %v3344_v62 = vld [vmem:[%s9090_s5] sm:$0xff] }
 0x2e0   : > { %3493 = vmatpush.msrb.mxu1 %v3346_v60  ;;  %v2321_v60 = vsel %vm7139_vm5, %v6695_v3, 0.0 }
 0x2e1   : > { %5345 = vrot.lane.b32.xlu2 %v5344_v56, %s5715_s23  ;;  %v2354_v56 = vsel %vm9325_vm3, %v6937_v19, 0.0  ;;  %3606 = vmatpush.msrb.mxu2 %v3362_v58  ;;  %v7314_v58 = vld [vmem:[#allocation2 + $0x90] sm:$0xff]  ;;  %vm9336_vm3 = vcmask 261120  }
 0x2e2   : > { %5360 = vrot.lane.b32.xlu1 %v5359_v21, %s5714_s20  ;;  %v7282_v21 = vld [vmem:[#allocation2 + $0x109] sm:$0xff]  ;;  %v5364_v52 = vpack.i.bf16 %v6924_v24, %v2354_v56  ;;  %3494 = vmatpush.msrb.mxu1 %v3345_v61  ;;  %v3360_v24 = vld [vmem:[%s9090_s5 + $0x80] sm:$0xff]  ;;  %v5379_v56 = vpack.i.bf16 %v7135_v59, %v2321_v60  ;;  %v7335_v60 = vld [vmem:[#allocation2 + $0x98] sm:$0xff] }
 0x2e3   : > { %v7267_v40 = vpop.permute.xlu2 %5200  ;;  %9326 = vst [vmem:[#allocation43_spill] sm:$0xff] %v7282_v21  ;;  %3607 = vmatpush.msrb.mxu2 %v3361_v55  ;;  %v5374_v55 = vpack.i.bf16 %v7234_v9, %v7314_v58  ;;  %v1982_v9 = vld [vmem:[#allocation2 + $0x7] sm:$0xff] }
 0x2e4   : > { %5118 = vmatmul.msk.f32.gmra.mxu3 %vm9327_vm8, %v7282_v21  ;;  %3495 = vmatpush.msrb.mxu1 %v3344_v62 }
 0x2e5   : > { %3608 = vmatpush.msrb.mxu2 %v3360_v24 }
 0x2e6   : > { %5355 = vrot.lane.b32.xlu0 %v5354_v49, %s5713_s19  ;;  %v7306_v49 = vld [vmem:[#allocation2 + $0x111] sm:$0xff] }
 0x2e7   : > { %9328 = vst [vmem:[#allocation44_spill] sm:$0xff] %v7306_v49  ;;  %v2407_v61 = vsel %vm9330_vm1, %v7306_v49, 0.0  ;;  %vm3182_vm1 = vcmask 523264  }
 0x2e9   : > { %5370 = vrot.lane.b32.xlu2 %v5369_v13, %s5715_s23  ;;  %v7316_v13 = vld [vmem:[#allocation2 + $0x8f] sm:$0xff] }
 0x2ea   : > { %5365 = vrot.lane.b32.xlu1 %v5364_v52, %s5714_s20  ;;  %9329 = vst [vmem:[#allocation45_spill] sm:$0xff] %v7316_v13  ;;  %v2251_v52 = vsel %vm7139_vm5, %v6999_v53, 0.0  ;;  %v5384_v53 = vpack.i.bf16 %v7185_v18, %v7118_v22  ;;  %vm9331_vm5 = vnez %v9273_v50 }
 0x2eb   : > { %v7311_v11 = vpop.permute.xlu2 %5205  ;;  %v5389_v62 = vpack.i.bf16 %v2251_v52, %v7316_v13  ;;  %v2286_v24 = vsel %vm9331_vm5, %v6937_v19, 0.0 }
 0x2ec   : > { %5119 = vmatmul.msk.f32.gmra.mxu3 %vm9327_vm8, %v2407_v61  ;;  %v5399_v52 = vpack.i.bf16 %v2286_v24, %v7335_v60  ;;  %vm9332_vm8 = vnez %v9217_v37  ;;  %v7356_v24 = vld [vmem:[#allocation2 + $0x9f] sm:$0xff] }
 0x2ed   : > { %9333 = vst [vmem:[#allocation46_spill] sm:$0xff] %v7356_v24  ;;  %v9335_v50 = vsel %vm9332_vm8, %v6695_v3, 0.0 }
 0x2ee   : > { %5380 = vrot.lane.b32.xlu0 %v5379_v56, %s5713_s19  ;;  %v2356_v56 = vsel %vm9331_vm5, %v6943_v54, 0.0  ;;  %vm9334_vm5 = vnez %v9225_v36 }
 0x2ef   : > { %v5394_v61 = vpack.i.bf16 %v7059_v48, %v2356_v56 }
 0x2f1   : > { %5375 = vrot.lane.b32.xlu2 %v5374_v55, %s5715_s23 }
 0x2f2   : > { %5390 = vrot.lane.b32.xlu1 %v5389_v62, %s5714_s20  ;;  %v2323_v62 = vsel %vm9332_vm8, %v6714_v45, 0.0  ;;  %vm9338_vm8 = vmmov %vm9336_vm3 }
 0x2f3   : > { %v7331_v33 = vpop.permute.xlu2 %5220  ;;  %v5409_v21 = vpack.i.bf16 %v7232_v43, %v2323_v62  ;;  %v5419_v62 = vpack.i.bf16 %v9335_v50, %v7356_v24 }
 0x2f6   : > { %5385 = vrot.lane.b32.xlu0 %v5384_v53, %s5713_s19  ;;  %v7354_v53 = vld [vmem:[#allocation2 + $0xa0] sm:$0xff] }
 0x2f8   : > { %v5181_v55 = vpop.permute.xlu0 %5180 }
 0x2f9   : > { %5400 = vrot.lane.b32.xlu2 %v5399_v52, %s5715_s23  ;;  %v5183_v48 = vunpack.i.h.bf16 %v5181_v55  ;;  %v5182_v56 = vunpack.i.l.bf16 %v5181_v55  ;;  %v2078_v52 = vsel %vm9334_vm5, %v1982_v9, 0.0  ;;  %vm9337_vm5 = vmmov %vm9336_vm3 }
 0x2fa   : > { %5395 = vrot.lane.b32.xlu1 %v5394_v61, %s5714_s20  ;;  %v5404_v61 = vpack.i.bf16 %v7316_v13, %v7354_v53 }
 0x2fb   : > { %v7351_v19 = vpop.permute.xlu2 %5225  ;;  %v3150_v36 = vsel %vm9336_vm3, %v2078_v52, %v5183_v48  ;;  %v3248_v9 = vsel %vm9337_vm5, %v6706_v0, %v5182_v56  ;;  %v2358_v0 = vsel %vm6939_vm0, %v6945_v10, 0.0  ;;  %v5414_v52 = vpack.i.bf16 %v7274_v57, %v6580_v35 }
 0x2fc   : > { %v5191_v49 = vpop.permute.xlu1 %5190 }
 0x2fd   : > { %v5193_v13 = vunpack.i.h.bf16 %v5191_v49  ;;  %v5192_v43 = vunpack.i.l.bf16 %v5191_v49  ;;  %v1983_v49 = vld [vmem:[#allocation2 + $0xf] sm:$0xff] }
 0x2fe   : > { %5410 = vrot.lane.b32.xlu0 %v5409_v21, %s5713_s19 }
 0x300   : > { %v5186_v47 = vpop.permute.xlu0 %5185 }
 0x301   : > { %5405 = vrot.lane.b32.xlu2 %v5404_v61, %s5715_s23  ;;  %v5188_v55 = vunpack.i.h.bf16 %v5186_v47  ;;  %v5187_v21 = vunpack.i.l.bf16 %v5186_v47  ;;  %v2288_v47 = vsel %vm6939_vm0, %v6943_v54, 0.0  ;;  %v9355_v54 = vld [vmem:[#allocation13_spill] sm:$0xff] }
 0x302   : > { %5420 = vrot.lane.b32.xlu1 %v5419_v62, %s5714_s20  ;;  %v7377_v62 = vld [vmem:[#allocation2 + $0xa8] sm:$0xff] }
 0x303   : > { %v7373_v37 = vpop.permute.xlu2 %5250  ;;  %v3183_v50 = vsel %vm3182_vm1, %v3150_v36, %v5188_v55  ;;  %v3280_v41 = vsel %vm3182_vm1, %v3248_v9, %v5187_v21  ;;  %v5429_v55 = vpack.i.bf16 %v2288_v47, %v7377_v62  ;;  %v5424_v21 = vpack.i.bf16 %v7118_v22, %v2358_v0  ;;  %v7405_v0 = vld [vmem:[#allocation2 + $0xb0] sm:$0xff] }
 0x304   : > { %v5196_v3 = vpop.permute.xlu1 %5195  ;;  %v3216_v48 = vsel %vm9186_vm14, %v3183_v50, %v5193_v13  ;;  %v3312_v56 = vsel %vm9186_vm14, %v3280_v41, %v5192_v43  ;;  %v5203_v13 = vunpack.i.h.bf16 %v7267_v40  ;;  %v5202_v41 = vunpack.i.l.bf16 %v7267_v40  ;;  %v7407_v40 = vld [vmem:[#allocation2 + $0xaf] sm:$0xff] }
 0x305   : > { %v5198_v61 = vunpack.i.h.bf16 %v5196_v3  ;;  %v5197_v18 = vunpack.i.l.bf16 %v5196_v3  ;;  %3496 = vmatmul.f32.vlgmr.msrb.gmra.mxu1 %v3216_v48  ;;  %3609 = vmatmul.f32.vlgmr.msrb.gmra.mxu2 %v3312_v56  ;;  %v5208_v22 = vunpack.i.h.bf16 %v7311_v11  ;;  %v5207_v50 = vunpack.i.l.bf16 %v7311_v11  ;;  %v9339_v56 = vld [vmem:[#allocation10_spill] sm:$0xff] }
 0x306   : > { %5415 = vrot.lane.b32.xlu0 %v5414_v52, %s5713_s19  ;;  %vm9340_vm5 = vnez %v9339_v56  ;;  %v9341_v52 = vld [vmem:[#allocation4_spill] sm:$0xff] }
 0x307   : > { %v3151_v36 = vsel %vm9336_vm3, %v1983_v49, %v5198_v61  ;;  %v3249_v9 = vsel %vm9338_vm8, %v6791_v46, %v5197_v18 }
 0x308   : > { %v5211_v43 = vpop.permute.xlu0 %5210  ;;  %v3184_v35 = vsel %vm3182_vm1, %v3151_v36, %v5203_v13  ;;  %v3281_v3 = vsel %vm3182_vm1, %v3249_v9, %v5202_v41  ;;  %v5434_v9 = vpack.i.bf16 %v7356_v24, %v7405_v0  ;;  %v9343_v13 = vsel %vm9340_vm5, %v6714_v45, 0.0 }
 0x309   : > { %5430 = vrot.lane.b32.xlu2 %v5429_v55, %s5715_s23  ;;  %v5213_v61 = vunpack.i.h.bf16 %v5211_v43  ;;  %v5212_v47 = vunpack.i.l.bf16 %v5211_v43  ;;  %v3217_v49 = vsel %vm9186_vm14, %v3184_v35, %v5208_v22  ;;  %v3313_v48 = vsel %vm9186_vm14, %v3281_v3, %v5207_v50  ;;  %v9344_v43 = vld [vmem:[#allocation5_spill] sm:$0xff]  ;;  %v9346_v35 = vld [vmem:[#allocation8_spill] sm:$0xff]  ;;  %v9348_v50 = vld [vmem:[#allocation6_spill] sm:$0xff] }
 0x30a   : > { %5425 = vrot.lane.b32.xlu1 %v5424_v21, %s5714_s20  ;;  %v9342_v55 = vsel %vm9340_vm5, %v9341_v52, 0.0  ;;  %v5449_v41 = vpack.i.bf16 %v9343_v13, %v7407_v40  ;;  %vm9345_vm3 = vnez %v9344_v43  ;;  %vm9349_vm14 = vmmov %vm9338_vm8  ;;  %v5223_v45 = vunpack.i.h.bf16 %v7331_v33 }
 0x30b   : > { %v7403_v46 = vpop.permute.xlu2 %5255  ;;  %v5439_v21 = vpack.i.bf16 %v7314_v58, %v9342_v55  ;;  %v9347_v3 = vsel %vm9345_vm3, %v9346_v35, 0.0  ;;  %v5222_v55 = vunpack.i.l.bf16 %v7331_v33  ;;  %v7439_v35 = vld [vmem:[#allocation2 + $0xb8] sm:$0xff]  ;;  %v9352_v33 = vld [vmem:[#allocation7_spill] sm:$0xff]  ;;  %vm9354_vm3 = vmmov %vm9338_vm8 }
 0x30c   : > { %v5216_v18 = vpop.permute.xlu1 %5215  ;;  %v3152_v22 = vsel %vm9338_vm8, %v9347_v3, %v5213_v61  ;;  %vm9356_vm8 = vmmov %vm9354_vm3 }
 0x30d   : > { %v5218_v11 = vunpack.i.h.bf16 %v5216_v18  ;;  %v5217_v36 = vunpack.i.l.bf16 %v5216_v18  ;;  %3499 = vmatmul.f32.gmra.mxu1 %v3217_v49  ;;  %3612 = vmatmul.f32.gmra.mxu2 %v3313_v48  ;;  %v3250_v18 = vsel %vm9349_vm14, %v9348_v50, %v5212_v47  ;;  %v2290_v47 = vsel %vm6947_vm15, %v6945_v10, 0.0  ;;  %v9353_v10 = vld [vmem:[#allocation12_spill] sm:$0xff] }
 0x30e   : > { %5440 = vrot.lane.b32.xlu0 %v5439_v21, %s5713_s19  ;;  %vm9350_vm14 = vcmask 785408   ;;  %v5459_v50 = vpack.i.bf16 %v2290_v47, %v7439_v35  ;;  %v5227_v47 = vunpack.i.l.bf16 %v7351_v19 }
 0x30f   : > { %v3185_v48 = vsel %vm3182_vm1, %v3152_v22, %v5218_v11  ;;  %v3282_v56 = vsel %vm3182_vm1, %v3250_v18, %v5217_v36  ;;  %v2360_v11 = vsel %vm6947_vm15, %v6951_v23, 0.0  ;;  %vm9351_vm5 = vmmov %vm9350_vm14  ;;  %v5665_v18 = vld [vmem:[#allocation2 + $0x99] sm:$0xff] }
 0x310   : > { %v5231_v49 = vpop.permute.xlu0 %5230  ;;  %v3218_v36 = vsel %vm9350_vm14, %v3185_v48, %v5223_v45  ;;  %vm9357_vm14 = vmmov %vm9351_vm5 }
 0x311   : > { %5435 = vrot.lane.b32.xlu2 %v5434_v9, %s5715_s23  ;;  %v5233_v21 = vunpack.i.h.bf16 %v5231_v49  ;;  %v5232_v13 = vunpack.i.l.bf16 %v5231_v49  ;;  %v3314_v9 = vsel %vm9351_vm5, %v3282_v56, %v5222_v55  ;;  %v5454_v49 = vpack.i.bf16 %v5665_v18, %v2360_v11 }
 0x312   : > { %5450 = vrot.lane.b32.xlu1 %v5449_v41, %s5714_s20  ;;  %v5444_v41 = vpack.i.bf16 %v7335_v60, %v9352_v33 }
 0x313   : > { %v7437_v43 = vpop.permute.xlu2 %5280  ;;  %v3153_v24 = vsel %vm9354_vm3, %v9353_v10, %v5233_v21  ;;  %v3251_v48 = vsel %vm9356_vm8, %v9355_v54, %v5232_v13  ;;  %v7465_v21 = vld [vmem:[#allocation2 + $0xc0] sm:$0xff] }
 0x314   : > { %v5241_v61 = vpop.permute.xlu1 %5240  ;;  %v7467_v54 = vld [vmem:[#allocation2 + $0xbf] sm:$0xff]  ;;  %v5464_v18 = vpack.i.bf16 %v7407_v40, %v7465_v21  ;;  %v5282_v20 = vunpack.i.l.bf16 %v7437_v43 }
 0x315   : > { %v5243_v3 = vunpack.i.h.bf16 %v5241_v61  ;;  %v5242_v22 = vunpack.i.l.bf16 %v5241_v61  ;;  %3502 = vmatmul.f32.gmra.mxu1 %v3218_v36  ;;  %3615 = vmatmul.f32.gmra.mxu2 %v3314_v9  ;;  %v5228_v61 = vunpack.i.h.bf16 %v7351_v19 }
 0x316   : > { %5445 = vrot.lane.b32.xlu0 %v5444_v41, %s5713_s19  ;;  %v9360_v41 = vld [vmem:[#allocation11_spill] sm:$0xff] }
 0x317   : > { %v3186_v45 = vsel %vm3182_vm1, %v3153_v24, %v5243_v3  ;;  %v3283_v55 = vsel %vm3182_vm1, %v3251_v48, %v5242_v22  ;;  %v9358_v24 = vld [vmem:[#allocation15_spill] sm:$0xff] }
 0x318   : > { %v5236_v56 = vpop.permute.xlu0 %5235  ;;  %v3219_v13 = vsel %vm9357_vm14, %v3186_v45, %v5228_v61  ;;  %v3315_v33 = vsel %vm9351_vm5, %v3283_v55, %v5227_v47  ;;  %vm9359_vm3 = vnez %v9358_v24  ;;  %v9365_v45 = vld [vmem:[#allocation9_spill] sm:$0xff]  ;;  %vm9367_vm14 = vcmask 261120  }
 0x319   : > { %5460 = vrot.lane.b32.xlu2 %v5459_v50, %s5715_s23  ;;  %v5238_v11 = vunpack.i.h.bf16 %v5236_v56  ;;  %v5237_v36 = vunpack.i.l.bf16 %v5236_v56  ;;  %v9361_v3 = vsel %vm9359_vm3, %v9360_v41, 0.0  ;;  %v9363_v56 = vld [vmem:[#allocation16_spill] sm:$0xff]  ;;  %vm9368_vm5 = vmmov %vm9367_vm14  ;;  %v5252_v24 = vunpack.i.l.bf16 %v7373_v37 }
 0x31a   : > { %5455 = vrot.lane.b32.xlu1 %v5454_v49, %s5714_s20  ;;  %v5469_v22 = vpack.i.bf16 %v7354_v53, %v9361_v3  ;;  %v9362_v49 = vsel %vm9359_vm3, %v9341_v52, 0.0  ;;  %vm9364_vm8 = vnez %v9363_v56  ;;  %v5253_v52 = vunpack.i.h.bf16 %v7373_v37  ;;  %v7499_v56 = vld [vmem:[#allocation2 + $0xc8] sm:$0xff]  ;;  %v9371_v37 = vld [vmem:[#allocation17_spill] sm:$0xff] }
 0x31b   : > { %v7463_v9 = vpop.permute.xlu2 %5285  ;;  %v5479_v48 = vpack.i.bf16 %v9362_v49, %v7467_v54  ;;  %v9366_v55 = vsel %vm9364_vm8, %v9365_v45, 0.0  ;;  %v3252_v47 = vsel %vm9368_vm5, %v6735_v4, %v5237_v36  ;;  %v2292_v4 = vsel %vm6953_vm11, %v6951_v23, 0.0 }
 0x31c   : > { %v5246_v10 = vpop.permute.xlu1 %5245  ;;  %v3154_v61 = vsel %vm9367_vm14, %v9366_v55, %v5238_v11  ;;  %v2362_v36 = vsel %vm6953_vm11, %v6962_v51, 0.0  ;;  %vm9369_vm3 = vcmask 785408   ;;  %v5489_v55 = vpack.i.bf16 %v2292_v4, %v7499_v56  ;;  %vm9372_vm14 = vmmov %vm9368_vm5 }
 0x31d   : > { %v5248_v19 = vunpack.i.h.bf16 %v5246_v10  ;;  %v5247_v50 = vunpack.i.l.bf16 %v5246_v10  ;;  %3505 = vmatmul.f32.gmra.mxu1 %v3219_v13  ;;  %3618 = vmatmul.f32.gmra.mxu2 %v3315_v33  ;;  %vm9370_vm8 = vmmov %vm9369_vm3  ;;  %v5257_v4 = vunpack.i.l.bf16 %v7403_v46 }
 0x31e   : > { %5470 = vrot.lane.b32.xlu0 %v5469_v22, %s5713_s19 }
 0x31f   : > { %v3187_v13 = vsel %vm3182_vm1, %v3154_v61, %v5248_v19  ;;  %v3284_v33 = vsel %vm3182_vm1, %v3252_v47, %v5247_v50  ;;  %v5666_v61 = vld [vmem:[#allocation2 + $0xa9] sm:$0xff] }
 0x320   : > { %v5261_v10 = vpop.permute.xlu0 %5260  ;;  %v3220_v19 = vsel %vm9369_vm3, %v3187_v13, %v5253_v52  ;;  %v3316_v50 = vsel %vm9370_vm8, %v3284_v33, %v5252_v24  ;;  %v5484_v47 = vpack.i.bf16 %v5666_v61, %v2362_v36  ;;  %vm9373_vm8 = vmmov %vm9369_vm3 }
 0x321   : > { %5465 = vrot.lane.b32.xlu2 %v5464_v18, %s5715_s23  ;;  %v5263_v3 = vunpack.i.h.bf16 %v5261_v10  ;;  %v5262_v22 = vunpack.i.l.bf16 %v5261_v10  ;;  %v5474_v18 = vpack.i.bf16 %v7377_v62, %v9371_v37  ;;  %v5667_v10 = vld [vmem:[#allocation2 + $0x2f] sm:$0xff] }
 0x322   : > { %5480 = vrot.lane.b32.xlu1 %v5479_v48, %s5714_s20  ;;  %v7524_v37 = vld [vmem:[#allocation2 + $0xd0] sm:$0xff] }
 0x323   : > { %v7497_v49 = vpop.permute.xlu2 %5310  ;;  %v3155_v23 = vsel %vm9372_vm14, %v5667_v10, %v5263_v3  ;;  %v3253_v13 = vsel %vm9368_vm5, %v6793_v30, %v5262_v22  ;;  %v7526_v30 = vld [vmem:[#allocation2 + $0xcf] sm:$0xff] }
 0x324   : > { %v5271_v11 = vpop.permute.xlu1 %5270  ;;  %v5312_v25 = vunpack.i.l.bf16 %v7497_v49 }
 0x325   : > { %v5273_v48 = vunpack.i.h.bf16 %v5271_v11  ;;  %v5272_v45 = vunpack.i.l.bf16 %v5271_v11  ;;  %3508 = vmatmul.f32.gmra.mxu1 %v3220_v19  ;;  %3621 = vmatmul.f32.gmra.mxu2 %v3316_v50  ;;  %v5258_v11 = vunpack.i.h.bf16 %v7403_v46 }
 0x326   : > { %5475 = vrot.lane.b32.xlu0 %v5474_v18, %s5713_s19 }
 0x327   : > { %v3188_v52 = vsel %vm3182_vm1, %v3155_v23, %v5273_v48  ;;  %v3285_v24 = vsel %vm3182_vm1, %v3253_v13, %v5272_v45  ;;  %v9374_v23 = vld [vmem:[#allocation19_spill] sm:$0xff]  ;;  %v9376_v48 = vld [vmem:[#allocation18_spill] sm:$0xff] }
 0x328   : > { %v5266_v33 = vpop.permute.xlu0 %5265  ;;  %v3221_v22 = vsel %vm9369_vm3, %v3188_v52, %v5258_v11  ;;  %v3317_v18 = vsel %vm9373_vm8, %v3285_v24, %v5257_v4  ;;  %vm9375_vm14 = vnez %v9374_v23  ;;  %vm9381_vm3 = vmmov %vm9368_vm5 }
 0x329   : > { %5490 = vrot.lane.b32.xlu2 %v5489_v55, %s5715_s23  ;;  %v5268_v36 = vunpack.i.h.bf16 %v5266_v33  ;;  %v5267_v19 = vunpack.i.l.bf16 %v5266_v33  ;;  %v9377_v45 = vsel %vm9375_vm14, %v9376_v48, 0.0  ;;  %v9378_v10 = vsel %vm9375_vm14, %v9360_v41, 0.0  ;;  %v9379_v33 = vld [vmem:[#allocation14_spill] sm:$0xff]  ;;  %vm9385_vm14 = vmmov %vm9381_vm3 }
 0x32a   : > { %5485 = vrot.lane.b32.xlu1 %v5484_v47, %s5714_s20  ;;  %v5499_v55 = vpack.i.bf16 %v7405_v0, %v9377_v45  ;;  %v5494_v47 = vpack.i.bf16 %v7467_v54, %v7524_v37  ;;  %v5509_v13 = vpack.i.bf16 %v9378_v10, %v7526_v30  ;;  %v9380_v52 = vsel %vm6773_vm6, %v9379_v33, 0.0  ;;  %vm9382_vm6 = vmmov %vm9373_vm8 }
 0x32b   : > { %v7522_v50 = vpop.permute.xlu2 %5315  ;;  %v3156_v24 = vsel %vm9368_vm5, %v9380_v52, %v5268_v36  ;;  %v3254_v11 = vsel %vm9381_vm3, %v6895_v17, %v5267_v19  ;;  %v5283_v41 = vunpack.i.h.bf16 %v7437_v43  ;;  %v2294_v17 = vsel %vm6964_vm13, %v6962_v51, 0.0  ;;  %vm9383_vm8 = vmmov %vm9382_vm6  ;;  %v9384_v43 = vld [vmem:[#allocation28_spill] sm:$0xff] }
 0x32c   : > { %v5276_v3 = vpop.permute.xlu1 %5275  ;;  %v2364_v19 = vsel %vm6964_vm13, %v6968_v39, 0.0  ;;  %v5668_v52 = vld [vmem:[#allocation2 + $0xb9] sm:$0xff]  ;;  %vm9386_vm5 = vmmov %vm9381_vm3 }
 0x32d   : > { %v5278_v46 = vunpack.i.h.bf16 %v5276_v3  ;;  %v5277_v61 = vunpack.i.l.bf16 %v5276_v3  ;;  %3511 = vmatmul.f32.gmra.mxu1 %v3221_v22  ;;  %3624 = vmatmul.f32.gmra.mxu2 %v3317_v18  ;;  %vm9387_vm3 = vmmov %vm9382_vm6 }
 0x32e   : > { %5500 = vrot.lane.b32.xlu0 %v5499_v55, %s5713_s19  ;;  %v7558_v55 = vld [vmem:[#allocation2 + $0xd8] sm:$0xff] }
 0x32f   : > { %v3189_v3 = vsel %vm3182_vm1, %v3156_v24, %v5278_v46  ;;  %v3286_v22 = vsel %vm3182_vm1, %v3254_v11, %v5277_v61  ;;  %v5519_v33 = vpack.i.bf16 %v2294_v17, %v7558_v55  ;;  %v5514_v24 = vpack.i.bf16 %v5668_v52, %v2364_v19 }
 0x330   : > { %v5291_v4 = vpop.permute.xlu0 %5290  ;;  %v3222_v46 = vsel %vm9382_vm6, %v3189_v3, %v5283_v41  ;;  %v3318_v61 = vsel %vm9383_vm8, %v3286_v22, %v5282_v20  ;;  %v5288_v20 = vunpack.i.h.bf16 %v7463_v9  ;;  %vm9388_vm6 = vmmov %vm9387_vm3 }
 0x331   : > { %5495 = vrot.lane.b32.xlu2 %v5494_v47, %s5715_s23  ;;  %v5293_v18 = vunpack.i.h.bf16 %v5291_v4  ;;  %v5292_v23 = vunpack.i.l.bf16 %v5291_v4  ;;  %v5504_v47 = vpack.i.bf16 %v7439_v35, %v9384_v43  ;;  %vm9393_vm8 = vmmov %vm9386_vm5 }
 0x332   : > { %5510 = vrot.lane.b32.xlu1 %v5509_v13, %s5714_s20 }
 0x333   : > { %v7556_v45 = vpop.permute.xlu2 %5340  ;;  %v3157_v11 = vsel %vm9385_vm14, %v6803_v32, %v5293_v18  ;;  %v3255_v4 = vsel %vm9386_vm5, %v7006_v14, %v5292_v23  ;;  %v7584_v18 = vld [vmem:[#allocation2 + $0xe0] sm:$0xff]  ;;  %vm9394_vm14 = vmmov %vm9386_vm5 }
 0x334   : > { %v5301_v36 = vpop.permute.xlu1 %5300  ;;  %v7586_v14 = vld [vmem:[#allocation2 + $0xdf] sm:$0xff]  ;;  %v5524_v52 = vpack.i.bf16 %v7526_v30, %v7584_v18  ;;  %v5342_v5 = vunpack.i.l.bf16 %v7556_v45 }
 0x335   : > { %v5303_v10 = vunpack.i.h.bf16 %v5301_v36  ;;  %v5302_v13 = vunpack.i.l.bf16 %v5301_v36  ;;  %3514 = vmatmul.f32.gmra.mxu1 %v3222_v46  ;;  %3627 = vmatmul.f32.gmra.mxu2 %v3318_v61  ;;  %v5287_v36 = vunpack.i.l.bf16 %v7463_v9 }
 0x336   : > { %5505 = vrot.lane.b32.xlu0 %v5504_v47, %s5713_s19  ;;  %v9389_v47 = vld [vmem:[#allocation20_spill] sm:$0xff] }
 0x337   : > { %v3190_v22 = vsel %vm3182_vm1, %v3157_v11, %v5303_v10  ;;  %v3287_v41 = vsel %vm3182_vm1, %v3255_v4, %v5302_v13  ;;  %v9390_v10 = vsel %vm6785_vm7, %v9389_v47, 0.0  ;;  %v9392_v4 = vsel %vm6816_vm9, %v6814_v12, 0.0  ;;  %vm9396_vm9 = vmmov %vm9387_vm3 }
 0x338   : > { %v5296_v3 = vpop.permute.xlu0 %5295  ;;  %v3223_v23 = vsel %vm9387_vm3, %v3190_v22, %v5288_v20  ;;  %v3319_v61 = vsel %vm9388_vm6, %v3287_v41, %v5287_v36  ;;  %v5529_v13 = vpack.i.bf16 %v7465_v21, %v9390_v10 }
 0x339   : > { %5520 = vrot.lane.b32.xlu2 %v5519_v33, %s5715_s23  ;;  %v5298_v17 = vunpack.i.h.bf16 %v5296_v3  ;;  %v5297_v19 = vunpack.i.l.bf16 %v5296_v3 }
 0x33a   : > { %5515 = vrot.lane.b32.xlu1 %v5514_v24, %s5714_s20  ;;  %v9391_v24 = vsel %vm6785_vm7, %v9376_v48, 0.0  ;;  %v5313_v48 = vunpack.i.h.bf16 %v7497_v49  ;;  %vm9395_vm7 = vmmov %vm9387_vm3  ;;  %v5534_v49 = vpack.i.bf16 %v7499_v56, %v7054_v38 }
 0x33b   : > { %v7582_v46 = vpop.permute.xlu2 %5345  ;;  %v5539_v11 = vpack.i.bf16 %v9391_v24, %v7586_v14  ;;  %v3158_v3 = vsel %vm9393_vm8, %v9392_v4, %v5298_v17  ;;  %v3256_v22 = vsel %vm9394_vm14, %v7046_v29, %v5297_v19  ;;  %v2296_v29 = vsel %vm6970_vm4, %v6968_v39, 0.0  ;;  %vm9397_vm3 = vmmov %vm9386_vm5 }
 0x33c   : > { %v5306_v32 = vpop.permute.xlu1 %5305  ;;  %v2366_v19 = vsel %vm6970_vm4, %v6983_v1, 0.0  ;;  %vm9398_vm8 = vmmov %vm9388_vm6 }
 0x33d   : > { %v5308_v9 = vunpack.i.h.bf16 %v5306_v32  ;;  %v5307_v33 = vunpack.i.l.bf16 %v5306_v32  ;;  %3517 = vmatmul.f32.gmra.mxu1 %v3223_v23  ;;  %3630 = vmatmul.f32.gmra.mxu2 %v3319_v61  ;;  %v7618_v23 = vld [vmem:[#allocation2 + $0xe8] sm:$0xff]  ;;  %vm9404_vm14 = vmmov %vm9397_vm3 }
 0x33e   : > { %5530 = vrot.lane.b32.xlu0 %v5529_v13, %s5713_s19 }
 0x33f   : > { %v3191_v20 = vsel %vm3182_vm1, %v3158_v3, %v5308_v9  ;;  %v3288_v42 = vsel %vm3182_vm1, %v3256_v22, %v5307_v33  ;;  %v5549_v33 = vpack.i.bf16 %v2296_v29, %v7618_v23 }
 0x340   : > { %v5321_v41 = vpop.permute.xlu0 %5320  ;;  %v3224_v61 = vsel %vm9395_vm7, %v3191_v20, %v5313_v48  ;;  %v3320_v10 = vsel %vm9396_vm9, %v3288_v42, %v5312_v25  ;;  %v5317_v20 = vunpack.i.l.bf16 %v7522_v50  ;;  %v7645_v25 = vld [vmem:[#allocation2 + $0xf0] sm:$0xff]  ;;  %vm9405_vm7 = vmmov %vm9397_vm3 }
 0x341   : > { %5525 = vrot.lane.b32.xlu2 %v5524_v52, %s5715_s23  ;;  %v5323_v36 = vunpack.i.h.bf16 %v5321_v41  ;;  %v5322_v12 = vunpack.i.l.bf16 %v5321_v41  ;;  %v5544_v52 = vpack.i.bf16 %v9384_v43, %v2366_v19  ;;  %v5318_v41 = vunpack.i.h.bf16 %v7522_v50  ;;  %vm9410_vm9 = vmmov %vm9397_vm3 }
 0x342   : > { %5540 = vrot.lane.b32.xlu1 %v5539_v11, %s5714_s20 }
 0x343   : > { %v7616_v32 = vpop.permute.xlu2 %5370  ;;  %v3159_v24 = vsel %vm9386_vm5, %v7008_v26, %v5323_v36  ;;  %v3257_v11 = vsel %vm9397_vm3, %v7075_v31, %v5322_v12  ;;  %v7647_v31 = vld [vmem:[#allocation2 + $0xef] sm:$0xff]  ;;  %vm9411_vm5 = vmmov %vm9397_vm3 }
 0x344   : > { %v5331_v17 = vpop.permute.xlu1 %5330  ;;  %vm9412_vm3 = vmmov %vm9388_vm6 }
 0x345   : > { %v5333_v13 = vunpack.i.h.bf16 %v5331_v17  ;;  %v5332_v9 = vunpack.i.l.bf16 %v5331_v17  ;;  %3520 = vmatmul.f32.gmra.mxu1 %v3224_v61  ;;  %3633 = vmatmul.f32.gmra.mxu2 %v3320_v10  ;;  %v9399_v17 = vld [vmem:[#allocation21_spill] sm:$0xff]  ;;  %v5554_v10 = vpack.i.bf16 %v7586_v14, %v7645_v25 }
 0x346   : > { %5535 = vrot.lane.b32.xlu0 %v5534_v49, %s5713_s19  ;;  %v9400_v29 = vsel %vm6832_vm10, %v9399_v17, 0.0  ;;  %v9401_v49 = vsel %vm6832_vm10, %v9389_v47, 0.0  ;;  %v5343_v47 = vunpack.i.h.bf16 %v7556_v45  ;;  %vm9408_vm10 = vmmov %vm9388_vm6  ;;  %v5564_v45 = vpack.i.bf16 %v7558_v55, %v7107_v28 }
 0x347   : > { %v3192_v3 = vsel %vm3182_vm1, %v3159_v24, %v5333_v13  ;;  %v3289_v22 = vsel %vm3182_vm1, %v3257_v11, %v5332_v9  ;;  %v5559_v19 = vpack.i.bf16 %v7524_v37, %v9400_v29  ;;  %v5569_v13 = vpack.i.bf16 %v9401_v49, %v7647_v31  ;;  %v9402_v9 = vld [vmem:[#allocation22_spill] sm:$0xff] }
 0x348   : > { %v5326_v4 = vpop.permute.xlu0 %5325  ;;  %v3225_v36 = vsel %vm9388_vm6, %v3192_v3, %v5318_v41  ;;  %v3321_v12 = vsel %vm9398_vm8, %v3289_v22, %v5317_v20  ;;  %vm9414_vm8 = vnez %v9266_v8 }
 0x349   : > { %5550 = vrot.lane.b32.xlu2 %v5549_v33, %s5715_s23  ;;  %v5328_v43 = vunpack.i.h.bf16 %v5326_v4  ;;  %v5327_v42 = vunpack.i.l.bf16 %v5326_v4  ;;  %v9403_v33 = vsel %vm6841_vm12, %v9402_v9, 0.0  ;;  %vm9409_vm12 = vmmov %vm9388_vm6 }
 0x34a   : > { %5545 = vrot.lane.b32.xlu1 %v5544_v52, %s5714_s20  ;;  %vm9413_vm6 = vmmov %vm9412_vm3 }
 0x34b   : > { %v7643_v48 = vpop.permute.xlu2 %5375  ;;  %v3160_v52 = vsel %vm9404_vm14, %v9403_v33, %v5328_v43  ;;  %v3258_v24 = vsel %vm9405_vm7, %v7096_v2, %v5327_v42  ;;  %v7679_v43 = vld [vmem:[#allocation2 + $0xf8] sm:$0xff]  ;;  %v2298_v42 = vsel %vm6974_vm2, %v6983_v1, 0.0  ;;  %vm9418_vm14 = vnez %v9270_v34  ;;  %vm9421_vm7 = vmmov %vm9411_vm5 }
 0x34c   : > { %v5336_v26 = vpop.permute.xlu1 %5335  ;;  %v5373_v34 = vunpack.i.h.bf16 %v7616_v32 }
 0x34d   : > { %v5338_v50 = vunpack.i.h.bf16 %v5336_v26  ;;  %v5337_v61 = vunpack.i.l.bf16 %v5336_v26  ;;  %3523 = vmatmul.f32.gmra.mxu1 %v3225_v36  ;;  %3636 = vmatmul.f32.gmra.mxu2 %v3321_v12  ;;  %v9407_v26 = vld [vmem:[#allocation36_spill] sm:$0xff] }
 0x34e   : > { %5560 = vrot.lane.b32.xlu0 %v5559_v19, %s5713_s19  ;;  %v2368_v36 = vsel %vm6974_vm2, %v9407_v26, 0.0 }
 0x34f   : > { %v3193_v4 = vsel %vm3182_vm1, %v3160_v52, %v5338_v50  ;;  %v3290_v16 = vsel %vm3182_vm1, %v3258_v24, %v5337_v61  ;;  %v5579_v61 = vpack.i.bf16 %v2298_v42, %v7679_v43  ;;  %v5348_v24 = vunpack.i.h.bf16 %v7582_v46 }
 0x350   : > { %v5351_v11 = vpop.permute.xlu0 %5350  ;;  %v3226_v12 = vsel %vm9408_vm10, %v3193_v4, %v5343_v47  ;;  %v3322_v29 = vsel %vm9409_vm12, %v3290_v16, %v5342_v5  ;;  %v7706_v47 = vld [vmem:[#allocation2 + $0x100] sm:$0xff]  ;;  %vm9423_vm10 = vmmov %vm9411_vm5 }
 0x351   : > { %5555 = vrot.lane.b32.xlu2 %v5554_v10, %s5715_s23  ;;  %v5353_v3 = vunpack.i.h.bf16 %v5351_v11  ;;  %v5352_v22 = vunpack.i.l.bf16 %v5351_v11  ;;  %v5574_v10 = vpack.i.bf16 %v7054_v38, %v2368_v36  ;;  %v5347_v11 = vunpack.i.l.bf16 %v7582_v46 }
 0x352   : > { %5570 = vrot.lane.b32.xlu1 %v5569_v13, %s5714_s20 }
 0x353   : > { %v7677_v41 = vpop.permute.xlu2 %5400  ;;  %v3161_v49 = vsel %vm9410_vm9, %v7077_v15, %v5353_v3  ;;  %v3259_v13 = vsel %vm9411_vm5, %v7135_v59, %v5352_v22  ;;  %v7708_v59 = vld [vmem:[#allocation2 + $0xff] sm:$0xff]  ;;  %v9415_v22 = vld [vmem:[#allocation23_spill] sm:$0xff]  ;;  %vm9426_vm9 = vmmov %vm9412_vm3 }
 0x354   : > { %v5361_v20 = vpop.permute.xlu1 %5360  ;;  %vm9427_vm5 = vmmov %vm9412_vm3 }
 0x355   : > { %v5363_v19 = vunpack.i.h.bf16 %v5361_v20  ;;  %v5362_v50 = vunpack.i.l.bf16 %v5361_v20  ;;  %3526 = vmatmul.f32.gmra.mxu1 %v3226_v12  ;;  %3639 = vmatmul.f32.gmra.mxu2 %v3322_v29  ;;  %v9416_v20 = vsel %vm9414_vm8, %v9415_v22, 0.0  ;;  %v5584_v12 = vpack.i.bf16 %v7647_v31, %v7706_v47 }
 0x356   : > { %5565 = vrot.lane.b32.xlu0 %v5564_v45, %s5713_s19  ;;  %v5589_v42 = vpack.i.bf16 %v7584_v18, %v9416_v20  ;;  %v9417_v29 = vsel %vm9414_vm8, %v9399_v17, 0.0  ;;  %vm9433_vm8 = vmmov %vm9427_vm5 }
 0x357   : > { %v3194_v33 = vsel %vm3182_vm1, %v3161_v49, %v5363_v19  ;;  %v3291_v52 = vsel %vm3182_vm1, %v3259_v13, %v5362_v50  ;;  %v5599_v45 = vpack.i.bf16 %v9417_v29, %v7708_v59  ;;  %v9419_v19 = vld [vmem:[#allocation24_spill] sm:$0xff] }
 0x358   : > { %v5356_v9 = vpop.permute.xlu0 %5355  ;;  %v3227_v5 = vsel %vm9412_vm3, %v3194_v33, %v5348_v24  ;;  %v3323_v3 = vsel %vm9413_vm6, %v3291_v52, %v5347_v11  ;;  %v9420_v50 = vsel %vm9418_vm14, %v9419_v19, 0.0  ;;  %v5372_v33 = vunpack.i.l.bf16 %v7616_v32  ;;  %v9428_v32 = vld [vmem:[#allocation40_spill] sm:$0xff]  ;;  %vm9430_vm3 = vmmov %vm9421_vm7 }
 0x359   : > { %5580 = vrot.lane.b32.xlu2 %v5579_v61, %s5715_s23  ;;  %v5358_v38 = vunpack.i.h.bf16 %v5356_v9  ;;  %v5357_v4 = vunpack.i.l.bf16 %v5356_v9  ;;  %v7734_v9 = vld [vmem:[#allocation2 + $0x107] sm:$0xff]  ;;  %vm9432_vm6 = vmmov %vm9430_vm3 }
 0x35a   : > { %5575 = vrot.lane.b32.xlu1 %v5574_v10, %s5714_s20  ;;  %v9422_v10 = vld [vmem:[#allocation39_spill] sm:$0xff]  ;;  %vm9434_vm14 = vmmov %vm9427_vm5 }
 0x35b   : > { %v7704_v16 = vpop.permute.xlu2 %5405  ;;  %v3162_v61 = vsel %vm9421_vm7, %v9420_v50, %v5358_v38  ;;  %v3260_v49 = vsel %vm9423_vm10, %v9422_v10, %v5357_v4  ;;  %v5669_v4 = vld [vmem:[#allocation2 + $0xf7] sm:$0xff]  ;;  %v9429_v50 = vld [vmem:[#allocation38_spill] sm:$0xff]  ;;  %v9431_v10 = vld [vmem:[#allocation41_spill] sm:$0xff] }
 0x35c   : > { %v5366_v15 = vpop.permute.xlu1 %5365 }
 0x35d   : > { %v5368_v46 = vunpack.i.h.bf16 %v5366_v15  ;;  %v5367_v36 = vunpack.i.l.bf16 %v5366_v15  ;;  %3529 = vmatmul.f32.gmra.mxu1 %v3227_v5  ;;  %3642 = vmatmul.f32.gmra.mxu2 %v3323_v3  ;;  %v9424_v15 = vld [vmem:[#allocation35_spill] sm:$0xff]  ;;  %v7744_v3 = vld [vmem:[#allocation2 + $0x108] sm:$0xff] }
 0x35e   : > { %5590 = vrot.lane.b32.xlu0 %v5589_v42, %s5713_s19  ;;  %vm9425_vm12 = vnez %v9424_v15 }
 0x35f   : > { %v3195_v8 = vsel %vm3182_vm1, %v3162_v61, %v5368_v46  ;;  %v3292_v17 = vsel %vm3182_vm1, %v3260_v49, %v5367_v36  ;;  %v2300_v5 = vsel %vm9425_vm12, %v5669_v4, 0.0  ;;  %v2370_v20 = vsel %vm9425_vm12, %v7734_v9, 0.0 }
 0x360   : > { %v5381_v13 = vpop.permute.xlu0 %5380  ;;  %v3228_v42 = vsel %vm9426_vm9, %v3195_v8, %v5373_v34  ;;  %v3324_v46 = vsel %vm9427_vm5, %v3292_v17, %v5372_v33  ;;  %v5594_v36 = vpack.i.bf16 %v7618_v23, %v9428_v32  ;;  %v5604_v19 = vpack.i.bf16 %v7107_v28, %v2370_v20  ;;  %vm9445_vm9 = vmmov %vm9430_vm3 }
 0x361   : > { %5585 = vrot.lane.b32.xlu2 %v5584_v12, %s5715_s23  ;;  %v5383_v52 = vunpack.i.h.bf16 %v5381_v13  ;;  %v5382_v24 = vunpack.i.l.bf16 %v5381_v13  ;;  %v5378_v34 = vunpack.i.h.bf16 %v7643_v48  ;;  %v5377_v33 = vunpack.i.l.bf16 %v7643_v48  ;;  %vm9446_vm5 = vmmov %vm9430_vm3 }
 0x362   : > { %5600 = vrot.lane.b32.xlu1 %v5599_v45, %s5714_s20  ;;  %v5609_v45 = vpack.i.bf16 %v2300_v5, %v7744_v3  ;;  %v7768_v5 = vld [vmem:[#allocation2 + $0x10f] sm:$0xff] }
 0x363   : > { %v7740_v38 = vpop.permute.xlu2 %5430  ;;  %v3163_v61 = vsel %vm9430_vm3, %v9429_v50, %v5383_v52  ;;  %v3261_v49 = vsel %vm9432_vm6, %v9431_v10, %v5382_v24  ;;  %v7766_v52 = vld [vmem:[#allocation2 + $0x110] sm:$0xff]  ;;  %vm9450_vm6 = vmmov %vm9433_vm8 }
 0x364   : > { %v5391_v11 = vpop.permute.xlu1 %5390  ;;  %v5433_v44 = vunpack.i.h.bf16 %v7740_v38 }
 0x365   : > { %v5393_v12 = vunpack.i.h.bf16 %v5391_v11  ;;  %v5392_v29 = vunpack.i.l.bf16 %v5391_v11  ;;  %3532 = vmatmul.f32.gmra.mxu1 %v3228_v42  ;;  %3645 = vmatmul.f32.gmra.mxu2 %v3324_v46  ;;  %v9435_v42 = vld [vmem:[#allocation27_spill] sm:$0xff]  ;;  %v9437_v46 = vld [vmem:[#allocation25_spill] sm:$0xff] }
 0x366   : > { %5595 = vrot.lane.b32.xlu0 %v5594_v36, %s5713_s19  ;;  %vm9436_vm7 = vnez %v9435_v42 }
 0x367   : > { %v3196_v8 = vsel %vm3182_vm1, %v3163_v61, %v5393_v12  ;;  %v3293_v17 = vsel %vm3182_vm1, %v3261_v49, %v5392_v29  ;;  %v9438_v36 = vsel %vm9436_vm7, %v9437_v46, 0.0  ;;  %v9439_v29 = vld [vmem:[#allocation3_spill] sm:$0xff]  ;;  %v5614_v61 = vpack.i.bf16 %v7708_v59, %v7766_v52 }
 0x368   : > { %v5386_v13 = vpop.permute.xlu0 %5385  ;;  %v3229_v24 = vsel %vm9433_vm8, %v3196_v8, %v5378_v34  ;;  %v3325_v20 = vsel %vm9434_vm14, %v3293_v17, %v5377_v33  ;;  %v5619_v12 = vpack.i.bf16 %v7645_v25, %v9438_v36  ;;  %v9440_v10 = vsel %vm9436_vm7, %v9415_v22, 0.0  ;;  %v9443_v8 = vld [vmem:[#allocation29_spill] sm:$0xff]  ;;  %vm9451_vm8 = vmmov %vm9450_vm6 }
 0x369   : > { %5610 = vrot.lane.b32.xlu2 %v5609_v45, %s5715_s23  ;;  %v5388_v28 = vunpack.i.h.bf16 %v5386_v13  ;;  %v5387_v11 = vunpack.i.l.bf16 %v5386_v13  ;;  %v1533_v45 = vadd.s32 248, %v9439_v29  ;;  %v5629_v49 = vpack.i.bf16 %v9440_v10, %v7768_v5  ;;  %v9441_v13 = vld [vmem:[#allocation26_spill] sm:$0xff]  ;;  %vm9455_vm7 = vmmov %vm9446_vm5 }
 0x36a   : > { %5605 = vrot.lane.b32.xlu1 %v5604_v19, %s5714_s20  ;;  %vm9442_vm10 = vnez %v9441_v13  ;;  %v5403_v46 = vunpack.i.h.bf16 %v7677_v41  ;;  %v5402_v36 = vunpack.i.l.bf16 %v7677_v41 }
 0x36b   : > { %v7778_v48 = vpop.permute.xlu2 %5435  ;;  %v9444_v17 = vsel %vm9442_vm10, %v9443_v8, 0.0  ;;  %v3262_v33 = vsel %vm9446_vm5, %v7274_v57, %v5387_v11  ;;  %v9447_v57 = vld [vmem:[#allocation37_spill] sm:$0xff]  ;;  %vm9456_vm10 = vmmov %vm9446_vm5 }
 0x36c   : > { %v5396_v4 = vpop.permute.xlu1 %5395  ;;  %v3164_v34 = vsel %vm9445_vm9, %v9444_v17, %v5388_v28  ;;  %vm9448_vm3 = vnez %v9447_v57  ;;  %vm9458_vm9 = vmmov %vm9450_vm6 }
 0x36d   : > { %v5398_v19 = vunpack.i.h.bf16 %v5396_v4  ;;  %v5397_v50 = vunpack.i.l.bf16 %v5396_v4  ;;  %3535 = vmatmul.f32.gmra.mxu1 %v3229_v24  ;;  %3648 = vmatmul.f32.gmra.mxu2 %v3325_v20  ;;  %v2340_v24 = vld [vmem:[#allocation2 + $0x117] sm:$0xff]  ;;  %v1755_v20 = vand.u32 15, %v1533_v45  ;;  %v2302_v11 = vsel %vm9448_vm3, %v7734_v9, 0.0  ;;  %vm9459_vm5 = vmmov %vm9450_vm6 }
 0x36e   : > { %5620 = vrot.lane.b32.xlu0 %v5619_v12, %s5713_s19  ;;  %v2372_v10 = vsel %vm9448_vm3, %v2340_v24, 0.0  ;;  %v9449_v45 = vld [vmem:[#allocation43_spill] sm:$0xff] }
 0x36f   : > { %v3197_v42 = vsel %vm3182_vm1, %v3164_v34, %v5398_v19  ;;  %v3294_v22 = vsel %vm3182_vm1, %v3262_v33, %v5397_v50  ;;  %v5624_v19 = vpack.i.bf16 %v7679_v43, %v9449_v45  ;;  %vm7810_vm14 = vcmp.ne.s32.totalorder %v1755_v20, 15  ;;  %v9454_v34 = vld [vmem:[#allocation42_spill] sm:$0xff] }
 0x370   : > { %v5411_v4 = vpop.permute.xlu0 %5410  ;;  %v3230_v50 = vsel %vm9450_vm6, %v3197_v42, %v5403_v46  ;;  %v5634_v17 = vpack.i.bf16 %v9428_v32, %v2372_v10  ;;  %v9457_v42 = vld [vmem:[#allocation44_spill] sm:$0xff]  ;;  %vm9462_vm6 = vmmov %vm9455_vm7 }
 0x371   : > { %5615 = vrot.lane.b32.xlu2 %v5614_v61, %s5715_s23  ;;  %v5413_v12 = vunpack.i.h.bf16 %v5411_v4  ;;  %v5412_v28 = vunpack.i.l.bf16 %v5411_v4  ;;  %v2374_v61 = vld [vmem:[#allocation2 + $0x118] sm:$0xff] }
 0x372   : > { %5630 = vrot.lane.b32.xlu1 %v5629_v49, %s5714_s20  ;;  %v3326_v49 = vsel %vm9451_vm8, %v3294_v22, %v5402_v36  ;;  %v5639_v9 = vpack.i.bf16 %v2302_v11, %v2374_v61  ;;  %v2339_v22 = vsel %vm7810_vm14, %v9457_v42, 0.0  ;;  %v5408_v36 = vunpack.i.h.bf16 %v7704_v16  ;;  %v5670_v11 = vld [vmem:[#allocation2 + $0x101] sm:$0xff]  ;;  %vm9463_vm8 = vmmov %vm9462_vm6 }
 0x373   : > { %v3165_v33 = vsel %vm9455_vm7, %v9454_v34, %v5413_v12  ;;  %v3263_v4 = vsel %vm9456_vm10, %v7314_v58, %v5412_v28  ;;  %v7820_v24 = vpop.permute.xlu2 %5460  ;;  %v5407_v12 = vunpack.i.l.bf16 %v7704_v16  ;;  %v2269_v61 = vsel %vm7810_vm14, %v5670_v11, 0.0  ;;  %v2341_v10 = vld [vmem:[#allocation2 + $0x11f] sm:$0xff]  ;;  %vm9467_vm10 = vmmov %vm9462_vm6 }
 0x374   : > { %v5421_v29 = vpop.permute.xlu1 %5420  ;;  %v5649_v16 = vpack.i.bf16 %v2269_v61, %v2341_v10  ;;  %v9466_v10 = vld [vmem:[#allocation45_spill] sm:$0xff]  ;;  %v5462_v7 = vunpack.i.l.bf16 %v7820_v24 }
 0x375   : > { %v5423_v13 = vunpack.i.h.bf16 %v5421_v29  ;;  %v5422_v8 = vunpack.i.l.bf16 %v5421_v29  ;;  %3538 = vmatmul.f32.gmra.mxu1 %v3230_v50  ;;  %3651 = vmatmul.f32.gmra.mxu2 %v3326_v49  ;;  %v5644_v50 = vpack.i.bf16 %v7706_v47, %v2339_v22 }
 0x376   : > { %5625 = vrot.lane.b32.xlu0 %v5624_v19, %s5713_s19 }
 0x377   : > { %v3198_v46 = vsel %vm3182_vm1, %v3165_v33, %v5423_v13  ;;  %v3295_v32 = vsel %vm3182_vm1, %v3263_v4, %v5422_v8  ;;  %v9460_v8 = vld [vmem:[#allocation30_spill] sm:$0xff]  ;;  %v2375_v4 = vld [vmem:[#allocation2 + $0x120] sm:$0xff] }
 0x378   : > { %v5416_v20 = vpop.permute.xlu0 %5415  ;;  %v3231_v45 = vsel %vm9458_vm9, %v3198_v46, %v5408_v36  ;;  %v3327_v19 = vsel %vm9459_vm5, %v3295_v32, %v5407_v12  ;;  %v5432_v46 = vunpack.i.l.bf16 %v7740_v38  ;;  %vm9468_vm9 = vmmov %vm9462_vm6 }
 0x379   : > { %5640 = vrot.lane.b32.xlu2 %v5639_v9, %s5715_s23  ;;  %v5418_v58 = vunpack.i.h.bf16 %v5416_v20  ;;  %v5417_v28 = vunpack.i.l.bf16 %v5416_v20  ;;  %v9461_v9 = vsel %vm6939_vm0, %v9460_v8, 0.0  ;;  %vm9464_vm0 = vmmov %vm9459_vm5  ;;  %v5437_v8 = vunpack.i.l.bf16 %v7778_v48 }
 0x37a   : > { %5635 = vrot.lane.b32.xlu1 %v5634_v17, %s5714_s20  ;;  %vm9465_vm7 = vmmov %vm9464_vm0 }
 0x37b   : > { %v3166_v17 = vsel %vm9462_vm6, %v9461_v9, %v5418_v58  ;;  %v3264_v34 = vsel %vm9463_vm8, %v7335_v60, %v5417_v28  ;;  %v7845_v20 = vpop.permute.xlu2 %5465  ;;  %vm9469_vm5 = vmmov %vm9464_vm0 }
 0x37c   : > { %v5426_v29 = vpop.permute.xlu1 %5425  ;;  %vm9470_vm6 = vmmov %vm9464_vm0 }
 0x37d   : > { %v5428_v49 = vunpack.i.h.bf16 %v5426_v29  ;;  %v5427_v13 = vunpack.i.l.bf16 %v5426_v29  ;;  %3541 = vmatmul.f32.gmra.mxu1 %v3231_v45  ;;  %3654 = vmatmul.f32.gmra.mxu2 %v3327_v19  ;;  %v7856_v29 = vpop.f32.mrf.mxu0 }
 0x37e   : > { %5645 = vrot.lane.b32.xlu0 %v5644_v50, %s5713_s19  ;;  %s8935_s19 = scalar_lea.vmem %s9097_s12, %s5156_s25 }
 0x37f   : > { %v3199_v42 = vsel %vm3182_vm1, %v3166_v17, %v5428_v49  ;;  %v3296_v22 = vsel %vm3182_vm1, %v3264_v34, %v5427_v13 }
 0x380   : > { %v5441_v33 = vpop.permute.xlu0 %5440  ;;  %v3232_v58 = vsel %vm9464_vm0, %v3199_v42, %v5433_v44  ;;  %v3328_v28 = vsel %vm9465_vm7, %v3296_v22, %v5432_v46  ;;  %v9471_v44 = vld [vmem:[#allocation31_spill] sm:$0xff]  ;;  %vm9473_vm0 = vmmov %vm9463_vm8 }
 0x381   : > { %3116 = vrot.lane.b32.xlu2 %v2375_v4, %s5715_s23  ;;  %v5443_v32 = vunpack.i.h.bf16 %v5441_v33  ;;  %v5442_v36 = vunpack.i.l.bf16 %v5441_v33  ;;  %v9472_v46 = vsel %vm6947_vm15, %v9471_v44, 0.0  ;;  %vm9474_vm15 = vmmov %vm9469_vm5 }
 0x382   : > { %5650 = vrot.lane.b32.xlu1 %v5649_v16, %s5714_s20  ;;  %v7852_v60 = vpop.f32.mrf.mxu1  ;;  %v5438_v16 = vunpack.i.h.bf16 %v7778_v48  ;;  %vm9475_vm7 = vmmov %vm9469_vm5 }
 0x383   : > { %v3167_v38 = vsel %vm9467_vm10, %v9466_v10, %v5443_v32  ;;  %v3265_v45 = vsel %vm9468_vm9, %v7354_v53, %v5442_v36  ;;  %v7870_v34 = vpop.permute.xlu2 %5490  ;;  %vm9477_vm10 = vmmov %vm9473_vm0 }
 0x384   : > { %v5451_v12 = vpop.permute.xlu1 %5450  ;;  %vm9478_vm9 = vmmov %vm9473_vm0 }
 0x385   : > { %v5453_v11 = vunpack.i.h.bf16 %v5451_v12  ;;  %v5452_v61 = vunpack.i.l.bf16 %v5451_v12  ;;  %3544 = vmatmul.f32.gmra.mxu1 %v3232_v58  ;;  %3657 = vmatmul.f32.gmra.mxu2 %v3328_v28  ;;  %v7883_v36 = vpop.f32.mrf.mxu0 }
 0x386   : > { %2760 = vrot.lane.b32.xlu0 %v7768_v5, %s5715_s23 }
 0x387   : > { %v3200_v49 = vsel %vm3182_vm1, %v3167_v38, %v5453_v11  ;;  %v3297_v13 = vsel %vm3182_vm1, %v3265_v45, %v5452_v61  ;;  %v5463_v61 = vunpack.i.h.bf16 %v7820_v24 }
 0x388   : > { %v5446_v19 = vpop.permute.xlu0 %5445  ;;  %v7864_v50 = vpop.f32.mrf.mxu2  ;;  %v3233_v53 = vsel %vm9469_vm5, %v3200_v49, %v5438_v16  ;;  %v3329_v4 = vsel %vm9470_vm6, %v3297_v13, %v5437_v8  ;;  %v7896_v13 = vld [vmem:[%s9091_s6] ss:$0 sm:$0xff]  ;;  %vm9480_vm6 = vmmov %vm9469_vm5 }
 0x389   : > { %v5448_v9 = vunpack.i.h.bf16 %v5446_v19  ;;  %v5447_v17 = vunpack.i.l.bf16 %v5446_v19 }
 0x38a   : > { %v7872_v33 = vpop.f32.mrf.mxu1 }
 0x38b   : > { %v3168_v48 = vsel %vm9463_vm8, %v9472_v46, %v5448_v9  ;;  %v3266_v32 = vsel %vm9473_vm0, %v7377_v62, %v5447_v17  ;;  %v5496_v16 = vpop.permute.xlu2 %5495  ;;  %v9476_v17 = vld [vmem:[#allocation46_spill] sm:$0xff]  ;;  %vm9483_vm8 = vmmov %vm9473_vm0 }
 0x38c   : > { %v5456_v5 = vpop.permute.xlu1 %5455 }
 0x38d   : > { %v5458_v42 = vunpack.i.h.bf16 %v5456_v5  ;;  %v5457_v22 = vunpack.i.l.bf16 %v5456_v5  ;;  %3547 = vmatmul.f32.gmra.mxu1 %v3233_v53  ;;  %3660 = vmatmul.f32.gmra.mxu2 %v3329_v4 }
 0x38f   : > { %v3201_v28 = vsel %vm3182_vm1, %v3168_v48, %v5458_v42  ;;  %v3298_v11 = vsel %vm3182_vm1, %v3266_v32, %v5457_v22  ;;  %v3729_v48 = vpop.f32.mrf.mxu0  ;;  %v5468_v32 = vunpack.i.h.bf16 %v7845_v20 }
 0x390   : > { %v5471_v12 = vpop.permute.xlu0 %5470  ;;  %v7885_v58 = vpop.f32.mrf.mxu2  ;;  %v3234_v49 = vsel %vm9474_vm15, %v3201_v28, %v5463_v61  ;;  %v3330_v62 = vsel %vm9475_vm7, %v3298_v11, %v5462_v7  ;;  %vm9485_vm15 = vmmov %vm9469_vm5 }
 0x391   : > { %v5473_v10 = vunpack.i.h.bf16 %v5471_v12  ;;  %v5472_v38 = vunpack.i.l.bf16 %v5471_v12  ;;  %v5467_v12 = vunpack.i.l.bf16 %v7845_v20  ;;  %vm9486_vm7 = vmmov %vm9473_vm0 }
 0x392   : > { %v3503_v19 = vpop.f32.mrf.mxu1 }
 0x393   : > { %v3169_v24 = vsel %vm9477_vm10, %v9476_v17, %v5473_v10  ;;  %v3267_v5 = vsel %vm9478_vm9, %v7405_v0, %v5472_v38  ;;  %v3504_v53 = vadd.f32 %v7896_v13, %v3503_v19  ;;  %vm9487_vm10 = vmmov %vm9473_vm0 }
 0x394   : > { %v5481_v45 = vpop.permute.xlu1 %5480  ;;  %vm9488_vm9 = vmmov %vm9469_vm5 }
 0x395   : > { %v5483_v8 = vunpack.i.h.bf16 %v5481_v45  ;;  %v5482_v9 = vunpack.i.l.bf16 %v5481_v45  ;;  %3550 = vmatmul.f32.gmra.mxu1 %v3234_v49  ;;  %3663 = vmatmul.f32.gmra.mxu2 %v3330_v62  ;;  %v9481_v49 = vld [vmem:[#allocation32_spill] sm:$0xff] }
 0x396   : > { %v9482_v62 = vsel %vm6953_vm11, %v9481_v49, 0.0  ;;  %vm9484_vm11 = vmmov %vm9469_vm5  ;;  %v5497_v49 = vunpack.i.l.bf16 %v5496_v16 }
 0x397   : > { %v3202_v44 = vsel %vm3182_vm1, %v3169_v24, %v5483_v8  ;;  %v3299_v46 = vsel %vm3182_vm1, %v3267_v5, %v5482_v9  ;;  %v5521_v9 = vpop.permute.xlu2 %5520 }
 0x398   : > { %v5476_v4 = vpop.permute.xlu0 %5475  ;;  %v3616_v42 = vpop.f32.mrf.mxu2  ;;  %v3235_v10 = vsel %vm9469_vm5, %v3202_v44, %v5468_v32  ;;  %v3331_v38 = vsel %vm9480_vm6, %v3299_v46, %v5467_v12  ;;  %vm9491_vm6 = vmmov %vm9473_vm0 }
 0x399   : > { %v3617_v22 = vadd.f32 %v3616_v42, %v3504_v53  ;;  %v5478_v28 = vunpack.i.h.bf16 %v5476_v4  ;;  %v5477_v11 = vunpack.i.l.bf16 %v5476_v4  ;;  %v5493_v4 = vunpack.i.h.bf16 %v7870_v34 }
 0x39a   : > { %v7909_v0 = vpop.f32.mrf.mxu1  ;;  %v5492_v42 = vunpack.i.l.bf16 %v7870_v34 }
 0x39b   : > { %v7907_v7 = vadd.f32 %v3729_v48, %v3617_v22  ;;  %v3170_v20 = vsel %vm9483_vm8, %v9482_v62, %v5478_v28  ;;  %v3268_v8 = vsel %vm9473_vm0, %v7439_v35, %v5477_v11  ;;  %vm9492_vm8 = vmmov %vm9473_vm0 }
 0x39c   : > { %v5486_v61 = vpop.permute.xlu1 %5485  ;;  %vm9494_vm0 = vmmov %vm9469_vm5 }
 0x39d   : > { %9479 = vst [vmem:[#allocation10_spill] sm:$0xff] %v7907_v7  ;;  %v5488_v45 = vunpack.i.h.bf16 %v5486_v61  ;;  %v5487_v19 = vunpack.i.l.bf16 %v5486_v61  ;;  %3553 = vmatmul.f32.gmra.mxu1 %v3235_v10  ;;  %3666 = vmatmul.f32.gmra.mxu2 %v3331_v38 }
 0x39f   : > { %v3203_v5 = vsel %vm3182_vm1, %v3170_v20, %v5488_v45  ;;  %v3300_v53 = vsel %vm3182_vm1, %v3268_v8, %v5487_v19  ;;  %v5526_v10 = vpop.permute.xlu2 %5525  ;;  %v5498_v19 = vunpack.i.h.bf16 %v5496_v16 }
 0x3a0   : > { %v5501_v17 = vpop.permute.xlu0 %5500  ;;  %v7920_v24 = vpop.f32.mrf.mxu2  ;;  %v3236_v48 = vsel %vm9484_vm11, %v3203_v5, %v5493_v4  ;;  %v3332_v35 = vsel %vm9485_vm15, %v3300_v53, %v5492_v42  ;;  %v9489_v4 = vld [vmem:[#allocation33_spill] sm:$0xff]  ;;  %vm9495_vm11 = vmmov %vm9491_vm6 }
 0x3a1   : > { %v5503_v6 = vunpack.i.h.bf16 %v5501_v17  ;;  %v5502_v22 = vunpack.i.l.bf16 %v5501_v17  ;;  %v9490_v42 = vsel %vm6964_vm13, %v9489_v4, 0.0  ;;  %vm9493_vm13 = vmmov %vm9469_vm5 }
 0x3a2   : > { %v7926_v46 = vpop.f32.mrf.mxu1  ;;  %vm9496_vm15 = vmmov %vm9491_vm6 }
 0x3a3   : > { %v3171_v28 = vsel %vm9486_vm7, %v7407_v40, %v5503_v6  ;;  %v3269_v11 = vsel %vm9487_vm10, %v7465_v21, %v5502_v22  ;;  %vm9497_vm7 = vmmov %vm9494_vm0 }
 0x3a4   : > { %v5511_v44 = vpop.permute.xlu1 %5510  ;;  %vm9498_vm10 = vmmov %vm9494_vm0 }
 0x3a5   : > { %v5513_v32 = vunpack.i.h.bf16 %v5511_v44  ;;  %v5512_v12 = vunpack.i.l.bf16 %v5511_v44  ;;  %3556 = vmatmul.f32.gmra.mxu1 %v3236_v48  ;;  %3669 = vmatmul.f32.gmra.mxu2 %v3332_v35 }
 0x3a7   : > { %v3204_v38 = vsel %vm3182_vm1, %v3171_v28, %v5513_v32  ;;  %v3301_v45 = vsel %vm3182_vm1, %v3269_v11, %v5512_v12  ;;  %v5523_v32 = vunpack.i.h.bf16 %v5521_v9  ;;  %v5522_v12 = vunpack.i.l.bf16 %v5521_v9  ;;  %v5551_v63 = vpop.permute.xlu2 %5550 }
 0x3a8   : > { %v5506_v34 = vpop.permute.xlu0 %5505  ;;  %v7934_v61 = vpop.f32.mrf.mxu2  ;;  %v3237_v40 = vsel %vm9488_vm9, %v3204_v38, %v5498_v19  ;;  %v3333_v5 = vsel %vm9469_vm5, %v3301_v45, %v5497_v49  ;;  %vm9500_vm9 = vmmov %vm9491_vm6 }
 0x3a9   : > { %v5508_v62 = vunpack.i.h.bf16 %v5506_v34  ;;  %v5507_v20 = vunpack.i.l.bf16 %v5506_v34  ;;  %vm9501_vm5 = vmmov %vm9491_vm6 }
 0x3aa   : > { %v7938_v17 = vpop.f32.mrf.mxu1 }
 0x3ab   : > { %v3172_v6 = vsel %vm9491_vm6, %v9490_v42, %v5508_v62  ;;  %v3270_v16 = vsel %vm9492_vm8, %v7499_v56, %v5507_v20  ;;  %vm9505_vm6 = vmmov %vm9494_vm0 }
 0x3ac   : > { %v5516_v8 = vpop.permute.xlu1 %5515  ;;  %vm9506_vm8 = vmmov %vm9501_vm5 }
 0x3ad   : > { %v5518_v21 = vunpack.i.h.bf16 %v5516_v8  ;;  %v5517_v53 = vunpack.i.l.bf16 %v5516_v8  ;;  %3559 = vmatmul.f32.gmra.mxu1 %v3237_v40  ;;  %3672 = vmatmul.f32.gmra.mxu2 %v3333_v5 }
 0x3af   : > { %v3205_v48 = vsel %vm3182_vm1, %v3172_v6, %v5518_v21  ;;  %v3302_v35 = vsel %vm3182_vm1, %v3270_v16, %v5517_v53  ;;  %v5528_v21 = vunpack.i.h.bf16 %v5526_v10  ;;  %v5527_v53 = vunpack.i.l.bf16 %v5526_v10 }
 0x3b0   : > { %v5531_v22 = vpop.permute.xlu0 %5530  ;;  %v7949_v44 = vpop.f32.mrf.mxu2  ;;  %v3238_v45 = vsel %vm9493_vm13, %v3205_v48, %v5523_v32  ;;  %v3334_v19 = vsel %vm9494_vm0, %v3302_v35, %v5522_v12  ;;  %v9499_v32 = vsel %vm6970_vm4, %v6962_v51, 0.0  ;;  %v5553_v51 = vunpack.i.h.bf16 %v5551_v63  ;;  %vm9504_vm4 = vmmov %vm9494_vm0 }
 0x3b1   : > { %v5533_v28 = vunpack.i.h.bf16 %v5531_v22  ;;  %v5532_v11 = vunpack.i.l.bf16 %v5531_v22  ;;  %v5556_v48 = vpop.permute.xlu2 %5555  ;;  %vm9507_vm13 = vmmov %vm9501_vm5 }
 0x3b2   : > { %v7953_v38 = vpop.f32.mrf.mxu1 }
 0x3b3   : > { %v3173_v62 = vsel %vm9495_vm11, %v7467_v54, %v5533_v28  ;;  %v3271_v9 = vsel %vm9496_vm15, %v7524_v37, %v5532_v11  ;;  %vm9508_vm11 = vmmov %vm9494_vm0 }
 0x3b4   : > { %v5541_v34 = vpop.permute.xlu1 %5540  ;;  %vm9510_vm15 = vmmov %vm9501_vm5 }
 0x3b5   : > { %v5543_v56 = vunpack.i.h.bf16 %v5541_v34  ;;  %v5542_v49 = vunpack.i.l.bf16 %v5541_v34  ;;  %3562 = vmatmul.f32.gmra.mxu1 %v3238_v45  ;;  %3675 = vmatmul.f32.gmra.mxu2 %v3334_v19  ;;  %v7981_v34 = vld [vmem:[%s9096_s11 + $0x18] sm:$0xff] }
 0x3b6   : > { %9502 = vst [vmem:[#allocation4_spill] sm:$0xff] %v7981_v34  ;;  %v7986_v27 = vand.u32 4294901760, %v7981_v34 }
 0x3b7   : > { %v3206_v40 = vsel %vm3182_vm1, %v3173_v62, %v5543_v56  ;;  %v3303_v5 = vsel %vm3182_vm1, %v3271_v9, %v5542_v49  ;;  %v5552_v56 = vunpack.i.l.bf16 %v5551_v63 }
 0x3b8   : > { %v5536_v20 = vpop.permute.xlu0 %5535  ;;  %v7961_v8 = vpop.f32.mrf.mxu2  ;;  %v3239_v22 = vsel %vm9497_vm7, %v3206_v40, %v5528_v21  ;;  %v3335_v54 = vsel %vm9498_vm10, %v3303_v5, %v5527_v53  ;;  %9503 = vst [vmem:[#allocation5_spill] sm:$0xff] %v7986_v27  ;;  %4359 = vmatpush.msra.mxu1 %v7986_v27  ;;  %4011 = vmatpush.msra.mxu0 %v7986_v27  ;;  %vm9511_vm7 = vmmov %vm9501_vm5 }
 0x3b9   : > { %v5538_v4 = vunpack.i.h.bf16 %v5536_v20  ;;  %v5537_v42 = vunpack.i.l.bf16 %v5536_v20  ;;  %4171 = vmatpush.msra.mxu3 %v7986_v27  ;;  %vm9513_vm10 = vmmov %vm9494_vm0 }
 0x3ba   : > { %v7965_v16 = vpop.f32.mrf.mxu1 }
 0x3bb   : > { %v3174_v10 = vsel %vm9500_vm9, %v9499_v32, %v5538_v4  ;;  %v3272_v12 = vsel %vm9501_vm5, %v7558_v55, %v5537_v42  ;;  %v5581_v4 = vpop.permute.xlu2 %5580  ;;  %vm9514_vm9 = vmmov %vm9501_vm5 }
 0x3bc   : > { %v5546_v6 = vpop.permute.xlu1 %5545 }
 0x3bd   : > { %v5548_v37 = vunpack.i.h.bf16 %v5546_v6  ;;  %v5547_v35 = vunpack.i.l.bf16 %v5546_v6  ;;  %3565 = vmatmul.f32.gmra.mxu1 %v3239_v22  ;;  %3678 = vmatmul.f32.gmra.mxu2 %v3335_v54 }
 0x3bf   : > { %v3207_v45 = vsel %vm3182_vm1, %v3174_v10, %v5548_v37  ;;  %v3304_v19 = vsel %vm3182_vm1, %v3272_v12, %v5547_v35  ;;  %v5558_v37 = vunpack.i.h.bf16 %v5556_v48  ;;  %v5557_v35 = vunpack.i.l.bf16 %v5556_v48 }
 0x3c0   : > { %v5561_v28 = vpop.permute.xlu0 %5560  ;;  %v7976_v11 = vpop.f32.mrf.mxu2  ;;  %v3240_v20 = vsel %vm9504_vm4, %v3207_v45, %v5553_v51  ;;  %v3336_v40 = vsel %vm9505_vm6, %v3304_v19, %v5552_v56  ;;  %v9509_v51 = vsel %vm6974_vm2, %v6968_v39, 0.0  ;;  %vm9512_vm2 = vmmov %vm9494_vm0 }
 0x3c1   : > { %v5563_v49 = vunpack.i.h.bf16 %v5561_v28  ;;  %v5562_v62 = vunpack.i.l.bf16 %v5561_v28  ;;  %vm9515_vm4 = vmmov %vm9501_vm5 }
 0x3c2   : > { %v7988_v9 = vpop.f32.mrf.mxu1  ;;  %vm9516_vm6 = vmmov %vm9494_vm0 }
 0x3c3   : > { %v3175_v63 = vsel %vm9506_vm8, %v7526_v30, %v5563_v49  ;;  %v3273_v53 = vsel %vm9507_vm13, %v7584_v18, %v5562_v62  ;;  %vm9517_vm8 = vmmov %vm9494_vm0 }
 0x3c4   : > { %v5571_v55 = vpop.permute.xlu1 %5570  ;;  %vm9519_vm13 = vmmov %vm9515_vm4 }
 0x3c5   : > { %v5573_v5 = vunpack.i.h.bf16 %v5571_v55  ;;  %v5572_v21 = vunpack.i.l.bf16 %v5571_v55  ;;  %3568 = vmatmul.f32.gmra.mxu1 %v3240_v20  ;;  %3681 = vmatmul.f32.gmra.mxu2 %v3336_v40  ;;  %v5586_v55 = vpop.permute.xlu2 %5585 }
 0x3c7   : > { %v3208_v22 = vsel %vm3182_vm1, %v3175_v63, %v5573_v5  ;;  %v3305_v54 = vsel %vm3182_vm1, %v3273_v53, %v5572_v21  ;;  %v5583_v5 = vunpack.i.h.bf16 %v5581_v4  ;;  %v5582_v21 = vunpack.i.l.bf16 %v5581_v4  ;;  %v8026_v4 = vpop.f32.mrf.mxu3 }
 0x3c8   : > { %v5566_v42 = vpop.permute.xlu0 %5565  ;;  %v7999_v6 = vpop.f32.mrf.mxu2  ;;  %v3241_v30 = vsel %vm9494_vm0, %v3208_v22, %v5558_v37  ;;  %v3337_v45 = vsel %vm9508_vm11, %v3305_v54, %v5557_v35  ;;  %vm9520_vm0 = vmmov %vm9515_vm4 }
 0x3c9   : > { %v5568_v32 = vunpack.i.h.bf16 %v5566_v42  ;;  %v5567_v10 = vunpack.i.l.bf16 %v5566_v42  ;;  %vm9522_vm11 = vmmov %vm9512_vm2 }
 0x3ca   : > { %v8003_v28 = vpop.f32.mrf.mxu1 }
 0x3cb   : > { %v3176_v56 = vsel %vm9510_vm15, %v9509_v51, %v5568_v32  ;;  %v3274_v48 = vsel %vm9511_vm7, %v7618_v23, %v5567_v10  ;;  %vm9523_vm15 = vmmov %vm9512_vm2 }
 0x3cc   : > { %v5576_v12 = vpop.permute.xlu1 %5575  ;;  %vm9525_vm7 = vmmov %vm9520_vm0 }
 0x3cd   : > { %v5578_v18 = vunpack.i.h.bf16 %v5576_v12  ;;  %v5577_v19 = vunpack.i.l.bf16 %v5576_v12  ;;  %3571 = vmatmul.f32.gmra.mxu1 %v3241_v30  ;;  %3684 = vmatmul.f32.gmra.mxu2 %v3337_v45  ;;  %v2376_v12 = vld [vmem:[#allocation2 + $0x119] sm:$0xff] }
 0x3ce   : > { %5120 = vmatmul.msk.f32.gmra.mxu3 %vm9515_vm4, %v2376_v12  ;;  %vm9531_vm4 = vmmov %vm9512_vm2 }
 0x3cf   : > { %v3209_v20 = vsel %vm3182_vm1, %v3176_v56, %v5578_v18  ;;  %v3306_v40 = vsel %vm3182_vm1, %v3274_v48, %v5577_v19  ;;  %v5588_v18 = vunpack.i.h.bf16 %v5586_v55  ;;  %v5587_v19 = vunpack.i.l.bf16 %v5586_v55  ;;  %v5611_v48 = vpop.permute.xlu2 %5610 }
 0x3d0   : > { %v5591_v49 = vpop.permute.xlu0 %5590  ;;  %v8014_v62 = vpop.f32.mrf.mxu2  ;;  %v3242_v39 = vsel %vm9512_vm2, %v3209_v20, %v5583_v5  ;;  %v3338_v22 = vsel %vm9513_vm10, %v3306_v40, %v5582_v21  ;;  %v9518_v21 = vsel %vm9425_vm12, %v6983_v1, 0.0  ;;  %v5613_v15 = vunpack.i.h.bf16 %v5611_v48  ;;  %vm9521_vm12 = vmmov %vm9520_vm0 }
 0x3d1   : > { %v5593_v63 = vunpack.i.h.bf16 %v5591_v49  ;;  %v5592_v53 = vunpack.i.l.bf16 %v5591_v49  ;;  %v5612_v1 = vunpack.i.l.bf16 %v5611_v48  ;;  %vm9526_vm10 = vmmov %vm9512_vm2 }
 0x3d2   : > { %v8018_v42 = vpop.f32.mrf.mxu1 }
 0x3d3   : > { %v3177_v37 = vsel %vm9514_vm9, %v7586_v14, %v5593_v63  ;;  %v3275_v35 = vsel %vm9501_vm5, %v7645_v25, %v5592_v53  ;;  %vm9528_vm9 = vmmov %vm9520_vm0 }
 0x3d4   : > { %v5601_v2 = vpop.permute.xlu1 %5600  ;;  %vm9529_vm5 = vmmov %vm9520_vm0 }
 0x3d5   : > { %v5603_v23 = vunpack.i.h.bf16 %v5601_v2  ;;  %v5602_v54 = vunpack.i.l.bf16 %v5601_v2  ;;  %3574 = vmatmul.f32.gmra.mxu1 %v3242_v39  ;;  %3687 = vmatmul.f32.gmra.mxu2 %v3338_v22  ;;  %v2377_v39 = vld [vmem:[#allocation2 + $0x121] sm:$0xff] }
 0x3d7   : > { %v3210_v30 = vsel %vm3182_vm1, %v3177_v37, %v5603_v23  ;;  %v3307_v45 = vsel %vm3182_vm1, %v3275_v35, %v5602_v54  ;;  %v2409_v54 = vsel %vm7810_vm14, %v2377_v39, 0.0  ;;  %v8050_v37 = vpop.f32.mrf.mxu3  ;;  %vm9524_vm14 = vmmov %vm9520_vm0 }
 0x3d8   : > { %v5596_v32 = vpop.permute.xlu0 %5595  ;;  %v8028_v10 = vpop.f32.mrf.mxu2  ;;  %v3243_v25 = vsel %vm9516_vm6, %v3210_v30, %v5588_v18  ;;  %v3339_v20 = vsel %vm9517_vm8, %v3307_v45, %v5587_v19  ;;  %5121 = vmatmul.msk.f32.gmra.mxu3 %vm9521_vm12, %v2409_v54  ;;  %vm9532_vm6 = vmmov %vm9520_vm0 }
 0x3d9   : > { %v5598_v51 = vunpack.i.h.bf16 %v5596_v32  ;;  %v5597_v56 = vunpack.i.l.bf16 %v5596_v32  ;;  %v5616_v18 = vpop.permute.xlu2 %5615  ;;  %v8071_v54 = vpop.f32.mrf.mxu0  ;;  %vm9533_vm8 = vmmov %vm9520_vm0 }
 0x3da   : > { %v8033_v49 = vpop.f32.mrf.mxu1 }
 0x3db   : > { %v3178_v55 = vsel %vm9519_vm13, %v9518_v21, %v5598_v51  ;;  %v3276_v63 = vsel %vm9520_vm0, %v7679_v43, %v5597_v56  ;;  %vm9534_vm13 = vmmov %vm9512_vm2 }
 0x3dc   : > { %v5606_v14 = vpop.permute.xlu1 %5605  ;;  %vm9535_vm0 = vmmov %vm9512_vm2 }
 0x3dd   : > { %v5608_v40 = vunpack.i.h.bf16 %v5606_v14  ;;  %v5607_v5 = vunpack.i.l.bf16 %v5606_v14  ;;  %3577 = vmatmul.f32.gmra.mxu1 %v3243_v25  ;;  %3690 = vmatmul.f32.gmra.mxu2 %v3339_v20 }
 0x3df   : > { %v3211_v22 = vsel %vm3182_vm1, %v3178_v55, %v5608_v40  ;;  %v3308_v23 = vsel %vm3182_vm1, %v3276_v63, %v5607_v5  ;;  %v5618_v40 = vunpack.i.h.bf16 %v5616_v18  ;;  %v5617_v5 = vunpack.i.l.bf16 %v5616_v18  ;;  %v8067_v39 = vpop.f32.mrf.mxu3 }
 0x3e0   : > { %v5621_v53 = vpop.permute.xlu0 %5620  ;;  %v8044_v2 = vpop.f32.mrf.mxu2  ;;  %v3244_v30 = vsel %vm9522_vm11, %v3211_v22, %v5613_v15  ;;  %v3340_v45 = vsel %vm9523_vm15, %v3308_v23, %v5612_v1  ;;  %v9527_v15 = vsel %vm9448_vm3, %v9407_v26, 0.0  ;;  %vm9530_vm3 = vmmov %vm9512_vm2 }
 0x3e1   : > { %v5623_v35 = vunpack.i.h.bf16 %v5621_v53  ;;  %v5622_v32 = vunpack.i.l.bf16 %v5621_v53 }
 0x3e2   : > { %v8053_v43 = vpop.f32.mrf.mxu1 }
 0x3e3   : > { %v3179_v41 = vsel %vm9524_vm14, %v7647_v31, %v5623_v35  ;;  %v3277_v56 = vsel %vm9525_vm7, %v7706_v47, %v5622_v32  ;;  %v5641_v32 = vpop.permute.xlu2 %5640 }
 0x3e4   : > { %v5631_v12 = vpop.permute.xlu1 %5630 }
 0x3e5   : > { %v5633_v19 = vunpack.i.h.bf16 %v5631_v12  ;;  %v5632_v51 = vunpack.i.l.bf16 %v5631_v12  ;;  %3580 = vmatmul.f32.gmra.mxu1 %v3244_v30  ;;  %3693 = vmatmul.f32.gmra.mxu2 %v3340_v45 }
 0x3e7   : > { %v3212_v25 = vsel %vm3182_vm1, %v3179_v41, %v5633_v19  ;;  %v3309_v20 = vsel %vm3182_vm1, %v3277_v56, %v5632_v51  ;;  %v5643_v19 = vunpack.i.h.bf16 %v5641_v32  ;;  %v5642_v51 = vunpack.i.l.bf16 %v5641_v32 }
 0x3e8   : > { %v5626_v14 = vpop.permute.xlu0 %5625  ;;  %v8061_v48 = vpop.f32.mrf.mxu2  ;;  %v3245_v31 = vsel %vm9512_vm2, %v3212_v25, %v5618_v40  ;;  %v3341_v47 = vsel %vm9526_vm10, %v3309_v20, %v5617_v5 }
 0x3e9   : > { %v5628_v21 = vunpack.i.h.bf16 %v5626_v14  ;;  %v5627_v55 = vunpack.i.l.bf16 %v5626_v14  ;;  %v8088_v20 = vpop.f32.mrf.mxu3 }
 0x3ea   : > { %v8065_v53 = vpop.f32.mrf.mxu1 }
 0x3eb   : > { %v3180_v1 = vsel %vm9528_vm9, %v9527_v15, %v5628_v21  ;;  %v3278_v35 = vsel %vm9529_vm5, %v7744_v3, %v5627_v55  ;;  %v8092_v21 = vpop.f32.mrf.mxu0 }
 0x3ec   : > { %v5636_v63 = vpop.permute.xlu1 %5635 }
 0x3ed   : > { %v5638_v22 = vunpack.i.h.bf16 %v5636_v63  ;;  %v5637_v23 = vunpack.i.l.bf16 %v5636_v63  ;;  %3583 = vmatmul.f32.gmra.mxu1 %v3245_v31  ;;  %3696 = vmatmul.f32.gmra.mxu2 %v3341_v47  ;;  %v3117_v31 = vpop.permute.xlu2 %3116 }
 0x3ef   : > { %v3213_v45 = vsel %vm3182_vm1, %v3180_v1, %v5638_v22  ;;  %v3310_v18 = vsel %vm3182_vm1, %v3278_v35, %v5637_v23 }
 0x3f0   : > { %v5646_v12 = vpop.permute.xlu0 %5645  ;;  %v8080_v30 = vpop.f32.mrf.mxu2  ;;  %v3246_v14 = vsel %vm9530_vm3, %v3213_v45, %v5643_v19  ;;  %v3342_v25 = vsel %vm9531_vm4, %v3310_v18, %v5642_v51 }
 0x3f1   : > { %v5647_v41 = vunpack.i.l.bf16 %v5646_v12  ;;  %v5648_v26 = vunpack.i.h.bf16 %v5646_v12  ;;  %v8104_v35 = vpop.f32.mrf.mxu3 }
 0x3f2   : > { %v8084_v57 = vpop.f32.mrf.mxu1 }
 0x3f3   : > { %v3279_v40 = vsel %vm9532_vm6, %v7766_v52, %v5647_v41  ;;  %v3181_v63 = vsel %vm9533_vm8, %v7708_v59, %v5648_v26  ;;  %v8111_v59 = vld [vmem:[%s9096_s11 + $0x10] sm:$0xff]  ;;  %v8116_v45 = vpop.f32.mrf.mxu0 }
 0x3f4   : > { %v5651_v56 = vpop.permute.xlu1 %5650  ;;  %9536 = vst [vmem:[#allocation8_spill] sm:$0xff] %v8111_v59  ;;  %v8114_v12 = vand.u32 4294901760, %v8111_v59 }
 0x3f5   : > { %v5652_v3 = vunpack.i.l.bf16 %v5651_v56  ;;  %3586 = vmatmul.f32.gmra.mxu1 %v3246_v14  ;;  %3699 = vmatmul.f32.gmra.mxu2 %v3342_v25  ;;  %v5653_v5 = vunpack.i.h.bf16 %v5651_v56 }
 0x3f6   : > { %9537 = vst [vmem:[#allocation6_spill] sm:$0xff] %v8114_v12  ;;  %4361 = vmatpush.msra.mxu1 %v8114_v12  ;;  %4013 = vmatpush.msra.mxu0 %v8114_v12 }
 0x3f7   : > { %v3311_v22 = vsel %vm3182_vm1, %v3279_v40, %v5652_v3  ;;  %v3214_v15 = vsel %vm3182_vm1, %v3181_v63, %v5653_v5  ;;  %4173 = vmatpush.msra.mxu3 %v8114_v12  ;;  %vm9546_vm1 = vmmov %vm9529_vm5 }
 0x3f8   : > { %v8094_v55 = vpop.f32.mrf.mxu2  ;;  %v2761_v47 = vpop.permute.xlu0 %2760  ;;  %v3343_v52 = vsel %vm9535_vm0, %v3311_v22, %v3117_v31  ;;  %vm9547_vm12 = vmmov %vm9546_vm1 }
 0x3f9   : > { %v3247_v1 = vsel %vm9534_vm13, %v3214_v15, %v2761_v47  ;;  %v8125_v51 = vpop.f32.mrf.mxu3  ;;  %vm9548_vm11 = vmmov %vm9546_vm1 }
 0x3fa   : > { %v8099_v23 = vpop.f32.mrf.mxu1  ;;  %vm9549_vm15 = vmmov %vm9546_vm1 }
 0x3fb   : > { %v8127_v56 = vpop.f32.mrf.mxu0  ;;  %vm9550_vm14 = vmmov %vm9546_vm1 }
 0x3fc   : > { %vm9551_vm7 = vmmov %vm9546_vm1 }
 0x3fd   : > { %3589 = vmatmul.f32.gmra.mxu1 %v3247_v1  ;;  %3702 = vmatmul.f32.gmra.mxu2 %v3343_v52  ;;  %vm9552_vm2 = vmmov %vm9546_vm1 }
 0x3fe   : > { %vm9553_vm10 = vmmov %vm9546_vm1 }
 0x3ff   : > { %vm9554_vm9 = vmmov %vm9546_vm1 }
 0x400   : > { %v8106_v32 = vpop.f32.mrf.mxu2  ;;  %vm9555_vm5 = vmmov %vm9546_vm1 }
 0x401   : > { %v8132_v40 = vpop.f32.mrf.mxu3  ;;  %vm9556_vm3 = vmmov %vm9546_vm1 }
 0x402   : > { %v8118_v18 = vpop.f32.mrf.mxu1  ;;  %9538 = vst [vmem:[#allocation7_spill] sm:$0xff] %v8132_v40  ;;  %vm9557_vm4 = vmmov %vm9546_vm1 }
 0x403   : > { %v8134_v5 = vpop.f32.mrf.mxu0  ;;  %vm9558_vm6 = vmmov %vm9546_vm1 }
 0x404   : > { %vm9559_vm8 = vmmov %vm9546_vm1 }
 0x405   : > { %vm9560_vm13 = vmmov %vm9546_vm1 }
 0x406   : > { %vm9561_vm0 = vmmov %vm9546_vm1 }
 0x408   : > { %v8123_v19 = vpop.f32.mrf.mxu2 }
 0x409   : > { %v8139_v15 = vpop.f32.mrf.mxu3 }
 0x40a   : > { %v3548_v41 = vpop.f32.mrf.mxu1  ;;  %9539 = vst [vmem:[#allocation12_spill] sm:$0xff] %v8139_v15 }
 0x40b   : > { %v3549_v26 = vadd.f32 %v7896_v13, %v3548_v41  ;;  %v8142_v52 = vpop.f32.mrf.mxu0 }
 0x410   : > { %v3661_v14 = vpop.f32.mrf.mxu2 }
 0x411   : > { %v8130_v25 = vadd.f32 %v3661_v14, %v3549_v26  ;;  %v8147_v12 = vpop.f32.mrf.mxu3 }
 0x412   : > { %v3551_v3 = vpop.f32.mrf.mxu1  ;;  %9540 = vst [vmem:[#allocation13_spill] sm:$0xff] %v8147_v12 }
 0x413   : > { %v3552_v63 = vadd.f32 %v7896_v13, %v3551_v3 }
 0x418   : > { %v3664_v31 = vpop.f32.mrf.mxu2 }
 0x419   : > { %v8137_v47 = vadd.f32 %v3664_v31, %v3552_v63  ;;  %v8151_v63 = vpop.f32.mrf.mxu0 }
 0x41a   : > { %v3554_v22 = vpop.f32.mrf.mxu1 }
 0x41b   : > { %v3555_v1 = vadd.f32 %v7896_v13, %v3554_v22  ;;  %v8157_v22 = vpop.f32.mrf.mxu3 }
 0x41c   : > { %9542 = vst [vmem:[#allocation11_spill] sm:$0xff] %v8157_v22  ;;  %v3507_v22 = vadd.f32 %v7896_v13, %v7909_v0  ;;  %v3513_v0 = vadd.f32 %v7896_v13, %v7938_v17  ;;  %v3519_v17 = vadd.f32 %v7896_v13, %v7965_v16 }
 0x420   : > { %v3667_v41 = vpop.f32.mrf.mxu2 }
 0x421   : > { %v8144_v26 = vadd.f32 %v3667_v41, %v3555_v1  ;;  %v3501_v1 = vadd.f32 %v7896_v13, %v7872_v33  ;;  %v8163_v15 = vpop.f32.mrf.mxu0 }
 0x422   : > { %v3557_v14 = vpop.f32.mrf.mxu1 }
 0x423   : > { %v3558_v59 = vadd.f32 %v7896_v13, %v3557_v14  ;;  %v3614_v14 = vadd.f32 %v7885_v58, %v3501_v1  ;;  %v3510_v58 = vadd.f32 %v7896_v13, %v7926_v46  ;;  %v3626_v46 = vadd.f32 %v7949_v44, %v3513_v0 }
 0x424   : > { %v3896_v44 = vmul.f32 %v7907_v7, %v7907_v7  ;;  %v3522_v0 = vadd.f32 %v7896_v13, %v7988_v9 }
 0x425   : > { %v8170_v12 = vadd.f32 %v7883_v36, %v3614_v14  ;;  %v3623_v36 = vadd.f32 %v7934_v61, %v3510_v58 }
 0x426   : > { %v3635_v9 = vadd.f32 %v7999_v6, %v3522_v0 }
 0x427   : > { %9543 = vst [vmem:[#allocation16_spill] sm:$0xff] %v8170_v12 }
 0x428   : > { %v3670_v34 = vpop.f32.mrf.mxu2 }
 0x429   : > { %v8149_v3 = vadd.f32 %v3670_v34, %v3558_v59  ;;  %v3498_v34 = vadd.f32 %v7896_v13, %v7852_v60  ;;  %v8184_v60 = vpop.f32.mrf.mxu3  ;;  %v8191_v14 = vpop.f32.mrf.mxu0 }
 0x42a   : > { %v8153_v31 = vpop.f32.mrf.mxu1  ;;  %9544 = vst [vmem:[#allocation9_spill] sm:$0xff] %v8184_v60  ;;  %v3828_v60 = vsel %vm9550_vm14, %v7907_v7, 0.0  ;;  %vm9566_vm14 = vmmov %vm9561_vm0 }
 0x42b   : > { %9541 = vst [vmem:[#allocation15_spill] sm:$0xff] %v8149_v3  ;;  %v3611_v59 = vadd.f32 %v7864_v50, %v3498_v34  ;;  %v3620_v3 = vadd.f32 %v7920_v24, %v3507_v22  ;;  %v3895_v50 = vmul.f32 %v8170_v12, %v8170_v12  ;;  %v3516_v22 = vadd.f32 %v7896_v13, %v7953_v38 }
 0x42c   : > { %v3826_v34 = vsel %vm9546_vm1, %v8170_v12, 0.0  ;;  %v8216_v38 = vadd.f32 %v8092_v21, %v3623_v36  ;;  %vm9562_vm1 = vmmov %vm9561_vm0 }
 0x42d   : > { %v8177_v33 = vadd.f32 %v7856_v29, %v3611_v59  ;;  %v8196_v24 = vadd.f32 %v8071_v54, %v3620_v3  ;;  %v3927_v61 = vsel %vm9547_vm12, %v3895_v50, 0.0  ;;  %v8211_v54 = vld [vmem:[%s9096_s11 + $0x8] sm:$0xff]  ;;  %v3629_v3 = vadd.f32 %v7961_v8, %v3516_v22  ;;  %vm9563_vm12 = vmmov %vm9561_vm0 }
 0x42e   : > { %v8220_v58 = vand.u32 4294901760, %v8211_v54  ;;  %v3632_v50 = vadd.f32 %v7976_v11, %v3519_v17  ;;  %v8233_v8 = vadd.f32 %v8116_v45, %v3626_v46  ;;  %v3929_v17 = vsel %vm9551_vm7, %v3896_v44, 0.0  ;;  %vm9567_vm7 = vmmov %vm9561_vm0 }
 0x42f   : > { %v3894_v29 = vmul.f32 %v8177_v33, %v8177_v33  ;;  %9545 = vst [vmem:[#allocation17_spill] sm:$0xff] %v8196_v24  ;;  %v3825_v16 = vsel %vm9548_vm11, %v8177_v33, 0.0  ;;  %v3897_v21 = vmul.f32 %v8196_v24, %v8196_v24  ;;  %v3830_v45 = vsel %vm9552_vm2, %v8196_v24, 0.0  ;;  %vm9564_vm11 = vmmov %vm9561_vm0 }
 0x430   : > { %v8155_v27 = vpop.f32.mrf.mxu2  ;;  %4363 = vmatpush.msra.mxu1 %v8220_v58  ;;  %4015 = vmatpush.msra.mxu0 %v8220_v58  ;;  %v3827_v11 = vadd.f32 %v3826_v34, %v3825_v16  ;;  %v3898_v46 = vmul.f32 %v8216_v38, %v8216_v38  ;;  %v8249_v7 = vadd.f32 %v8127_v56, %v3629_v3  ;;  %v3832_v16 = vsel %vm9554_vm9, %v8216_v38, 0.0  ;;  %vm9568_vm2 = vmmov %vm9561_vm0 }
 0x431   : > { %v3926_v12 = vsel %vm9549_vm15, %v3894_v29, 0.0  ;;  %v3525_v29 = vadd.f32 %v7896_v13, %v8003_v28  ;;  %4175 = vmatpush.msra.mxu3 %v8220_v58  ;;  %v8251_v34 = vpop.f32.mrf.mxu3  ;;  %v8254_v6 = vadd.f32 %v8134_v5, %v3632_v50  ;;  %v3931_v44 = vsel %vm9553_vm10, %v3897_v21, 0.0  ;;  %v3759_v3 = vpop.f32.mrf.mxu0  ;;  %vm9565_vm15 = vmmov %vm9561_vm0 }
 0x432   : > { %v8161_v41 = vpop.f32.mrf.mxu1  ;;  %v3928_v22 = vadd.f32 %v3927_v61, %v3926_v12  ;;  %v3829_v12 = vadd.f32 %v3828_v60, %v3827_v11  ;;  %v3528_v61 = vadd.f32 %v7896_v13, %v8018_v42  ;;  %v3899_v56 = vmul.f32 %v8233_v8, %v8233_v8  ;;  %vm9569_vm10 = vmmov %vm9561_vm0 }
 0x433   : > { %v3638_v28 = vadd.f32 %v8014_v62, %v3525_v29  ;;  %v8265_v60 = vadd.f32 %v8142_v52, %v3635_v9  ;;  %v3933_v42 = vsel %vm9555_vm5, %v3898_v46, 0.0  ;;  %v3834_v50 = vsel %vm9556_vm3, %v8233_v8, 0.0  ;;  %vm9570_vm9 = vmmov %vm9561_vm0 }
 0x434   : > { %v3930_v0 = vadd.f32 %v3929_v17, %v3928_v22  ;;  %v3831_v24 = vadd.f32 %v3830_v45, %v3829_v12  ;;  %v3641_v5 = vadd.f32 %v8028_v10, %v3528_v61  ;;  %v3900_v21 = vmul.f32 %v8249_v7, %v8249_v7  ;;  %vm9571_vm5 = vmmov %vm9561_vm0 }
 0x435   : > { %v3531_v11 = vadd.f32 %v7896_v13, %v8033_v49  ;;  %v3901_v52 = vmul.f32 %v8254_v6, %v8254_v6  ;;  %v8280_v10 = vadd.f32 %v8151_v63, %v3638_v28  ;;  %v3935_v9 = vsel %vm9557_vm4, %v3899_v56, 0.0  ;;  %vm9572_vm3 = vmmov %vm9561_vm0 }
 0x436   : > { %v3932_v22 = vadd.f32 %v3931_v44, %v3930_v0  ;;  %v3833_v29 = vadd.f32 %v3832_v16, %v3831_v24  ;;  %v3836_v17 = vsel %vm9558_vm6, %v8249_v7, 0.0  ;;  %v3534_v46 = vadd.f32 %v7896_v13, %v8053_v43  ;;  %vm9574_vm4 = vmmov %vm9561_vm0 }
 0x437   : > { %v3644_v45 = vadd.f32 %v8044_v2, %v3531_v11  ;;  %v3902_v61 = vmul.f32 %v8265_v60, %v8265_v60  ;;  %v8293_v63 = vadd.f32 %v8163_v15, %v3641_v5  ;;  %v3937_v28 = vsel %vm9559_vm8, %v3900_v21, 0.0  ;;  %vm9575_vm6 = vmmov %vm9561_vm0 }
 0x438   : > { %v8172_v40 = vpop.f32.mrf.mxu2  ;;  %v3934_v49 = vadd.f32 %v3933_v42, %v3932_v22  ;;  %v3835_v24 = vadd.f32 %v3834_v50, %v3833_v29  ;;  %v3838_v44 = vsel %vm9560_vm13, %v8254_v6, 0.0  ;;  %v3647_v2 = vadd.f32 %v8061_v48, %v3534_v46  ;;  %vm9576_vm8 = vmmov %vm9561_vm0 }
 0x439   : > { %v3537_v43 = vadd.f32 %v7896_v13, %v8065_v53  ;;  %v3939_v0 = vsel %vm9561_vm0, %v3901_v52, 0.0  ;;  %v3903_v42 = vmul.f32 %v8280_v10, %v8280_v10  ;;  %v3840_v15 = vsel %vm9562_vm1, %v8265_v60, 0.0  ;;  %v8312_v21 = vpop.f32.mrf.mxu3  ;;  %vm9577_vm13 = vmmov %vm9561_vm0 }
 0x43a   : > { %v8182_v1 = vpop.f32.mrf.mxu1  ;;  %v3936_v16 = vadd.f32 %v3935_v9, %v3934_v49  ;;  %v3837_v56 = vadd.f32 %v3836_v17, %v3835_v24  ;;  %v8307_v5 = vadd.f32 %v8191_v14, %v3644_v45  ;;  %v3540_v48 = vadd.f32 %v7896_v13, %v8084_v57  ;;  %v3762_v17 = vpop.f32.mrf.mxu0  ;;  %vm9578_vm1 = vmmov %vm9561_vm0 }
 0x43b   : > { %v3650_v50 = vadd.f32 %v8080_v30, %v3537_v43  ;;  %v3941_v22 = vsel %vm9563_vm12, %v3902_v61, 0.0  ;;  %v3904_v29 = vmul.f32 %v8293_v63, %v8293_v63  ;;  %v3842_v14 = vsel %vm9564_vm11, %v8280_v10, 0.0  ;;  %vm9579_vm12 = vmmov %vm9561_vm0 }
 0x43c   : > { %v3938_v53 = vadd.f32 %v3937_v28, %v3936_v16  ;;  %v3839_v11 = vadd.f32 %v3838_v44, %v3837_v56  ;;  %v8321_v9 = vadd.f32 %v3759_v3, %v3647_v2  ;;  %v3653_v30 = vadd.f32 %v8094_v55, %v3540_v48  ;;  %vm9582_vm11 = vmmov %vm9561_vm0 }
 0x43d   : > { %v3543_v57 = vadd.f32 %v7896_v13, %v8099_v23  ;;  %v3943_v49 = vsel %vm9565_vm15, %v3903_v42, 0.0  ;;  %v3844_v24 = vsel %vm9566_vm14, %v8293_v63, 0.0  ;;  %v3905_v61 = vmul.f32 %v8307_v5, %v8307_v5  ;;  %vm9583_vm15 = vmmov %vm9561_vm0 }
 0x43e   : > { %v3940_v45 = vadd.f32 %v3939_v0, %v3938_v53  ;;  %v3841_v46 = vadd.f32 %v3840_v15, %v3839_v11  ;;  %v8331_v28 = vadd.f32 %v3762_v17, %v3650_v50  ;;  %v3546_v55 = vadd.f32 %v7896_v13, %v8118_v18  ;;  %vm9585_vm14 = vmmov %vm9561_vm0 }
 0x43f   : > { %v3656_v3 = vadd.f32 %v8106_v32, %v3543_v57  ;;  %v3945_v43 = vsel %vm9567_vm7, %v3904_v29, 0.0  ;;  %v3846_v16 = vsel %vm9568_vm2, %v8307_v5, 0.0  ;;  %v3906_v56 = vmul.f32 %v8321_v9, %v8321_v9  ;;  %vm9586_vm7 = vmmov %vm9561_vm0 }
 0x440   : > { %v8206_v59 = vpop.f32.mrf.mxu2  ;;  %v3942_v23 = vadd.f32 %v3941_v22, %v3940_v45  ;;  %v3843_v2 = vadd.f32 %v3842_v14, %v3841_v46  ;;  %v8344_v0 = vadd.f32 %v8026_v4, %v3653_v30  ;;  %v3659_v32 = vadd.f32 %v8123_v19, %v3546_v55  ;;  %vm9587_vm2 = vmmov %vm9561_vm0 }
 0x441   : > { %v3947_v18 = vsel %vm9569_vm10, %v3905_v61, 0.0  ;;  %v3848_v50 = vsel %vm9570_vm9, %v8321_v9, 0.0  ;;  %v3907_v48 = vmul.f32 %v8331_v28, %v8331_v28  ;;  %v8353_v53 = vadd.f32 %v8050_v37, %v3656_v3  ;;  %v8365_v57 = vpop.f32.mrf.mxu3  ;;  %vm9589_vm10 = vmmov %vm9561_vm0 }
 0x442   : > { %v8235_v36 = vpop.f32.mrf.mxu1  ;;  %v3944_v42 = vadd.f32 %v3943_v49, %v3942_v23  ;;  %v3845_v15 = vadd.f32 %v3844_v24, %v3843_v2  ;;  %v3949_v4 = vsel %vm9571_vm5, %v3906_v56, 0.0  ;;  %v3850_v19 = vsel %vm9572_vm3, %v8331_v28, 0.0  ;;  %vm9590_vm9 = vmmov %vm9561_vm0 }
 0x443   : > { %v3908_v14 = vmul.f32 %v8344_v0, %v8344_v0  ;;  %v8363_v30 = vadd.f32 %v8067_v39, %v3659_v32  ;;  %v3951_v45 = vsel %vm9574_vm4, %v3907_v48, 0.0  ;;  %v3852_v46 = vsel %vm9575_vm6, %v8344_v0, 0.0  ;;  %vm9592_vm5 = vmmov %vm9561_vm0 }
 0x444   : > { %v3946_v11 = vadd.f32 %v3945_v43, %v3944_v42  ;;  %v3847_v22 = vadd.f32 %v3846_v16, %v3845_v15  ;;  %v3909_v49 = vmul.f32 %v8353_v53, %v8353_v53  ;;  %v8374_v24 = vadd.f32 %v8088_v20, %v8130_v25  ;;  %vm9593_vm3 = vmmov %vm9561_vm0 }
 0x445   : > { %9573 = vst [vmem:[#allocation19_spill] sm:$0xff] %v8363_v30  ;;  %v3953_v55 = vsel %vm9576_vm8, %v3908_v14, 0.0  ;;  %v3910_v23 = vmul.f32 %v8363_v30, %v8363_v30  ;;  %v8383_v2 = vadd.f32 %v8104_v35, %v8137_v47  ;;  %v3561_v43 = vadd.f32 %v7896_v13, %v8153_v31  ;;  %vm9594_vm4 = vmmov %vm9561_vm0 }
 0x446   : > { %v3948_v17 = vadd.f32 %v3947_v18, %v3946_v11  ;;  %v3849_v37 = vadd.f32 %v3848_v50, %v3847_v22  ;;  %v3854_v20 = vsel %vm9577_vm13, %v8353_v53, 0.0  ;;  %v3955_v25 = vsel %vm9561_vm0, %v3909_v49, 0.0  ;;  %v9580_v22 = vld [vmem:[#allocation15_spill] sm:$0xff]  ;;  %vm9596_vm6 = vmmov %vm9561_vm0 }
 0x447   : > { %v3911_v32 = vmul.f32 %v8374_v24, %v8374_v24  ;;  %v8394_v42 = vadd.f32 %v8125_v51, %v8144_v26  ;;  %v3674_v35 = vadd.f32 %v8155_v27, %v3561_v43  ;;  %v3856_v31 = vsel %vm9578_vm1, %v8363_v30, 0.0  ;;  %vm9597_vm8 = vmmov %vm9561_vm0 }
 0x448   : > { %v8268_v62 = vpop.f32.mrf.mxu2  ;;  %v3950_v39 = vadd.f32 %v3949_v4, %v3948_v17  ;;  %v3851_v3 = vadd.f32 %v3850_v19, %v3849_v37  ;;  %v3564_v15 = vadd.f32 %v7896_v13, %v8161_v41  ;;  %v3957_v48 = vsel %vm9579_vm12, %v3910_v23, 0.0  ;;  %v9581_v4 = vld [vmem:[#allocation7_spill] sm:$0xff]  ;;  %vm9598_vm13 = vmmov %vm9561_vm0 }
 0x449   : > { %v3912_v11 = vmul.f32 %v8383_v2, %v8383_v2  ;;  %v8406_v51 = vadd.f32 %v9581_v4, %v9580_v22  ;;  %v3858_v27 = vsel %vm9582_vm11, %v8374_v24, 0.0  ;;  %v3567_v41 = vadd.f32 %v7896_v13, %v8182_v1  ;;  %vm9599_vm1 = vmmov %vm9561_vm0 }
 0x44a   : > { %v8288_v12 = vpop.f32.mrf.mxu1  ;;  %v3952_v16 = vadd.f32 %v3951_v45, %v3950_v39  ;;  %v3853_v56 = vadd.f32 %v3852_v46, %v3851_v3  ;;  %v3677_v19 = vadd.f32 %v8172_v40, %v3564_v15  ;;  %v3959_v17 = vsel %vm9583_vm15, %v3911_v32, 0.0  ;;  %v9584_v45 = vld [vmem:[#allocation12_spill] sm:$0xff]  ;;  %v8419_v39 = vpop.f32.mrf.mxu3  ;;  %vm9600_vm12 = vmmov %vm9561_vm0 }
 0x44b   : > { %v3913_v37 = vmul.f32 %v8394_v42, %v8394_v42  ;;  %v8417_v46 = vadd.f32 %v9584_v45, %v3674_v35  ;;  %v3680_v40 = vadd.f32 %v8206_v59, %v3567_v41  ;;  %v3961_v1 = vsel %vm9586_vm7, %v3912_v11, 0.0  ;;  %vm9601_vm11 = vmmov %vm9561_vm0 }
 0x44c   : > { %v3954_v47 = vadd.f32 %v3953_v55, %v3952_v16  ;;  %v3855_v50 = vadd.f32 %v3854_v20, %v3853_v56  ;;  %v3860_v55 = vsel %vm9585_vm14, %v8383_v2, 0.0  ;;  %v3914_v43 = vmul.f32 %v8406_v51, %v8406_v51  ;;  %vm9602_vm15 = vmmov %vm9561_vm0 }
 0x44d   : > { %v3570_v16 = vadd.f32 %v7896_v13, %v8235_v36  ;;  %v3862_v20 = vsel %vm9587_vm2, %v8394_v42, 0.0  ;;  %v3915_v59 = vmul.f32 %v8417_v46, %v8417_v46  ;;  %v9591_v36 = vld [vmem:[#allocation11_spill] sm:$0xff]  ;;  %vm9603_vm14 = vmmov %vm9561_vm0 }
 0x44e   : > { %v3956_v26 = vadd.f32 %v3955_v25, %v3954_v47  ;;  %v3857_v14 = vadd.f32 %v3856_v31, %v3855_v50  ;;  %v9588_v25 = vld [vmem:[#allocation13_spill] sm:$0xff]  ;;  %v3963_v47 = vsel %vm9589_vm10, %v3913_v37, 0.0  ;;  %v3864_v50 = vsel %vm9590_vm9, %v8406_v51, 0.0  ;;  %vm9604_vm7 = vmmov %vm9561_vm0 }
 0x44f   : > { %v8432_v32 = vadd.f32 %v9588_v25, %v3677_v19  ;;  %v3683_v31 = vadd.f32 %v8268_v62, %v3570_v16  ;;  %v3965_v4 = vsel %vm9592_vm5, %v3914_v43, 0.0  ;;  %v3866_v19 = vsel %vm9593_vm3, %v8417_v46, 0.0  ;;  %v9595_v37 = vld [vmem:[#allocation9_spill] sm:$0xff]  ;;  %vm9605_vm2 = vmmov %vm9561_vm0 }
 0x450   : > { %v8317_v52 = vpop.f32.mrf.mxu2  ;;  %v3958_v3 = vadd.f32 %v3957_v48, %v3956_v26  ;;  %v3859_v23 = vadd.f32 %v3858_v27, %v3857_v14  ;;  %v8441_v48 = vadd.f32 %v9591_v36, %v3680_v40  ;;  %v3573_v26 = vadd.f32 %v7896_v13, %v8288_v12  ;;  %vm9610_vm10 = vmmov %vm9561_vm0 }
 0x451   : > { %v3916_v62 = vmul.f32 %v8432_v32, %v8432_v32  ;;  %v8454_v45 = vadd.f32 %v9595_v37, %v3683_v31  ;;  %v3868_v40 = vsel %vm9596_vm6, %v8432_v32, 0.0  ;;  %vm9611_vm9 = vmmov %vm9561_vm0 }
 0x452   : > { %v8336_v44 = vpop.f32.mrf.mxu1  ;;  %v3960_v56 = vadd.f32 %v3959_v17, %v3958_v3  ;;  %v3861_v35 = vadd.f32 %v3860_v55, %v3859_v23  ;;  %v3967_v17 = vsel %vm9594_vm4, %v3915_v59, 0.0  ;;  %v3686_v3 = vadd.f32 %v8317_v52, %v3573_v26  ;;  %v3819_v26 = vld [vmem:[%s9096_s11] sm:$0xff]  ;;  %vm9612_vm5 = vmmov %vm9561_vm0 }
 0x453   : > { %v3576_v41 = vadd.f32 %v7896_v13, %v8336_v44  ;;  %v3917_v23 = vmul.f32 %v8441_v48, %v8441_v48  ;;  %v3810_v44 = vpop.f32.mrf.mxu3  ;;  %v3870_v52 = vsel %vm9598_vm13, %v8441_v48, 0.0  ;;  %vm9613_vm3 = vmmov %vm9561_vm0 }
 0x454   : > { %v3962_v15 = vadd.f32 %v3961_v1, %v3960_v56  ;;  %v3863_v22 = vadd.f32 %v3862_v20, %v3861_v35  ;;  %v3969_v56 = vsel %vm9597_vm8, %v3916_v62, 0.0  ;;  %v3918_v35 = vmul.f32 %v8454_v45, %v8454_v45  ;;  %vm9614_vm4 = vmmov %vm9561_vm0 }
 0x455   : > { %vm9615_vm6 = vmmov %vm9561_vm0 }
 0x456   : > { %v3964_v27 = vadd.f32 %v3963_v47, %v3962_v15  ;;  %v3865_v14 = vadd.f32 %v3864_v50, %v3863_v22  ;;  %v8470_v47 = vadd.f32 %v8251_v34, %v3686_v3  ;;  %v3872_v22 = vsel %vm9599_vm1, %v8454_v45, 0.0  ;;  %vm9616_vm8 = vmmov %vm9561_vm0 }
 0x457   : > { %vm9617_vm13 = vmmov %vm9561_vm0 }
 0x458   : > { %v8355_v29 = vpop.f32.mrf.mxu2  ;;  %v3966_v12 = vadd.f32 %v3965_v4, %v3964_v27  ;;  %v3867_v43 = vadd.f32 %v3866_v19, %v3865_v14  ;;  %v3919_v27 = vmul.f32 %v8470_v47, %v8470_v47  ;;  %v3874_v62 = vsel %vm9601_vm11, %v8470_v47, 0.0  ;;  %vm9618_vm1 = vmmov %vm9561_vm0 }
 0x459   : > { %v3689_v1 = vadd.f32 %v8355_v29, %v3576_v41  ;;  %v3971_v29 = vsel %vm9561_vm0, %v3917_v23, 0.0 }
 0x45a   : > { %v8376_v61 = vpop.f32.mrf.mxu1  ;;  %v3968_v16 = vadd.f32 %v3967_v17, %v3966_v12  ;;  %v3869_v25 = vadd.f32 %v3868_v40, %v3867_v43  ;;  %v3975_v40 = vsel %vm9602_vm15, %v3919_v27, 0.0 }
 0x45b   : > { %v3579_v20 = vadd.f32 %v7896_v13, %v8376_v61  ;;  %v8474_v59 = vadd.f32 %v8312_v21, %v3689_v1  ;;  %v5671_v13 = vld [vmem:[%s9091_s6] ss:$0 sm:$0xff] }
 0x45c   : > { %v3970_v50 = vadd.f32 %v3969_v56, %v3968_v16  ;;  %v3871_v36 = vadd.f32 %v3870_v52, %v3869_v25  ;;  %v9606_v25 = vld [vmem:[#allocation5_spill] sm:$0xff]  ;;  %v9607_v52 = vld [vmem:[#allocation4_spill] sm:$0xff] }
 0x45e   : > { %v3972_v21 = vadd.f32 %v3971_v29, %v3970_v50  ;;  %v3873_v17 = vadd.f32 %v3872_v22, %v3871_v36  ;;  %v9608_v29 = vld [vmem:[#allocation6_spill] sm:$0xff] }
 0x460   : > { %v3691_v18 = vpop.f32.mrf.mxu2  ;;  %v3875_v12 = vadd.f32 %v3874_v62, %v3873_v17 }
 0x461   : > { %v3692_v31 = vadd.f32 %v3691_v18, %v3579_v20  ;;  %v3973_v18 = vsel %vm9600_vm12, %v3918_v35, 0.0  ;;  %v8514_v35 = vsub.f32 %v9607_v52, %v9606_v25  ;;  %vm9619_vm12 = vmmov %vm9561_vm0 }
 0x462   : > { %v3581_v49 = vpop.f32.mrf.mxu1  ;;  %v3974_v37 = vadd.f32 %v3973_v18, %v3972_v21 }
 0x463   : > { %v3582_v61 = vadd.f32 %v5671_v13, %v3581_v49  ;;  %v8487_v49 = vand.u32 4294901760, %v3819_v26  ;;  %v8494_v41 = vadd.f32 %v8365_v57, %v3692_v31  ;;  %v3876_v57 = vsel %vm9603_vm14, %v8474_v59, 0.0  ;;  %v9609_v31 = vld [vmem:[#allocation8_spill] sm:$0xff] }
 0x464   : > { %v3976_v50 = vadd.f32 %v3975_v40, %v3974_v37  ;;  %v3877_v36 = vadd.f32 %v3876_v57, %v3875_v12  ;;  %v8532_v21 = vand.u32 4294901760, %v8514_v35 }
 0x465   : > { %4017 = vmatpush.msra.mxu0 %v8487_v49  ;;  %4177 = vmatpush.msra.mxu3 %v8487_v49  ;;  %v3878_v43 = vsel %vm9605_vm2, %v8494_v41, 0.0  ;;  %v3921_v16 = vmul.f32 %v8494_v41, %v8494_v41  ;;  %v8527_v22 = vsub.f32 %v3819_v26, %v8487_v49 }
 0x466   : > { %4365 = vmatpush.msra.mxu1 %v8487_v49  ;;  %v4042_v17 = vsub.f32 %v8514_v35, %v8532_v21 }
 0x467   : > { %v3979_v62 = vsel %vm9610_vm10, %v3921_v16, 0.0  ;;  %vm9622_vm10 = vmmov %vm9561_vm0 }
 0x468   : > { %v3694_v11 = vpop.f32.mrf.mxu2 }
 0x469   : > { %v3695_v4 = vadd.f32 %v3694_v11, %v3582_v61  ;;  %v3920_v11 = vmul.f32 %v8474_v59, %v8474_v59  ;;  %v8518_v61 = vsub.f32 %v9609_v31, %v9608_v29 }
 0x46a   : > { %v3584_v55 = vpop.f32.mrf.mxu1 }
 0x46b   : > { %v3585_v34 = vadd.f32 %v5671_v13, %v3584_v55  ;;  %v8499_v3 = vadd.f32 %v8419_v39, %v3695_v4  ;;  %v3813_v55 = vpop.f32.mrf.mxu3  ;;  %v3977_v1 = vsel %vm9604_vm7, %v3920_v11, 0.0  ;;  %v8535_v18 = vand.u32 4294901760, %v8518_v61 }
 0x46c   : > { %v3978_v27 = vadd.f32 %v3977_v1, %v3976_v50  ;;  %v8542_v11 = vand.u32 4294901760, %v8527_v22  ;;  %v4043_v1 = vand.u32 4294901760, %v4042_v17 }
 0x46d   : > { %v3880_v26 = vsel %vm9611_vm9, %v8499_v3, 0.0  ;;  %v4048_v37 = vsub.f32 %v8518_v61, %v8535_v18  ;;  %vm9623_vm9 = vmmov %vm9561_vm0 }
 0x46e   : > { %v4060_v16 = vsub.f32 %v8527_v22, %v8542_v11  ;;  %4232 = vmatpush.msrb.mxu3 %v4043_v1  ;;  %4044 = vmatpush.msrb.mxu0 %v4043_v1 }
 0x470   : > { %v3697_v15 = vpop.f32.mrf.mxu2 }
 0x471   : > { %v3698_v14 = vadd.f32 %v3697_v15, %v3585_v34  ;;  %v8522_v15 = vsub.f32 %v8211_v54, %v8220_v58 }
 0x472   : > { %v3587_v19 = vpop.f32.mrf.mxu1 }
 0x473   : > { %v3588_v23 = vadd.f32 %v5671_v13, %v3587_v19  ;;  %v8510_v39 = vadd.f32 %v3810_v44, %v3698_v14  ;;  %v3922_v44 = vmul.f32 %v8499_v3, %v8499_v3  ;;  %v8538_v54 = vand.u32 4294901760, %v8522_v15  ;;  %v3816_v31 = vpop.f32.mrf.mxu3 }
 0x474   : > { %v3879_v19 = vadd.f32 %v3878_v43, %v3877_v36  ;;  %v4049_v43 = vand.u32 4294901760, %v4048_v37 }
 0x475   : > { %v3923_v14 = vmul.f32 %v8510_v39, %v8510_v39  ;;  %v3882_v12 = vsel %vm9613_vm3, %v8510_v39, 0.0  ;;  %v4054_v57 = vsub.f32 %v8522_v15, %v8538_v54 }
 0x476   : > { %4238 = vmatpush.msrb.mxu3 %v4049_v43  ;;  %4050 = vmatpush.msrb.mxu0 %v4049_v43 }
 0x477   : > { %v3983_v50 = vsel %vm9614_vm4, %v3923_v14, 0.0  ;;  %vm9625_vm4 = vmmov %vm9561_vm0 }
 0x478   : > { %v3700_v56 = vpop.f32.mrf.mxu2 }
 0x479   : > { %v3701_v20 = vadd.f32 %v3700_v56, %v3588_v23  ;;  %v3980_v56 = vadd.f32 %v3979_v62, %v3978_v27  ;;  %v4061_v27 = vand.u32 4294901760, %v4060_v16 }
 0x47a   : > { %v3590_v4 = vpop.f32.mrf.mxu1 }
 0x47b   : > { %v8529_v34 = vadd.f32 %v3813_v55, %v3701_v20  ;;  %v3981_v55 = vsel %vm9612_vm5, %v3922_v44, 0.0  ;;  %v3591_v40 = vadd.f32 %v5671_v13, %v3590_v4  ;;  %v3881_v20 = vadd.f32 %v3880_v26, %v3879_v19 }
 0x47c   : > { %v4055_v44 = vand.u32 4294901760, %v4054_v57  ;;  %v3982_v4 = vadd.f32 %v3981_v55, %v3980_v56 }
 0x47d   : > { %v3924_v23 = vmul.f32 %v8529_v34, %v8529_v34  ;;  %v3884_v13 = vsel %vm9615_vm6, %v8529_v34, 0.0  ;;  %v3883_v30 = vadd.f32 %v3882_v12, %v3881_v20  ;;  %vm9626_vm6 = vmmov %vm9561_vm0 }
 0x47e   : > { %v3984_v19 = vadd.f32 %v3983_v50, %v3982_v4  ;;  %4244 = vmatpush.msrb.mxu3 %v4055_v44  ;;  %4056 = vmatpush.msrb.mxu0 %v4055_v44 }
 0x47f   : > { %v3985_v17 = vsel %vm9616_vm8, %v3924_v23, 0.0  ;;  %v3885_v62 = vadd.f32 %v3884_v13, %v3883_v30 }
 0x480   : > { %v3703_v52 = vpop.f32.mrf.mxu2  ;;  %4250 = vmatpush.msrb.mxu3 %v4061_v27  ;;  %4062 = vmatpush.msrb.mxu0 %v4061_v27 }
 0x481   : > { %v3704_v36 = vadd.f32 %v3703_v52, %v3591_v40  ;;  %v3986_v40 = vadd.f32 %v3985_v17, %v3984_v19 }
 0x483   : > { %v8565_v37 = vadd.f32 %v3816_v31, %v3704_v36 }
 0x485   : > { %v3886_v26 = vsel %vm9617_vm13, %v8565_v37, 0.0  ;;  %v3925_v14 = vmul.f32 %v8565_v37, %v8565_v37 }
 0x486   : > { %v3887_v55 = vadd.f32 %v3886_v26, %v3885_v62 }
 0x487   : > { %v3987_v12 = vsel %vm9561_vm0, %v3925_v14, 0.0 }
 0x488   : > { %v3888_v57 = vrot.slane %v3887_v55, 4  ;;  %v3988_v23 = vadd.f32 %v3987_v12, %v3986_v40  ;;  %v4619_v12 = vld [vmem:[%s9094_s9 + $0x18] sm:$0xff] }
 0x489   : > { %4732 = vmatpush.msra.mxu2 %v4619_v12 }
 0x48a   : > { %v3889_v1 = vadd.f32 %v3888_v57, %v3887_v55  ;;  %v3989_v43 = vrot.slane %v3988_v23, 4 }
 0x48c   : > { %v3890_v16 = vrot.slane %v3889_v1, 2  ;;  %v3990_v30 = vadd.f32 %v3989_v43, %v3988_v23 }
 0x48e   : > { %v3891_v56 = vadd.f32 %v3890_v16, %v3889_v1  ;;  %v3991_v20 = vrot.slane %v3990_v30, 2 }
 0x490   : > { %v3992_v52 = vadd.f32 %v3991_v20, %v3990_v30  ;;  %v3892_v31 = vrot.slane %v3891_v56, 1 }
 0x492   : > { %v3993_v50 = vrot.slane %v3992_v52, 1  ;;  %v3893_v13 = vadd.f32 %v3892_v31, %v3891_v56 }
 0x494   : > { %v3996_v36 = vsel %vm9618_vm1, %v3893_v13, 0  ;;  %v3994_v44 = vadd.f32 %v3993_v50, %v3992_v52  ;;  %vm9627_vm1 = vmmov %vm9561_vm0 }
 0x495   : > { %v4018_v4 = vand.u32 4294901760, %v3996_v36 }
 0x496   : > { %v4184_v17 = vsel %vm9619_vm12, %v3994_v44, 0 }
 0x497   : > { %v4019_v19 = vsub.f32 %v3996_v36, %v4018_v4  ;;  %4179 = vmatmul.f32.vlgmr.msra.gmra.mxu3 %v4018_v4  ;;  %v4206_v27 = vand.u32 4294901760, %v4184_v17 }
 0x498   : > { %4299 = vmatpush.msra.mxu3 %v9606_v25 }
 0x499   : > { %v4020_v62 = vand.u32 4294901760, %v4019_v19  ;;  %4367 = vmatmul.f32.vlgmr.msra.gmra.mxu1 %v4206_v27  ;;  %v4207_v40 = vsub.f32 %v4184_v17, %v4206_v27 }
 0x49a   : > { %4301 = vmatpush.msra.mxu3 %v9608_v29 }
 0x49b   : > { %v4021_v26 = vsub.f32 %v4019_v19, %v4020_v62  ;;  %v4208_v55 = vand.u32 4294901760, %v4207_v40 }
 0x49c   : > { %4303 = vmatpush.msra.mxu3 %v8220_v58 }
 0x49d   : > { %v4022_v14 = vand.u32 4294901760, %v4021_v26  ;;  %v4209_v57 = vsub.f32 %v4207_v40, %v4208_v55 }
 0x49e   : > { %4305 = vmatpush.msra.mxu3 %v8487_v49 }
 0x49f   : > { %4023 = vmatmul.f32.vlgmr.msra.gmra.mxu0 %v4022_v14  ;;  %4252 = vmatmul.f32.vlgmr.msrb.gmra.mxu3 %v4206_v27  ;;  %v4210_v23 = vand.u32 4294901760, %v4209_v57 }
 0x4a0   : > { %4082 = vmatpush.msra.mxu0 %v8514_v35  ;;  %5163 = vmatpush.msrb.mxu3 %v4619_v12 }
 0x4a2   : > { %4085 = vmatpush.msra.mxu0 %v8518_v61 }
 0x4a4   : > { %4088 = vmatpush.msra.mxu0 %v8522_v15 }
 0x4a6   : > { %4091 = vmatpush.msra.mxu0 %v8527_v22 }
 0x4a7   : > { %4064 = vmatmul.f32.vlgmr.msrb.gmra.mxu0 %v4018_v4  ;;  %4309 = vmatmul.f32.vlgmr.msra.gmra.mxu3 %v4208_v55 }
 0x4a8   : > { %4111 = vmatpush.msrb.mxu0 %v9606_v25 }
 0x4aa   : > { %4113 = vmatpush.msrb.mxu0 %v9608_v29 }
 0x4ac   : > { %4115 = vmatpush.msrb.mxu0 %v8220_v58 }
 0x4ae   : > { %4117 = vmatpush.msrb.mxu0 %v8487_v49 }
 0x4af   : > { %4094 = vmatmul.f32.vlgmr.msra.gmra.mxu0 %v4019_v19  ;;  %v4616_v19 = vld [vmem:[%s9094_s9] sm:$0xff] }
 0x4b0   : > { %4140 = vmatpush.msra.mxu0 %v8532_v21 }
 0x4b2   : > { %4144 = vmatpush.msra.mxu0 %v8535_v18 }
 0x4b4   : > { %4148 = vmatpush.msra.mxu0 %v8538_v54 }
 0x4b6   : > { %4152 = vmatpush.msra.mxu0 %v8542_v11 }
 0x4b7   : > { %4121 = vmatmul.f32.vlgmr.msrb.gmra.mxu0 %v4020_v62 }
 0x4b8   : > { %4199 = vmatpush.msrb.mxu0 %v9606_v25 }
 0x4ba   : > { %4201 = vmatpush.msrb.mxu0 %v9608_v29 }
 0x4bc   : > { %4203 = vmatpush.msrb.mxu0 %v8220_v58  ;;  %v4618_v58 = vld [vmem:[%s9094_s9 + $0x10] sm:$0xff] }
 0x4bd   : > { %4733 = vmatpush.msra.mxu2 %v4618_v58  ;;  %5164 = vmatpush.msrb.mxu3 %v4618_v58 }
 0x4be   : > { %4205 = vmatpush.msrb.mxu0 %v8487_v49 }
 0x4bf   : > { %4154 = vmatmul.f32.vlgmr.msra.gmra.mxu0 %v4018_v4  ;;  %v4617_v4 = vld [vmem:[%s9094_s9 + $0x8] sm:$0xff] }
 0x4c0   : > { %4270 = vmatpush.msra.mxu0 %v8514_v35  ;;  %4734 = vmatpush.msra.mxu2 %v4617_v4 }
 0x4c1   : > { %5165 = vmatpush.msrb.mxu3 %v4617_v4 }
 0x4c2   : > { %4273 = vmatpush.msra.mxu0 %v8518_v61  ;;  %4735 = vmatpush.msra.mxu2 %v4616_v19 }
 0x4c3   : > { %5166 = vmatpush.msrb.mxu3 %v4616_v19 }
 0x4c4   : > { %4276 = vmatpush.msra.mxu0 %v8522_v15 }
 0x4c6   : > { %4279 = vmatpush.msra.mxu0 %v8527_v22 }
 0x4c7   : > { %4211 = vmatmul.f32.vlgmr.msrb.gmra.mxu0 %v4210_v23 }
 0x4c8   : > { %4328 = vmatpush.msrb.mxu0 %v8532_v21 }
 0x4ca   : > { %4332 = vmatpush.msrb.mxu0 %v8535_v18 }
 0x4cc   : > { %4336 = vmatpush.msrb.mxu0 %v8538_v54 }
 0x4ce   : > { %4340 = vmatpush.msrb.mxu0 %v8542_v11 }
 0x4cf   : > { %4282 = vmatmul.f32.vlgmr.msra.gmra.mxu0 %v4207_v40 }
 0x4d7   : > { %4342 = vmatmul.f32.vlgmr.msrb.gmra.mxu0 %v4206_v27 }
 0x516   : > { %v4368_v13 = vpop.f32.mrf.mxu1 }
 0x51a   : > { %v4180_v15 = vpop.f32.mrf.mxu3 }
 0x51c   : > { %v4024_v49 = vpop.f32.mrf.mxu0 }
 0x522   : > { %v4253_v21 = vpop.f32.mrf.mxu3 }
 0x524   : > { %v4065_v25 = vpop.f32.mrf.mxu0 }
 0x525   : > { %v4066_v18 = vadd.f32 %v4065_v25, %v4024_v49  ;;  %v9620_v49 = vld [vmem:[#allocation16_spill] sm:$0xff] }
 0x52a   : > { %v4310_v56 = vpop.f32.mrf.mxu3 }
 0x52c   : > { %v4095_v35 = vpop.f32.mrf.mxu0 }
 0x52d   : > { %v4096_v54 = vadd.f32 %v4095_v35, %v4066_v18 }
 0x534   : > { %v4122_v29 = vpop.f32.mrf.mxu0 }
 0x535   : > { %v4123_v11 = vadd.f32 %v4122_v29, %v4096_v54 }
 0x53c   : > { %v4155_v61 = vpop.f32.mrf.mxu0 }
 0x53d   : > { %v4156_v16 = vadd.f32 %v4155_v61, %v4123_v11 }
 0x53f   : > { %v4181_v20 = vadd.f32 %v4180_v15, %v4156_v16 }
 0x541   : > { %v4371_v36 = vmul.f32 %v4181_v20, %v4181_v20  ;;  %v8614_v55 = vperm.slane %v4181_v20, 0 }
 0x543   : > { %v4385_v23 = vsub.f32 %v8177_v33, %v8614_v55  ;;  %v4386_v25 = vsub.f32 %v9620_v49, %v8614_v55  ;;  %v4393_v35 = vsub.f32 %v8265_v60, %v8614_v55  ;;  %v4394_v29 = vsub.f32 %v8280_v10, %v8614_v55 }
 0x544   : > { %v4212_v22 = vpop.f32.mrf.mxu0  ;;  %v4395_v15 = vsub.f32 %v8293_v63, %v8614_v55  ;;  %v4403_v33 = vsub.f32 %v8383_v2, %v8614_v55  ;;  %v4405_v60 = vsub.f32 %v8406_v51, %v8614_v55  ;;  %v4406_v10 = vsub.f32 %v8417_v46, %v8614_v55 }
 0x545   : > { %v4254_v43 = vadd.f32 %v4253_v21, %v4212_v22  ;;  %v4402_v22 = vsub.f32 %v8374_v24, %v8614_v55  ;;  %v4404_v21 = vsub.f32 %v8394_v42, %v8614_v55  ;;  %v4407_v18 = vsub.f32 %v8432_v32, %v8614_v55 }
 0x546   : > { %v4408_v63 = vsub.f32 %v8441_v48, %v8614_v55  ;;  %v4409_v24 = vsub.f32 %v8454_v45, %v8614_v55  ;;  %v4410_v2 = vsub.f32 %v8470_v47, %v8614_v55  ;;  %v4411_v42 = vsub.f32 %v8474_v59, %v8614_v55 }
 0x547   : > { %v4412_v51 = vsub.f32 %v8494_v41, %v8614_v55  ;;  %v4413_v46 = vsub.f32 %v8499_v3, %v8614_v55  ;;  %v4414_v32 = vsub.f32 %v8510_v39, %v8614_v55  ;;  %v4415_v48 = vsub.f32 %v8529_v34, %v8614_v55  ;;  %v8665_v3 = vld [vmem:[%s9092_s7] ss:$0 sm:$0xff] }
 0x548   : > { %v4416_v47 = vsub.f32 %v8565_v37, %v8614_v55 }
 0x54c   : > { %v4283_v1 = vpop.f32.mrf.mxu0 }
 0x54d   : > { %v4284_v30 = vadd.f32 %v4283_v1, %v4254_v43 }
 0x54f   : > { %v4311_v52 = vadd.f32 %v4310_v56, %v4284_v30 }
 0x554   : > { %v4343_v31 = vpop.f32.mrf.mxu0 }
 0x555   : > { %v4344_v50 = vadd.f32 %v4343_v31, %v4311_v52 }
 0x557   : > { %v4369_v44 = vadd.f32 %v4368_v13, %v4344_v50  ;;  %v8702_v50 = vld [vmem:[%s9093_s8] ss:$0 sm:$0xff] }
 0x559   : > { %v4372_v17 = vsub.f32 %v4369_v44, %v4371_v36 }
 0x55b   : > { %v4373_v27 = vadd.f32 1e-05, %v4372_v17 }
 0x55d   : > { %5663 = vrsqrt.f32 %v4373_v27  ;;  %vm4380_vm15 = vweird.f32 %v4373_v27 }
 0x563   : > { %v5664_v62 = vpop.eup %5663 }
 0x564   : > { %v4375_v26 = vmul.f32 %v5664_v62, %v4373_v27  ;;  %vm4381_vm11 = vweird.f32 %v5664_v62 }
 0x565   : > { %vm4382_vm14 = vmor %vm4380_vm15, %vm4381_vm11 }
 0x566   : > { %v4376_v14 = vmul.f32 %v5664_v62, %v4375_v26  ;;  %vm9628_vm15 = vmmov %vm9561_vm0 }
 0x568   : > { %v4377_v40 = vmul.f32 0.5, %v4376_v14 }
 0x56a   : > { %v4378_v12 = vsub.f32 1.5, %v4377_v40  ;;  %v9621_v40 = vld [vmem:[#allocation10_spill] sm:$0xff] }
 0x56c   : > { %v4379_v57 = vmul.f32 %v5664_v62, %v4378_v12  ;;  %v4387_v12 = vsub.f32 %v9621_v40, %v8614_v55 }
 0x56e   : > { %v4383_v58 = vsel %vm4382_vm14, %v5664_v62, %v4379_v57  ;;  %v4396_v57 = vsub.f32 %v8307_v5, %v8614_v55  ;;  %vm9629_vm14 = vmmov %vm9561_vm0 }
 0x56f   : > { %v8624_v61 = vperm.slane %v4383_v58, 0 }
 0x571   : > { %v4426_v45 = vmul.f32 %v8624_v61, %v4393_v35  ;;  %v4418_v54 = vmul.f32 %v8624_v61, %v4385_v23  ;;  %v4419_v59 = vmul.f32 %v8624_v61, %v4386_v25  ;;  %v4427_v41 = vmul.f32 %v8624_v61, %v4394_v29 }
 0x572   : > { %v4428_v39 = vmul.f32 %v8624_v61, %v4395_v15  ;;  %v4435_v34 = vmul.f32 %v8624_v61, %v4402_v22  ;;  %v8670_v1 = vmul.f32 %v8624_v61, %v4403_v33  ;;  %v8673_v37 = vmul.f32 %v8624_v61, %v4404_v21 }
 0x573   : > { %v8676_v11 = vmul.f32 %v8624_v61, %v4405_v60  ;;  %v8679_v43 = vmul.f32 %v8624_v61, %v4406_v10  ;;  %v8682_v16 = vmul.f32 %v8624_v61, %v4407_v18  ;;  %v8685_v30 = vmul.f32 %v8624_v61, %v4408_v63  ;;  %v9624_v10 = vld [vmem:[#allocation17_spill] sm:$0xff] }
 0x574   : > { %v8688_v56 = vmul.f32 %v8624_v61, %v4409_v24  ;;  %v8691_v20 = vmul.f32 %v8624_v61, %v4410_v2  ;;  %v8694_v52 = vmul.f32 %v8624_v61, %v4411_v42  ;;  %v8697_v31 = vmul.f32 %v8624_v61, %v4412_v51 }
 0x575   : > { %v8705_v13 = vmul.f32 %v8624_v61, %v4413_v46  ;;  %v8708_v36 = vmul.f32 %v8624_v61, %v4414_v32  ;;  %v8711_v44 = vmul.f32 %v8624_v61, %v4415_v48  ;;  %v8714_v4 = vmul.f32 %v8624_v61, %v4416_v47 }
 0x576   : > { %v4453_v17 = vmul.f32 %v8665_v3, %v4418_v54  ;;  %v4462_v19 = vmul.f32 %v8665_v3, %v4427_v41  ;;  %v4454_v26 = vmul.f32 %v8665_v3, %v4419_v59  ;;  %v4463_v14 = vmul.f32 %v8665_v3, %v4428_v39 }
 0x577   : > { %v4420_v49 = vmul.f32 %v8624_v61, %v4387_v12  ;;  %v4429_v25 = vmul.f32 %v8624_v61, %v4396_v57  ;;  %v4388_v18 = vsub.f32 %v9624_v10, %v8614_v55  ;;  %v4397_v63 = vsub.f32 %v8321_v9, %v8614_v55 }
 0x578   : > { %v4488_v27 = vadd.f32 %v8702_v50, %v4453_v17  ;;  %v4497_v62 = vadd.f32 %v8702_v50, %v4462_v19  ;;  %v4489_v15 = vadd.f32 %v8702_v50, %v4454_v26  ;;  %v4498_v22 = vadd.f32 %v8702_v50, %v4463_v14 }
 0x579   : > { %v4455_v21 = vmul.f32 %v8665_v3, %v4420_v49  ;;  %v4464_v60 = vmul.f32 %v8665_v3, %v4429_v25  ;;  %v4421_v24 = vmul.f32 %v8624_v61, %v4388_v18  ;;  %v4430_v2 = vmul.f32 %v8624_v61, %v4397_v63 }
 0x57a   : > { %vm4520_vm7 = vcmp.ge.f32.partialorder %v4488_v27, 0.0  ;;  %v4552_v23 = vmul.f32 0.1, %v4488_v27  ;;  %vm4529_vm2 = vcmp.ge.f32.partialorder %v4497_v62, 0.0  ;;  %v4561_v58 = vmul.f32 0.1, %v4497_v62 }
 0x57b   : > { %v4553_v33 = vmul.f32 0.1, %v4489_v15  ;;  %v4562_v5 = vmul.f32 0.1, %v4498_v22  ;;  %vm4521_vm5 = vcmp.ge.f32.partialorder %v4489_v15, 0.0  ;;  %vm4530_vm3 = vcmp.ge.f32.partialorder %v4498_v22, 0.0 }
 0x57c   : > { %v4584_v35 = vsel %vm4520_vm7, %v4488_v27, %v4552_v23  ;;  %v4593_v29 = vsel %vm4529_vm2, %v4497_v62, %v4561_v58  ;;  %v4490_v46 = vadd.f32 %v8702_v50, %v4455_v21  ;;  %v4499_v32 = vadd.f32 %v8702_v50, %v4464_v60 }
 0x57d   : > { %5122 = vmatmul.msk.f32.vlgmr.msra.gmra.mxu2 %vm9622_vm10, %v4584_v35  ;;  %5131 = vmatmul.msk.f32.vlgmr.msrb.gmra.mxu3 %vm9623_vm9, %v4593_v29  ;;  %v4585_v42 = vsel %vm4521_vm5, %v4489_v15, %v4553_v33  ;;  %v4594_v51 = vsel %vm4530_vm3, %v4498_v22, %v4562_v5  ;;  %v4389_v48 = vsub.f32 %v8216_v38, %v8614_v55  ;;  %vm9630_vm10 = vmmov %vm9561_vm0 }
 0x57e   : > { %v4456_v9 = vmul.f32 %v8665_v3, %v4421_v24  ;;  %v4465_v47 = vmul.f32 %v8665_v3, %v4430_v2  ;;  %v4461_v54 = vmul.f32 %v8665_v3, %v4426_v45  ;;  %v4470_v59 = vmul.f32 %v8665_v3, %v4435_v34  ;;  %vm9631_vm9 = vmmov %vm9561_vm0 }
 0x57f   : > { %v4398_v41 = vsub.f32 %v8331_v28, %v8614_v55  ;;  %vm4522_vm8 = vcmp.ge.f32.partialorder %v4490_v46, 0.0  ;;  %v4554_v39 = vmul.f32 0.1, %v4490_v46  ;;  %v4563_v17 = vmul.f32 0.1, %v4499_v32 }
 0x580   : > { %vm4531_vm13 = vcmp.ge.f32.partialorder %v4499_v32, 0.0  ;;  %v8753_v19 = vadd.f32 %v8702_v50, %v4461_v54  ;;  %v8756_v38 = vadd.f32 %v8702_v50, %v4470_v59  ;;  %v4471_v27 = vmul.f32 %v8665_v3, %v8670_v1 }
 0x581   : > { %v4472_v45 = vmul.f32 %v8665_v3, %v8673_v37  ;;  %v4473_v34 = vmul.f32 %v8665_v3, %v8676_v11  ;;  %v4422_v28 = vmul.f32 %v8624_v61, %v4389_v48  ;;  %v4431_v62 = vmul.f32 %v8624_v61, %v4398_v41 }
 0x582   : > { %v4491_v26 = vadd.f32 %v8702_v50, %v4456_v9  ;;  %v4500_v14 = vadd.f32 %v8702_v50, %v4465_v47  ;;  %v4586_v40 = vsel %vm4522_vm8, %v4490_v46, %v4554_v39  ;;  %v4595_v12 = vsel %vm4531_vm13, %v4499_v32, %v4563_v17 }
 0x583   : > { %v8769_v57 = vadd.f32 %v8702_v50, %v4471_v27  ;;  %v8772_v1 = vadd.f32 %v8702_v50, %v4472_v45  ;;  %v8777_v37 = vadd.f32 %v8702_v50, %v4473_v34  ;;  %v4390_v11 = vsub.f32 %v8233_v8, %v8614_v55 }
 0x584   : > { %v4399_v23 = vsub.f32 %v8344_v0, %v8614_v55  ;;  %v4555_v58 = vmul.f32 0.1, %v4491_v26  ;;  %v4564_v49 = vmul.f32 0.1, %v4500_v14  ;;  %v4457_v25 = vmul.f32 %v8665_v3, %v4422_v28 }
 0x585   : > { %5123 = vmatmul.msk.f32.gmra.mxu2 %vm9625_vm4, %v4585_v42  ;;  %5132 = vmatmul.msk.f32.gmra.mxu3 %vm9626_vm6, %v4594_v51  ;;  %v4474_v35 = vmul.f32 %v8665_v3, %v8679_v43  ;;  %v4466_v29 = vmul.f32 %v8665_v3, %v4431_v62  ;;  %v4475_v15 = vmul.f32 %v8665_v3, %v8682_v16  ;;  %vm4523_vm12 = vcmp.ge.f32.partialorder %v4491_v26, 0.0  ;;  %vm9633_vm4 = vmmov %vm9561_vm0 }
 0x586   : > { %v4476_v22 = vmul.f32 %v8665_v3, %v8685_v30  ;;  %v4477_v8 = vmul.f32 %v8665_v3, %v8688_v56  ;;  %vm4532_vm11 = vcmp.ge.f32.partialorder %v4500_v14, 0.0  ;;  %v4478_v33 = vmul.f32 %v8665_v3, %v8691_v20  ;;  %vm9634_vm6 = vmmov %vm9561_vm0 }
 0x587   : > { %v8794_v0 = vadd.f32 %v8702_v50, %v4474_v35  ;;  %v8799_v43 = vadd.f32 %v8702_v50, %v4475_v15  ;;  %v4479_v30 = vmul.f32 %v8665_v3, %v8694_v52  ;;  %v4423_v56 = vmul.f32 %v8624_v61, %v4390_v11 }
 0x588   : > { %v8802_v5 = vadd.f32 %v8702_v50, %v4476_v22  ;;  %v8805_v16 = vadd.f32 %v8702_v50, %v4477_v8  ;;  %v4432_v21 = vmul.f32 %v8624_v61, %v4399_v23  ;;  %v8812_v60 = vadd.f32 %v8702_v50, %v4478_v33 }
 0x589   : > { %v4480_v20 = vmul.f32 %v8665_v3, %v8697_v31  ;;  %v4587_v10 = vsel %vm4523_vm12, %v4491_v26, %v4555_v58  ;;  %v4596_v18 = vsel %vm4532_vm11, %v4500_v14, %v4564_v49  ;;  %v4492_v63 = vadd.f32 %v8702_v50, %v4457_v25  ;;  %v9632_v14 = vld [vmem:[#allocation19_spill] sm:$0xff] }
 0x58a   : > { %v4501_v24 = vadd.f32 %v8702_v50, %v4466_v29  ;;  %v4391_v52 = vsub.f32 %v8249_v7, %v8614_v55  ;;  %v4400_v2 = vsub.f32 %v8353_v53, %v8614_v55  ;;  %v8825_v42 = vadd.f32 %v8702_v50, %v4479_v30 }
 0x58b   : > { %v4458_v31 = vmul.f32 %v8665_v3, %v4423_v56  ;;  %v8829_v51 = vadd.f32 %v8702_v50, %v4480_v20  ;;  %v4481_v46 = vmul.f32 %v8665_v3, %v8705_v13  ;;  %v4482_v32 = vmul.f32 %v8665_v3, %v8708_v36 }
 0x58c   : > { %v4556_v48 = vmul.f32 0.1, %v4492_v63  ;;  %v4565_v9 = vmul.f32 0.1, %v4501_v24  ;;  %v4467_v7 = vmul.f32 %v8665_v3, %v4432_v21  ;;  %v4483_v53 = vmul.f32 %v8665_v3, %v8711_v44 }
 0x58d   : > { %5124 = vmatmul.msk.f32.gmra.mxu2 %vm9561_vm0, %v4586_v40  ;;  %5133 = vmatmul.msk.f32.gmra.mxu3 %vm9627_vm1, %v4595_v12  ;;  %vm4524_vm7 = vcmp.ge.f32.partialorder %v4492_v63, 0.0  ;;  %vm4533_vm2 = vcmp.ge.f32.partialorder %v4501_v24, 0.0  ;;  %v8839_v47 = vadd.f32 %v8702_v50, %v4481_v46  ;;  %v8842_v54 = vadd.f32 %v8702_v50, %v4482_v32  ;;  %vm9635_vm1 = vmmov %vm9561_vm0 }
 0x58e   : > { %v8845_v13 = vadd.f32 %v8702_v50, %v4483_v53  ;;  %v4484_v36 = vmul.f32 %v8665_v3, %v8714_v4  ;;  %v4424_v59 = vmul.f32 %v8624_v61, %v4391_v52  ;;  %v4433_v41 = vmul.f32 %v8624_v61, %v4400_v2 }
 0x58f   : > { %v4493_v44 = vadd.f32 %v8702_v50, %v4458_v31  ;;  %v4588_v39 = vsel %vm4524_vm7, %v4492_v63, %v4556_v48  ;;  %v4597_v17 = vsel %vm4533_vm2, %v4501_v24, %v4565_v9  ;;  %v4502_v27 = vadd.f32 %v8702_v50, %v4467_v7 }
 0x590   : > { %v8854_v45 = vadd.f32 %v8702_v50, %v4484_v36  ;;  %v4459_v4 = vmul.f32 %v8665_v3, %v4424_v59  ;;  %v4468_v62 = vmul.f32 %v8665_v3, %v4433_v41  ;;  %v4392_v26 = vsub.f32 %v8254_v6, %v8614_v55  ;;  %v5672_v59 = vld [vmem:[%s5800_s28] sm:$0xff] }
 0x591   : > { %v4557_v34 = vmul.f32 0.1, %v4493_v44  ;;  %v4566_v28 = vmul.f32 0.1, %v4502_v27  ;;  %v4401_v40 = vsub.f32 %v9632_v14, %v8614_v55  ;;  %vm4525_vm5 = vcmp.ge.f32.partialorder %v4493_v44, 0.0 }
 0x592   : > { %vm4534_vm3 = vcmp.ge.f32.partialorder %v4502_v27, 0.0  ;;  %v4425_v12 = vmul.f32 %v8624_v61, %v4392_v26  ;;  %v4494_v49 = vadd.f32 %v8702_v50, %v4459_v4  ;;  %v4503_v25 = vadd.f32 %v8702_v50, %v4468_v62 }
 0x593   : > { %v4434_v11 = vmul.f32 %v8624_v61, %v4401_v40  ;;  %v4589_v23 = vsel %vm4525_vm5, %v4493_v44, %v4557_v34  ;;  %v4598_v58 = vsel %vm4534_vm3, %v4502_v27, %v4566_v28  ;;  %v4569_v20 = vmul.f32 0.1, %v8756_v38  ;;  %vm9640_vm3 = vmmov %vm9561_vm0  ;;  %v5674_v40 = vld [vmem:[%s5800_s28 + $0x8] sm:$0xff] }
 0x594   : > { %v4558_v6 = vmul.f32 0.1, %v4494_v49  ;;  %v4567_v35 = vmul.f32 0.1, %v4503_v25  ;;  %v4460_v55 = vmul.f32 %v8665_v3, %v4425_v12  ;;  %vm4526_vm8 = vcmp.ge.f32.partialorder %v4494_v49, 0.0 }
 0x595   : > { %5125 = vmatmul.msk.f32.gmra.mxu2 %vm9628_vm15, %v4587_v10  ;;  %5134 = vmatmul.msk.f32.gmra.mxu3 %vm9629_vm14, %v4596_v18  ;;  %v4469_v29 = vmul.f32 %v8665_v3, %v4434_v11  ;;  %vm4535_vm13 = vcmp.ge.f32.partialorder %v4503_v25, 0.0  ;;  %vm9636_vm15 = vmmov %vm9561_vm0  ;;  %v4560_v3 = vmul.f32 0.1, %v8753_v19  ;;  %vm4528_vm7 = vcmp.ge.f32.partialorder %v8753_v19, 0.0  ;;  %v5675_v11 = vld [vmem:[%s5800_s28 + $0x50] sm:$0xff] }
 0x596   : > { %v4590_v15 = vsel %vm4526_vm8, %v4494_v49, %v4558_v6  ;;  %v4599_v61 = vsel %vm4535_vm13, %v4503_v25, %v4567_v35  ;;  %v4495_v22 = vadd.f32 %v8702_v50, %v4460_v55  ;;  %vm9637_vm14 = vmmov %vm9561_vm0  ;;  %vm4537_vm2 = vcmp.ge.f32.partialorder %v8756_v38, 0.0 }
 0x597   : > { %v4504_v8 = vadd.f32 %v8702_v50, %v4469_v29  ;;  %v4592_v50 = vsel %vm4528_vm7, %v8753_v19, %v4560_v3  ;;  %v4601_v10 = vsel %vm4537_vm2, %v8756_v38, %v4569_v20  ;;  %v4570_v18 = vmul.f32 0.1, %v8769_v57  ;;  %vm9642_vm13 = vmmov %vm9561_vm0 }
 0x598   : > { %v4559_v33 = vmul.f32 0.1, %v4495_v22  ;;  %vm4527_vm12 = vcmp.ge.f32.partialorder %v4495_v22, 0.0  ;;  %vm4538_vm5 = vcmp.ge.f32.partialorder %v8769_v57, 0.0  ;;  %v4571_v24 = vmul.f32 0.1, %v8772_v1  ;;  %vm9645_vm2 = vmmov %vm9635_vm1 }
 0x599   : > { %v4568_v30 = vmul.f32 0.1, %v4504_v8  ;;  %vm4536_vm11 = vcmp.ge.f32.partialorder %v4504_v8, 0.0  ;;  %v4602_v63 = vsel %vm4538_vm5, %v8769_v57, %v4570_v18  ;;  %v4572_v38 = vmul.f32 0.1, %v8777_v37 }
 0x59a   : > { %v4591_v56 = vsel %vm4527_vm12, %v4495_v22, %v4559_v33  ;;  %vm4540_vm8 = vcmp.ge.f32.partialorder %v8777_v37, 0.0  ;;  %v4573_v57 = vmul.f32 0.1, %v8794_v0  ;;  %vm4542_vm12 = vcmp.ge.f32.partialorder %v8799_v43, 0.0  ;;  %v5676_v22 = vld [vmem:[%s5800_s28 + $0x10] sm:$0xff]  ;;  %v5677_v33 = vld [vmem:[%s5800_s28 + $0x58] sm:$0xff] }
 0x59b   : > { %v4600_v21 = vsel %vm4536_vm11, %v4504_v8, %v4568_v30  ;;  %v4604_v52 = vsel %vm4540_vm8, %v8777_v37, %v4572_v38  ;;  %vm9643_vm11 = vmmov %vm9635_vm1  ;;  %v4575_v37 = vmul.f32 0.1, %v8802_v5  ;;  %vm4544_vm7 = vcmp.ge.f32.partialorder %v8805_v16, 0.0 }
 0x59c   : > { %vm4546_vm5 = vcmp.ge.f32.partialorder %v8825_v42, 0.0  ;;  %vm9648_vm8 = vcmask 31744   ;;  %v4579_v62 = vmul.f32 0.1, %v8829_v51 }
 0x59d   : > { %5126 = vmatmul.msk.f32.gmra.mxu2 %vm9630_vm10, %v4588_v39  ;;  %5135 = vmatmul.msk.f32.gmra.mxu3 %vm9631_vm9, %v4597_v17  ;;  %vm9638_vm10 = vmmov %vm9561_vm0 }
 0x59e   : > { %vm9639_vm9 = vmmov %vm9561_vm0 }
 0x5a5   : > { %5127 = vmatmul.msk.f32.gmra.mxu2 %vm9633_vm4, %v4589_v23  ;;  %5136 = vmatmul.msk.f32.gmra.mxu3 %vm9634_vm6, %v4598_v58  ;;  %vm4539_vm4 = vcmp.ge.f32.partialorder %v8772_v1, 0.0  ;;  %vm9641_vm6 = vmmov %vm9561_vm0 }
 0x5a6   : > { %v4603_v19 = vsel %vm4539_vm4, %v8772_v1, %v4571_v24  ;;  %v4574_v1 = vmul.f32 0.1, %v8799_v43 }
 0x5a8   : > { %v4606_v31 = vsel %vm4542_vm12, %v8799_v43, %v4574_v1  ;;  %v4577_v43 = vmul.f32 0.1, %v8812_v60 }
 0x5ad   : > { %5128 = vmatmul.msk.f32.gmra.mxu2 %vm9561_vm0, %v4590_v15  ;;  %5137 = vmatmul.msk.f32.gmra.mxu3 %vm9635_vm1, %v4599_v61  ;;  %vm4541_vm0 = vcmp.ge.f32.partialorder %v8794_v0, 0.0  ;;  %v4580_v15 = vmul.f32 0.1, %v8839_v47 }
 0x5ae   : > { %v4605_v2 = vsel %vm4541_vm0, %v8794_v0, %v4573_v57  ;;  %v4576_v0 = vmul.f32 0.1, %v8805_v16  ;;  %vm4547_vm0 = vcmp.ge.f32.partialorder %v8829_v51, 0.0 }
 0x5af   : > { %v4611_v58 = vsel %vm4547_vm0, %v8829_v51, %v4579_v62 }
 0x5b0   : > { %v4608_v32 = vsel %vm4544_vm7, %v8805_v16, %v4576_v0  ;;  %v4578_v16 = vmul.f32 0.1, %v8825_v42  ;;  %vm4548_vm7 = vcmp.ge.f32.partialorder %v8839_v47, 0.0 }
 0x5b2   : > { %v4610_v39 = vsel %vm4546_vm5, %v8825_v42, %v4578_v16  ;;  %vm9654_vm5 = vmmov %vm9648_vm8  ;;  %v5681_v16 = vld [vmem:[%s5800_s28 + $0x68] sm:$0xff] }
 0x5b5   : > { %5129 = vmatmul.msk.f32.gmra.mxu2 %vm9636_vm15, %v4591_v56  ;;  %5138 = vmatmul.msk.f32.gmra.mxu3 %vm9637_vm14, %v4600_v21  ;;  %vm4543_vm15 = vcmp.ge.f32.partialorder %v8802_v5, 0.0  ;;  %vm9644_vm14 = vmmov %vm9635_vm1  ;;  %v4612_v56 = vsel %vm4548_vm7, %v8839_v47, %v4580_v15 }
 0x5b6   : > { %v4607_v46 = vsel %vm4543_vm15, %v8802_v5, %v4575_v37  ;;  %v8921_v5 = vld [vmem:[%s9095_s10] ss:$0 sm:$0xff]  ;;  %vm9651_vm15 = vmmov %vm9648_vm8 }
 0x5bd   : > { %5130 = vmatmul.msk.f32.gmra.mxu2 %vm9638_vm10, %v4592_v50  ;;  %5139 = vmatmul.msk.f32.gmra.mxu3 %vm9639_vm9, %v4601_v10  ;;  %vm4545_vm10 = vcmp.ge.f32.partialorder %v8812_v60, 0.0  ;;  %vm9646_vm9 = vmmov %vm9635_vm1 }
 0x5be   : > { %v4609_v48 = vsel %vm4545_vm10, %v8812_v60, %v4577_v43  ;;  %v5673_v60 = vld [vmem:[%s5800_s28 + $0x48] sm:$0xff]  ;;  %v4582_v43 = vmul.f32 0.1, %v8845_v13 }
 0x5c5   : > { %5140 = vmatmul.msk.f32.gmra.mxu3 %vm9640_vm3, %v4602_v63  ;;  %v4581_v63 = vmul.f32 0.1, %v8842_v54 }
 0x5cd   : > { %5141 = vmatmul.msk.f32.gmra.mxu3 %vm9641_vm6, %v4603_v19  ;;  %vm9647_vm6 = vmmov %vm9635_vm1  ;;  %v5678_v19 = vld [vmem:[%s5800_s28 + $0x18] sm:$0xff] }
 0x5d5   : > { %5142 = vmatmul.msk.f32.gmra.mxu3 %vm9642_vm13, %v4604_v52  ;;  %vm9649_vm13 = vmmov %vm9648_vm8  ;;  %v5679_v52 = vld [vmem:[%s5800_s28 + $0x60] sm:$0xff] }
 0x5dd   : > { %5143 = vmatmul.msk.f32.gmra.mxu3 %vm9635_vm1, %v4605_v2 }
 0x5e5   : > { %5144 = vmatmul.msk.f32.gmra.mxu3 %vm9643_vm11, %v4606_v31  ;;  %vm9650_vm11 = vmmov %vm9645_vm2 }
 0x5ed   : > { %5145 = vmatmul.msk.f32.gmra.mxu3 %vm9644_vm14, %v4607_v46  ;;  %vm9652_vm14 = vmmov %vm9648_vm8 }
 0x5f5   : > { %5146 = vmatmul.msk.f32.gmra.mxu3 %vm9645_vm2, %v4608_v32 }
 0x5fd   : > { %5147 = vmatmul.msk.f32.gmra.mxu3 %vm9646_vm9, %v4609_v48  ;;  %vm9653_vm9 = vmmov %vm9647_vm6 }
 0x600   : > { %v4737_v9 = vpop.f32.mrf.mxu2  ;;  %v4764_v7 = vpop.f32.mrf.mxu3 }
 0x601   : > { %v4738_v53 = vadd.f32 %v8921_v5, %v4737_v9  ;;  %v4765_v36 = vadd.f32 %v8921_v5, %v4764_v7  ;;  %v5680_v9 = vld [vmem:[%s5800_s28 + $0x20] sm:$0xff] }
 0x603   : > { %v4833_v41 = vadd.f32 %v5672_v59, %v4738_v53  ;;  %v4842_v44 = vadd.f32 %v5673_v60, %v4765_v36 }
 0x605   : > { %vm4865_vm3 = vcmp.ge.f32.partialorder %v4833_v41, 0.0  ;;  %v4897_v17 = vmul.f32 0.1, %v4833_v41  ;;  %vm4874_vm4 = vcmp.ge.f32.partialorder %v4842_v44, 0.0  ;;  %v4906_v27 = vmul.f32 0.1, %v4842_v44  ;;  %5148 = vmatmul.msk.f32.gmra.mxu3 %vm9647_vm6, %v4610_v39 }
 0x607   : > { %v4929_v34 = vsel %vm4865_vm3, %v4833_v41, %v4897_v17  ;;  %v4938_v28 = vsel %vm4874_vm4, %v4842_v44, %v4906_v27  ;;  %vm9655_vm3 = vmmov %vm9654_vm5  ;;  %vm4549_vm4 = vcmp.ge.f32.partialorder %v8842_v54, 0.0  ;;  %v4583_v27 = vmul.f32 0.1, %v8854_v45 }
 0x608   : > { %4961 = vst.msk [vmem:[%s8935_s19] sm:$0xff] %vm9648_vm8, %v4929_v34  ;;  %v4740_v42 = vpop.f32.mrf.mxu2  ;;  %v4767_v4 = vpop.f32.mrf.mxu3  ;;  %v4613_v2 = vsel %vm4549_vm4, %v8842_v54, %v4581_v63  ;;  %vm9657_vm0 = vmmov %vm9655_vm3 }
 0x609   : > { %4970 = vst.msk [vmem:[%s8935_s19 + $0x48] sm:$0xff] %vm9649_vm13, %v4938_v28  ;;  %v4741_v26 = vadd.f32 %v8921_v5, %v4740_v42  ;;  %v4768_v14 = vadd.f32 %v8921_v5, %v4767_v4  ;;  %vm9656_vm13 = vmmov %vm9653_vm9  ;;  %v5682_v28 = vld [vmem:[%s5800_s28 + $0x28] sm:$0xff]  ;;  %v5683_v4 = vld [vmem:[%s5800_s28 + $0x70] sm:$0xff] }
 0x60a   : > { %vm9660_vm7 = vmmov %vm9657_vm0 }
 0x60b   : > { %v4834_v12 = vadd.f32 %v5674_v40, %v4741_v26  ;;  %v4843_v23 = vadd.f32 %v5675_v11, %v4768_v14  ;;  %vm9663_vm4 = vmmov %vm9657_vm0 }
 0x60d   : > { %vm4866_vm1 = vcmp.ge.f32.partialorder %v4834_v12, 0.0  ;;  %v4898_v49 = vmul.f32 0.1, %v4834_v12  ;;  %vm4875_vm12 = vcmp.ge.f32.partialorder %v4843_v23, 0.0  ;;  %v4907_v25 = vmul.f32 0.1, %v4843_v23  ;;  %5149 = vmatmul.msk.f32.gmra.mxu3 %vm9650_vm11, %v4611_v58 }
 0x60f   : > { %v4930_v6 = vsel %vm4866_vm1, %v4834_v12, %v4898_v49  ;;  %v4939_v35 = vsel %vm4875_vm12, %v4843_v23, %v4907_v25  ;;  %vm9658_vm1 = vmmov %vm9657_vm0  ;;  %vm4550_vm12 = vcmp.ge.f32.partialorder %v8845_v13, 0.0  ;;  %v5684_v25 = vld [vmem:[%s5800_s28 + $0x30] sm:$0xff] }
 0x610   : > { %4962 = vst.msk [vmem:[%s8935_s19 + $0x8] sm:$0xff] %vm9651_vm15, %v4930_v6  ;;  %v4743_v55 = vpop.f32.mrf.mxu2  ;;  %v4770_v29 = vpop.f32.mrf.mxu3  ;;  %v4614_v36 = vsel %vm4550_vm12, %v8845_v13, %v4582_v43 }
 0x611   : > { %4971 = vst.msk [vmem:[%s8935_s19 + $0x50] sm:$0xff] %vm9652_vm14, %v4939_v35  ;;  %v4744_v51 = vadd.f32 %v8921_v5, %v4743_v55  ;;  %v4771_v61 = vadd.f32 %v8921_v5, %v4770_v29  ;;  %vm9659_vm14 = vmmov %vm9653_vm9  ;;  %v5685_v35 = vld [vmem:[%s5800_s28 + $0x78] sm:$0xff] }
 0x613   : > { %v4835_v8 = vadd.f32 %v5676_v22, %v4744_v51  ;;  %v4844_v30 = vadd.f32 %v5677_v33, %v4771_v61 }
 0x615   : > { %vm4867_vm2 = vcmp.ge.f32.partialorder %v4835_v8, 0.0  ;;  %v4899_v21 = vmul.f32 0.1, %v4835_v8  ;;  %vm4876_vm10 = vcmp.ge.f32.partialorder %v4844_v30, 0.0  ;;  %v4908_v3 = vmul.f32 0.1, %v4844_v30  ;;  %5150 = vmatmul.msk.f32.gmra.mxu3 %vm9653_vm9, %v4612_v56 }
 0x616   : > { %v5686_v56 = vld [vmem:[%s5800_s28 + $0x38] sm:$0xff] }
 0x617   : > { %v4931_v20 = vsel %vm4867_vm2, %v4835_v8, %v4899_v21  ;;  %v4940_v50 = vsel %vm4876_vm10, %v4844_v30, %v4908_v3  ;;  %vm9661_vm2 = vmmov %vm9657_vm0  ;;  %vm4551_vm10 = vcmp.ge.f32.partialorder %v8854_v45, 0.0  ;;  %v5687_v3 = vld [vmem:[%s5800_s28 + $0x80] sm:$0xff] }
 0x618   : > { %4963 = vst.msk [vmem:[%s8935_s19 + $0x10] sm:$0xff] %vm9654_vm5, %v4931_v20  ;;  %v4746_v10 = vpop.f32.mrf.mxu2  ;;  %v4773_v18 = vpop.f32.mrf.mxu3  ;;  %v4615_v26 = vsel %vm4551_vm10, %v8854_v45, %v4583_v27  ;;  %vm9668_vm10 = vmmov %vm9657_vm0 }
 0x619   : > { %4972 = vst.msk [vmem:[%s8935_s19 + $0x58] sm:$0xff] %vm9655_vm3, %v4940_v50  ;;  %v4747_v47 = vadd.f32 %v8921_v5, %v4746_v10  ;;  %v4774_v24 = vadd.f32 %v8921_v5, %v4773_v18  ;;  %vm9662_vm3 = vmmov %vm9656_vm13 }
 0x61b   : > { %v4836_v38 = vadd.f32 %v5678_v19, %v4747_v47  ;;  %v4845_v57 = vadd.f32 %v5679_v52, %v4774_v24  ;;  %v5688_v52 = vld [vmem:[%s5800_s28 + $0x40] sm:$0xff] }
 0x61d   : > { %vm4868_vm6 = vcmp.ge.f32.partialorder %v4836_v38, 0.0  ;;  %v4900_v1 = vmul.f32 0.1, %v4836_v38  ;;  %vm4877_vm8 = vcmp.ge.f32.partialorder %v4845_v57, 0.0  ;;  %v4909_v31 = vmul.f32 0.1, %v4845_v57  ;;  %5151 = vmatmul.msk.f32.gmra.mxu3 %vm9656_vm13, %v4613_v2 }
 0x61e   : > { %v5689_v2 = vld [vmem:[%s5800_s28 + $0x88] sm:$0xff] }
 0x61f   : > { %v4932_v37 = vsel %vm4868_vm6, %v4836_v38, %v4900_v1  ;;  %v4941_v46 = vsel %vm4877_vm8, %v4845_v57, %v4909_v31  ;;  %vm9664_vm6 = vmmov %vm9657_vm0 }
 0x620   : > { %4964 = vst.msk [vmem:[%s8935_s19 + $0x18] sm:$0xff] %vm9657_vm0, %v4932_v37  ;;  %v4749_v0 = vpop.f32.mrf.mxu2  ;;  %v4776_v32 = vpop.f32.mrf.mxu3 }
 0x621   : > { %4973 = vst.msk [vmem:[%s8935_s19 + $0x60] sm:$0xff] %vm9658_vm1, %v4941_v46  ;;  %v4750_v54 = vadd.f32 %v8921_v5, %v4749_v0  ;;  %v4777_v48 = vadd.f32 %v8921_v5, %v4776_v32  ;;  %vm9665_vm1 = vmmov %vm9657_vm0 }
 0x623   : > { %v4837_v7 = vadd.f32 %v5680_v9, %v4750_v54  ;;  %v4846_v53 = vadd.f32 %v5681_v16, %v4777_v48  ;;  %v5690_v54 = vld [vmem:[%s5800_s28 + $0x90] sm:$0xff] }
 0x625   : > { %vm4869_vm11 = vcmp.ge.f32.partialorder %v4837_v7, 0.0  ;;  %v4901_v59 = vmul.f32 0.1, %v4837_v7  ;;  %vm4878_vm15 = vcmp.ge.f32.partialorder %v4846_v53, 0.0  ;;  %v4910_v41 = vmul.f32 0.1, %v4846_v53  ;;  %5152 = vmatmul.msk.f32.gmra.mxu3 %vm9659_vm14, %v4614_v36  ;;  %vm9667_vm14 = vmmov %vm9657_vm0 }
 0x626   : > { %v5691_v36 = vld [vmem:[%s5800_s28 + $0x98] sm:$0xff] }
 0x627   : > { %v4933_v60 = vsel %vm4869_vm11, %v4837_v7, %v4901_v59  ;;  %v4942_v44 = vsel %vm4878_vm15, %v4846_v53, %v4910_v41  ;;  %vm9666_vm15 = vmmov %vm9657_vm0 }
 0x628   : > { %4965 = vst.msk [vmem:[%s8935_s19 + $0x20] sm:$0xff] %vm9660_vm7, %v4933_v60  ;;  %v4752_v39 = vpop.f32.mrf.mxu2  ;;  %v4779_v17 = vpop.f32.mrf.mxu3 }
 0x629   : > { %4974 = vst.msk [vmem:[%s8935_s19 + $0x68] sm:$0xff] %vm9661_vm2, %v4942_v44  ;;  %v4753_v13 = vadd.f32 %v8921_v5, %v4752_v39  ;;  %v4780_v34 = vadd.f32 %v8921_v5, %v4779_v17  ;;  %v5692_v17 = vld [vmem:[%s5800_s28 + $0xa0] sm:$0xff] }
 0x62b   : > { %v4838_v42 = vadd.f32 %v5682_v28, %v4753_v13  ;;  %v4847_v62 = vadd.f32 %v5683_v4, %v4780_v34  ;;  %v5693_v4 = vld [vmem:[%s5800_s28 + $0xa8] sm:$0xff] }
 0x62d   : > { %vm4870_vm9 = vcmp.ge.f32.partialorder %v4838_v42, 0.0  ;;  %v4902_v14 = vmul.f32 0.1, %v4838_v42  ;;  %vm4879_vm5 = vcmp.ge.f32.partialorder %v4847_v62, 0.0  ;;  %v4911_v40 = vmul.f32 0.1, %v4847_v62  ;;  %5153 = vmatmul.msk.f32.gmra.mxu3 %vm9662_vm3, %v4615_v26  ;;  %vm9670_vm3 = vmmov %vm9657_vm0 }
 0x62f   : > { %v4934_v12 = vsel %vm4870_vm9, %v4838_v42, %v4902_v14  ;;  %v4943_v11 = vsel %vm4879_vm5, %v4847_v62, %v4911_v40  ;;  %vm9669_vm9 = vmmov %vm9657_vm0 }
 0x630   : > { %4966 = vst.msk [vmem:[%s8935_s19 + $0x28] sm:$0xff] %vm9663_vm4, %v4934_v12  ;;  %v4755_v23 = vpop.f32.mrf.mxu2  ;;  %v4782_v58 = vpop.f32.mrf.mxu3 }
 0x631   : > { %4975 = vst.msk [vmem:[%s8935_s19 + $0x70] sm:$0xff] %vm9664_vm6, %v4943_v11  ;;  %v4756_v49 = vadd.f32 %v8921_v5, %v4755_v23  ;;  %v4783_v45 = vadd.f32 %v8921_v5, %v4782_v58  ;;  %vm9671_vm6 = vmmov %vm9657_vm0  ;;  %v5694_v11 = vld [vmem:[%s5800_s28 + $0xb0] sm:$0xff] }
 0x633   : > { %v4839_v6 = vadd.f32 %v5684_v25, %v4756_v49  ;;  %v4848_v55 = vadd.f32 %v5685_v35, %v4783_v45 }
 0x635   : > { %vm4871_vm8 = vcmp.ge.f32.partialorder %v4839_v6, 0.0  ;;  %v4903_v29 = vmul.f32 0.1, %v4839_v6  ;;  %vm4880_vm13 = vcmp.ge.f32.partialorder %v4848_v55, 0.0  ;;  %v4912_v15 = vmul.f32 0.1, %v4848_v55 }
 0x637   : > { %v4935_v51 = vsel %vm4871_vm8, %v4839_v6, %v4903_v29  ;;  %v4944_v61 = vsel %vm4880_vm13, %v4848_v55, %v4912_v15  ;;  %vm9672_vm13 = vmmov %vm9657_vm0  ;;  %v5695_v6 = vld [vmem:[%s5800_s28 + $0xb8] sm:$0xff] }
 0x638   : > { %4967 = vst.msk [vmem:[%s8935_s19 + $0x30] sm:$0xff] %vm9657_vm0, %v4935_v51  ;;  %v4758_v22 = vpop.f32.mrf.mxu2  ;;  %v4785_v8 = vpop.f32.mrf.mxu3 }
 0x639   : > { %4976 = vst.msk [vmem:[%s8935_s19 + $0x78] sm:$0xff] %vm9665_vm1, %v4944_v61  ;;  %v4759_v33 = vadd.f32 %v8921_v5, %v4758_v22  ;;  %v4786_v30 = vadd.f32 %v8921_v5, %v4785_v8  ;;  %v5696_v61 = vld [vmem:[%s5800_s28 + $0xc0] sm:$0xff] }
 0x63b   : > { %v4840_v21 = vadd.f32 %v5686_v56, %v4759_v33  ;;  %v4849_v20 = vadd.f32 %v5687_v3, %v4786_v30 }
 0x63d   : > { %vm4872_vm12 = vcmp.ge.f32.partialorder %v4840_v21, 0.0  ;;  %v4904_v50 = vmul.f32 0.1, %v4840_v21  ;;  %vm4881_vm11 = vcmp.ge.f32.partialorder %v4849_v20, 0.0  ;;  %v4913_v10 = vmul.f32 0.1, %v4849_v20 }
 0x63f   : > { %v4936_v18 = vsel %vm4872_vm12, %v4840_v21, %v4904_v50  ;;  %v4945_v63 = vsel %vm4881_vm11, %v4849_v20, %v4913_v10  ;;  %vm9673_vm11 = vmmov %vm9665_vm1  ;;  %v5697_v21 = vld [vmem:[%s5800_s28 + $0xc8] sm:$0xff] }
 0x640   : > { %4968 = vst.msk [vmem:[%s8935_s19 + $0x38] sm:$0xff] %vm9666_vm15, %v4936_v18  ;;  %v4761_v47 = vpop.f32.mrf.mxu2  ;;  %v4788_v24 = vpop.f32.mrf.mxu3 }
 0x641   : > { %4977 = vst.msk [vmem:[%s8935_s19 + $0x80] sm:$0xff] %vm9667_vm14, %v4945_v63  ;;  %v4762_v19 = vadd.f32 %v8921_v5, %v4761_v47  ;;  %v4789_v38 = vadd.f32 %v8921_v5, %v4788_v24  ;;  %vm9674_vm14 = vmmov %vm9665_vm1  ;;  %v5698_v63 = vld [vmem:[%s5800_s28 + $0xd0] sm:$0xff] }
 0x643   : > { %v4841_v57 = vadd.f32 %v5688_v52, %v4762_v19  ;;  %v4850_v1 = vadd.f32 %v5689_v2, %v4789_v38 }
 0x645   : > { %vm4873_vm7 = vcmp.ge.f32.partialorder %v4841_v57, 0.0  ;;  %v4905_v31 = vmul.f32 0.1, %v4841_v57  ;;  %vm4882_vm2 = vcmp.ge.f32.partialorder %v4850_v1, 0.0  ;;  %v4914_v37 = vmul.f32 0.1, %v4850_v1 }
 0x647   : > { %v4937_v46 = vsel %vm4873_vm7, %v4841_v57, %v4905_v31  ;;  %v4946_v0 = vsel %vm4882_vm2, %v4850_v1, %v4914_v37  ;;  %vm9675_vm2 = vmmov %vm9665_vm1  ;;  %v5699_v57 = vld [vmem:[%s5800_s28 + $0xd8] sm:$0xff] }
 0x648   : > { %4969 = vst.msk [vmem:[%s8935_s19 + $0x40] sm:$0xff] %vm9668_vm10, %v4937_v46  ;;  %v4791_v32 = vpop.f32.mrf.mxu3 }
 0x649   : > { %4978 = vst.msk [vmem:[%s8935_s19 + $0x88] sm:$0xff] %vm9669_vm9, %v4946_v0  ;;  %v4792_v43 = vadd.f32 %v8921_v5, %v4791_v32  ;;  %vm9676_vm9 = vmmov %vm9665_vm1  ;;  %v5700_v0 = vld [vmem:[%s5800_s28 + $0xe0] sm:$0xff] }
 0x64b   : > { %v4851_v48 = vadd.f32 %v5690_v54, %v4792_v43 }
 0x64d   : > { %vm4883_vm5 = vcmp.ge.f32.partialorder %v4851_v48, 0.0  ;;  %v4915_v9 = vmul.f32 0.1, %v4851_v48 }
 0x64f   : > { %v4947_v7 = vsel %vm4883_vm5, %v4851_v48, %v4915_v9 }
 0x650   : > { %4979 = vst.msk [vmem:[%s8935_s19 + $0x90] sm:$0xff] %vm9670_vm3, %v4947_v7  ;;  %v4794_v16 = vpop.f32.mrf.mxu3  ;;  %vm9677_vm3 = vmmov %vm9665_vm1  ;;  %v5701_v7 = vld [vmem:[%s5800_s28 + $0xe8] sm:$0xff] }
 0x651   : > { %v4795_v53 = vadd.f32 %v8921_v5, %v4794_v16 }
 0x653   : > { %v4852_v59 = vadd.f32 %v5691_v36, %v4795_v53 }
 0x655   : > { %vm4884_vm4 = vcmp.ge.f32.partialorder %v4852_v59, 0.0  ;;  %v4916_v41 = vmul.f32 0.1, %v4852_v59 }
 0x657   : > { %v4948_v60 = vsel %vm4884_vm4, %v4852_v59, %v4916_v41 }
 0x658   : > { %4980 = vst.msk [vmem:[%s8935_s19 + $0x98] sm:$0xff] %vm9671_vm6, %v4948_v60  ;;  %v4797_v44 = vpop.f32.mrf.mxu3  ;;  %vm9678_vm6 = vmmov %vm9665_vm1  ;;  %v5702_v60 = vld [vmem:[%s5800_s28 + $0xf0] sm:$0xff] }
 0x659   : > { %v4798_v39 = vadd.f32 %v8921_v5, %v4797_v44 }
 0x65b   : > { %v4853_v27 = vadd.f32 %v5692_v17, %v4798_v39 }
 0x65d   : > { %vm4885_vm8 = vcmp.ge.f32.partialorder %v4853_v27, 0.0  ;;  %v4917_v13 = vmul.f32 0.1, %v4853_v27 }
 0x65f   : > { %v4949_v34 = vsel %vm4885_vm8, %v4853_v27, %v4917_v13 }
 0x660   : > { %4981 = vst.msk [vmem:[%s8935_s19 + $0xa0] sm:$0xff] %vm9672_vm13, %v4949_v34  ;;  %v4800_v28 = vpop.f32.mrf.mxu3  ;;  %vm9679_vm13 = vmmov %vm9665_vm1  ;;  %v5703_v34 = vld [vmem:[%s5800_s28 + $0xf8] sm:$0xff] }
 0x661   : > { %v4801_v42 = vadd.f32 %v8921_v5, %v4800_v28 }
 0x663   : > { %v4854_v62 = vadd.f32 %v5693_v4, %v4801_v42 }
 0x665   : > { %vm4886_vm0 = vcmp.ge.f32.partialorder %v4854_v62, 0.0  ;;  %v4918_v26 = vmul.f32 0.1, %v4854_v62 }
 0x667   : > { %v4950_v14 = vsel %vm4886_vm0, %v4854_v62, %v4918_v26 }
 0x668   : > { %4982 = vst.msk [vmem:[%s8935_s19 + $0xa8] sm:$0xff] %vm9665_vm1, %v4950_v14  ;;  %v4803_v40 = vpop.f32.mrf.mxu3 }
 0x669   : > { %v4804_v12 = vadd.f32 %v8921_v5, %v4803_v40 }
 0x66b   : > { %v4855_v23 = vadd.f32 %v5694_v11, %v4804_v12 }
 0x66d   : > { %vm4887_vm12 = vcmp.ge.f32.partialorder %v4855_v23, 0.0  ;;  %v4919_v58 = vmul.f32 0.1, %v4855_v23 }
 0x66f   : > { %v4951_v49 = vsel %vm4887_vm12, %v4855_v23, %v4919_v58 }
 0x670   : > { %4983 = vst.msk [vmem:[%s8935_s19 + $0xb0] sm:$0xff] %vm9673_vm11, %v4951_v49  ;;  %v4806_v45 = vpop.f32.mrf.mxu3  ;;  %vm9680_vm11 = vmmov %vm9665_vm1 }
 0x671   : > { %v4807_v25 = vadd.f32 %v8921_v5, %v4806_v45 }
 0x673   : > { %v4856_v35 = vadd.f32 %v5695_v6, %v4807_v25 }
 0x675   : > { %vm4888_vm15 = vcmp.ge.f32.partialorder %v4856_v35, 0.0  ;;  %v4920_v55 = vmul.f32 0.1, %v4856_v35 }
 0x677   : > { %v4952_v29 = vsel %vm4888_vm15, %v4856_v35, %v4920_v55 }
 0x678   : > { %4984 = vst.msk [vmem:[%s8935_s19 + $0xb8] sm:$0xff] %vm9674_vm14, %v4952_v29  ;;  %v4809_v15 = vpop.f32.mrf.mxu3  ;;  %vm9681_vm14 = vmmov %vm9665_vm1 }
 0x679   : > { %v4810_v51 = vadd.f32 %v8921_v5, %v4809_v15 }
 0x67b   : > { %v4857_v22 = vadd.f32 %v5696_v61, %v4810_v51 }
 0x67d   : > { %vm4889_vm7 = vcmp.ge.f32.partialorder %v4857_v22, 0.0  ;;  %v4921_v8 = vmul.f32 0.1, %v4857_v22 }
 0x67f   : > { %v4953_v33 = vsel %vm4889_vm7, %v4857_v22, %v4921_v8 }
 0x680   : > { %4985 = vst.msk [vmem:[%s8935_s19 + $0xc0] sm:$0xff] %vm9675_vm2, %v4953_v33  ;;  %v4812_v30 = vpop.f32.mrf.mxu3 }
 0x681   : > { %v4813_v56 = vadd.f32 %v8921_v5, %v4812_v30 }
 0x683   : > { %v4858_v3 = vadd.f32 %v5697_v21, %v4813_v56 }
 0x685   : > { %vm4890_vm10 = vcmp.ge.f32.partialorder %v4858_v3, 0.0  ;;  %v4922_v20 = vmul.f32 0.1, %v4858_v3 }
 0x687   : > { %v4954_v50 = vsel %vm4890_vm10, %v4858_v3, %v4922_v20 }
 0x688   : > { %4986 = vst.msk [vmem:[%s8935_s19 + $0xc8] sm:$0xff] %vm9676_vm9, %v4954_v50  ;;  %v4815_v10 = vpop.f32.mrf.mxu3 }
 0x689   : > { %v4816_v18 = vadd.f32 %v8921_v5, %v4815_v10 }
 0x68b   : > { %v4859_v47 = vadd.f32 %v5698_v63, %v4816_v18 }
 0x68d   : > { %vm4891_vm5 = vcmp.ge.f32.partialorder %v4859_v47, 0.0  ;;  %v4923_v24 = vmul.f32 0.1, %v4859_v47 }
 0x68f   : > { %v4955_v19 = vsel %vm4891_vm5, %v4859_v47, %v4923_v24 }
 0x690   : > { %4987 = vst.msk [vmem:[%s8935_s19 + $0xd0] sm:$0xff] %vm9677_vm3, %v4955_v19  ;;  %v4818_v38 = vpop.f32.mrf.mxu3 }
 0x691   : > { %v4819_v52 = vadd.f32 %v8921_v5, %v4818_v38 }
 0x693   : > { %v4860_v2 = vadd.f32 %v5699_v57, %v4819_v52 }
 0x695   : > { %vm4892_vm4 = vcmp.ge.f32.partialorder %v4860_v2, 0.0  ;;  %v4924_v1 = vmul.f32 0.1, %v4860_v2 }
 0x697   : > { %v4956_v31 = vsel %vm4892_vm4, %v4860_v2, %v4924_v1 }
 0x698   : > { %4988 = vst.msk [vmem:[%s8935_s19 + $0xd8] sm:$0xff] %vm9678_vm6, %v4956_v31  ;;  %v4821_v37 = vpop.f32.mrf.mxu3 }
 0x699   : > { %v4822_v46 = vadd.f32 %v8921_v5, %v4821_v37 }
 0x69b   : > { %v4861_v32 = vadd.f32 %v5700_v0, %v4822_v46 }
 0x69d   : > { %vm4893_vm8 = vcmp.ge.f32.partialorder %v4861_v32, 0.0  ;;  %v4925_v43 = vmul.f32 0.1, %v4861_v32 }
 0x69f   : > { %v4957_v54 = vsel %vm4893_vm8, %v4861_v32, %v4925_v43 }
 0x6a0   : > { %4989 = vst.msk [vmem:[%s8935_s19 + $0xe0] sm:$0xff] %vm9679_vm13, %v4957_v54  ;;  %v4824_v48 = vpop.f32.mrf.mxu3 }
 0x6a1   : > { %v4825_v9 = vadd.f32 %v8921_v5, %v4824_v48 }
 0x6a3   : > { %v4862_v16 = vadd.f32 %v5701_v7, %v4825_v9 }
 0x6a5   : > { %vm4894_vm0 = vcmp.ge.f32.partialorder %v4862_v16, 0.0  ;;  %v4926_v53 = vmul.f32 0.1, %v4862_v16 }
 0x6a7   : > { %v4958_v36 = vsel %vm4894_vm0, %v4862_v16, %v4926_v53 }
 0x6a8   : > { %4990 = vst.msk [vmem:[%s8935_s19 + $0xe8] sm:$0xff] %vm9665_vm1, %v4958_v36  ;;  %v4827_v59 = vpop.f32.mrf.mxu3 }
 0x6a9   : > { %v4828_v41 = vadd.f32 %v8921_v5, %v4827_v59 }
 0x6ab   : > { %v4863_v44 = vadd.f32 %v5702_v60, %v4828_v41 }
 0x6ad   : > { %vm4895_vm12 = vcmp.ge.f32.partialorder %v4863_v44, 0.0  ;;  %v4927_v39 = vmul.f32 0.1, %v4863_v44 }
 0x6af   : > { %v4959_v17 = vsel %vm4895_vm12, %v4863_v44, %v4927_v39 }
 0x6b0   : > { %4991 = vst.msk [vmem:[%s8935_s19 + $0xf0] sm:$0xff] %vm9680_vm11, %v4959_v17  ;;  %v4830_v27 = vpop.f32.mrf.mxu3 }
 0x6b1   : > { %v4831_v13 = vadd.f32 %v8921_v5, %v4830_v27 }
 0x6b3   : > { %v4864_v28 = vadd.f32 %v5703_v34, %v4831_v13 }
 0x6b5   : > { %vm4896_vm15 = vcmp.ge.f32.partialorder %v4864_v28, 0.0  ;;  %v4928_v42 = vmul.f32 0.1, %v4864_v28 }
 0x6b7   : > { %v4960_v4 = vsel %vm4896_vm15, %v4864_v28, %v4928_v42 }
 0x6b8   : > { %4992 = vst.msk [vmem:[%s8935_s19 + $0xf8] sm:$0xff] %vm9681_vm14, %v4960_v4 }
 0x6b9 PF: > { %s22_s21 = sadd.s32 1, %s5710_s21  }
 0x6ba   : > { %p19_p4 = scmp.ge.s32.totalorder %s22_s21, 4  }
 0x6bc   :  { %21 = sbr.rel (!%p19_p4) target bundleno = 1 (0x1), region = 98 }

</bundles_post_ra>
